<compile_context>
chip_gen: v7x
topology: tpu7x:2x2x1
jax: 0.10.0
libtpu: 0.0.40
codegen_flags: <defaults>
</compile_context>

<pallas_src>
import jax
import jax.numpy as jnp
from jax import lax
from jax.experimental import pallas as pl
from jax.experimental.pallas import tpu as pltpu

EPS = 1e-5                      # nn.BatchNorm2d default eps
LANE = 128                      # TPU lane width
TILE_M = 128                    # pass-2 row tile (raise toward 512-2048 for production sizes)
VMEM_LIMIT = 32 * 1024 * 1024   # explicit scoped-VMEM budget (tiles here are tiny)


def conv_block_forward(x, weight, bias, gamma, beta, stride):
    """x: (N, C_in, H, W) float32 (NCHW, like PyTorch). Returns (N, C_out, OH, OW)."""
    N, C_in, H, W = x.shape
    C_out, C_in_w, KH, KW = weight.shape
    assert C_in == C_in_w
    OH = (H - KH) // stride + 1
    OW = (W - KW) // stride + 1
    M = N * OH * OW
    C_pad = ((C_out + LANE - 1) // LANE) * LANE   # lane-dense padded channel dim

    # ---- glue: layout prep (no data duplication; activation is read once) ----
    x_nhwc = jnp.transpose(x, (0, 2, 3, 1)).astype(jnp.float32)          # (N, H, W, C_in)
    # weight (C_out, C_in, KH, KW) -> per-tap (KH*KW, C_in, C_pad), zero-padded channels
    w_taps = jnp.transpose(weight, (2, 3, 1, 0)).reshape(KH * KW, C_in, C_out)
    w_taps = jnp.pad(w_taps, ((0, 0), (0, 0), (0, C_pad - C_out))).astype(jnp.float32)
    # `bias` intentionally unused: a per-channel constant added before train-mode BN is
    # removed exactly by the mean subtraction and leaves the variance unchanged.
    del bias

    # ---------- pass 1: conv (per-tap matmuls) + per-image BN statistics ----------
    def conv_stats_kernel(x_ref, w_ref, y_ref, stats_ref):
        # x_ref:     (1, H, W, C_in)        one image, resident in VMEM
        # w_ref:     (KH*KW, C_in, C_pad)   all taps, resident across the grid
        # y_ref:     (1, OH, OW, C_pad)     conv output (channel-padded, lane-dense)
        # stats_ref: (1, 2, C_pad)          [sum, sum-of-squares] over this image
        sum_acc = jnp.zeros((1, C_pad), jnp.float32)
        sq_acc = jnp.zeros((1, C_pad), jnp.float32)
        # TODO(synk): for images too large for one VMEM block, add an OH-tile grid axis
        # with halo rows fetched via manual pltpu.make_async_copy.
        for oh in range(OH):
            acc = jnp.zeros((OW, C_pad), jnp.float32)
            for kh in range(KH):
                row = x_ref[0, oh * stride + kh]                            # (W, C_in)
                for kw in range(KW):
                    xs = row[kw: kw + stride * (OW - 1) + 1: stride, :]     # (OW, C_in)
                    acc = acc + jnp.dot(xs, w_ref[kh * KW + kw],
                                        preferred_element_type=jnp.float32)
            y_ref[0, oh] = acc
            sum_acc = sum_acc + jnp.sum(acc, axis=0, keepdims=True)
            sq_acc = sq_acc + jnp.sum(acc * acc, axis=0, keepdims=True)
        stats_ref[0, 0:1, :] = sum_acc
        stats_ref[0, 1:2, :] = sq_acc

    y4, stats = pl.pallas_call(
        conv_stats_kernel,
        out_shape=(
            jax.ShapeDtypeStruct((N, OH, OW, C_pad), jnp.float32),
            jax.ShapeDtypeStruct((N, 2, C_pad), jnp.float32),
        ),
        grid=(N,),
        in_specs=[
            pl.BlockSpec((1, H, W, C_in), lambda n: (n, 0, 0, 0)),
            pl.BlockSpec((KH * KW, C_in, C_pad), lambda n: (0, 0, 0)),
        ],
        out_specs=(
            pl.BlockSpec((1, OH, OW, C_pad), lambda n: (n, 0, 0, 0)),
            pl.BlockSpec((1, 2, C_pad), lambda n: (n, 0, 0)),
        ),
        compiler_params=pltpu.CompilerParams(
            dimension_semantics=("parallel",),
            vmem_limit_bytes=VMEM_LIMIT,
        ),
    )(x_nhwc, w_taps)

    # ---- glue: O(C) cross-image stat combine, folded into per-channel scale/shift ----
    tot = jnp.sum(stats, axis=0)                           # (2, C_pad)
    mean = tot[0] / M
    var = jnp.maximum(tot[1] / M - mean * mean, 0.0)       # biased variance (train-mode BN)
    inv = lax.rsqrt(var + EPS)
    gamma_p = jnp.pad(gamma.astype(jnp.float32), (0, C_pad - C_out))
    beta_p = jnp.pad(beta.astype(jnp.float32), (0, C_pad - C_out))
    scale = (gamma_p * inv).reshape(1, C_pad)
    shift = (beta_p - mean * gamma_p * inv).reshape(1, C_pad)

    # ---------- pass 2: M-tiled, lane-dense  y * scale + shift -> ReLU ----------
    def bn_relu_kernel(y_ref, scale_ref, shift_ref, o_ref):
        o_ref[...] = jnp.maximum(y_ref[...] * scale_ref[...] + shift_ref[...], 0.0)

    y2 = y4.reshape(M, C_pad)                              # free row-major reshape
    tile_m = min(TILE_M, ((M + 7) // 8) * 8)               # sublane-aligned row tile
    out2 = pl.pallas_call(
        bn_relu_kernel,
        out_shape=jax.ShapeDtypeStruct((M, C_pad), jnp.float32),
        grid=(pl.cdiv(M, tile_m),),
        in_specs=[
            pl.BlockSpec((tile_m, C_pad), lambda i: (i, 0)),
            pl.BlockSpec((1, C_pad), lambda i: (0, 0)),
            pl.BlockSpec((1, C_pad), lambda i: (0, 0)),
        ],
        out_specs=pl.BlockSpec((tile_m, C_pad), lambda i: (i, 0)),
        compiler_params=pltpu.CompilerParams(
            dimension_semantics=("parallel",),
            vmem_limit_bytes=VMEM_LIMIT,
        ),
    )(y2, scale, shift)

    # ---- glue: drop channel padding, back to NCHW (tiny at these sizes) ----
    out_nhwc = out2.reshape(N, OH, OW, C_pad)[..., :C_out]
    return jnp.transpose(out_nhwc, (0, 3, 1, 2))


def conv_block_reference(x, weight, bias, gamma, beta, stride):
    """Pure-JAX reference matching PyTorch ConvBlock.forward (train-mode BN)."""
    y = lax.conv_general_dilated(
        x, weight, window_strides=(stride, stride), padding="VALID",
        dimension_numbers=("NCHW", "OIHW", "NCHW"),
    ) + bias.reshape(1, -1, 1, 1)
    mean = jnp.mean(y, axis=(0, 2, 3), keepdims=True)
    var = jnp.mean((y - mean) ** 2, axis=(0, 2, 3), keepdims=True)
    y = (y - mean) * lax.rsqrt(var + EPS)
    y = y * gamma.reshape(1, -1, 1, 1) + beta.reshape(1, -1, 1, 1)
    return jnp.maximum(y, 0.0)


if __name__ == "__main__":
    # Small, deterministic config: in_channels=4, out_channels=8, kernel=3, stride=1
    N, C_in, H, W = 2, 4, 16, 16
    C_out, K, STRIDE = 8, 3, 1

    key = jax.random.PRNGKey(0)
    kx, kw, kb = jax.random.split(key, 3)
    x = jax.random.normal(kx, (N, C_in, H, W), dtype=jnp.float32)
    weight = 0.1 * jax.random.normal(kw, (C_out, C_in, K, K), dtype=jnp.float32)
    bias = 0.1 * jax.random.normal(kb, (C_out,), dtype=jnp.float32)
    gamma = jnp.ones((C_out,), dtype=jnp.float32)   # BatchNorm2d default weight
    beta = jnp.zeros((C_out,), dtype=jnp.float32)   # BatchNorm2d default bias

    out = conv_block_forward(x, weight, bias, gamma, beta, STRIDE)
    out = jax.block_until_ready(out)

    ref = conv_block_reference(x, weight, bias, gamma, beta, STRIDE)
    assert out.shape == ref.shape == (N, C_out, (H - K) // STRIDE + 1, (W - K) // STRIDE + 1)
    assert jnp.allclose(out, ref, atol=1e-4, rtol=1e-4), "mismatch vs reference"

    print("KERNEL_OK")
</pallas_src>

<mosaic_0001>
module attributes {stable_mosaic.version = 11 : i64} {
  func.func @conv_stats_kernel(%arg0: i32, %arg1: memref<1x16x16x4xf32, #tpu.memory_space<vmem>>, %arg2: memref<9x4x128xf32, #tpu.memory_space<vmem>>, %arg3: memref<1x14x14x128xf32, #tpu.memory_space<vmem>>, %arg4: memref<1x2x128xf32, #tpu.memory_space<vmem>>) attributes {dimension_semantics = [#tpu.dimension_semantics<parallel>], iteration_bounds = array<i64: 2>, scalar_prefetch = 0 : i64, scratch_operands = 0 : i64, tpu.core_type = #tpu.core_type<tc>, window_params = [{transform_indices = @transform_0, window_bounds = array<i64: 1, 16, 16, 4>}, {pipeline_mode = #tpu.pipeline_mode<synchronous>, transform_indices = @transform_1, window_bounds = array<i64: 9, 4, 128>}, {transform_indices = @transform_2, window_bounds = array<i64: 1, 14, 14, 128>}, {transform_indices = @transform_3, window_bounds = array<i64: 1, 2, 128>}]} {
    %cst = arith.constant 0.000000e+00 : f32
    %0 = vector.broadcast %cst : f32 to vector<1x128xf32>
    %cst_0 = arith.constant 0.000000e+00 : f32
    %1 = vector.broadcast %cst_0 : f32 to vector<1x128xf32>
    %cst_1 = arith.constant 0.000000e+00 : f32
    %2 = vector.broadcast %cst_1 : f32 to vector<14x128xf32>
    %c0 = arith.constant 0 : index
    %c0_2 = arith.constant 0 : index
    %c0_3 = arith.constant 0 : index
    %c0_4 = arith.constant 0 : index
    %3 = vector.load %arg1[%c0, %c0_2, %c0_3, %c0_4] : memref<1x16x16x4xf32, #tpu.memory_space<vmem>>, vector<1x1x16x4xf32>
    %4 = vector.shape_cast %3 : vector<1x1x16x4xf32> to vector<16x4xf32>
    %5 = vector.extract_strided_slice %4 {offsets = [0, 0], sizes = [14, 4], strides = [1, 1]} : vector<16x4xf32> to vector<14x4xf32>
    %c0_5 = arith.constant 0 : index
    %c0_6 = arith.constant 0 : index
    %c0_7 = arith.constant 0 : index
    %6 = vector.load %arg2[%c0_5, %c0_6, %c0_7] : memref<9x4x128xf32, #tpu.memory_space<vmem>>, vector<1x4x128xf32>
    %7 = vector.shape_cast %6 : vector<1x4x128xf32> to vector<4x128xf32>
    %cst_8 = arith.constant dense<0.000000e+00> : vector<14x128xf32>
    %8 = tpu.matmul %5, %7, %cst_8 {dimension_numbers = #tpu.dot_dimension_numbers<[1], [0], [0], [1], [0, 0, 1, 1], [], []>} : vector<14x4xf32>, vector<4x128xf32>, vector<14x128xf32> -> vector<14x128xf32>
    %9 = arith.addf %2, %8 : vector<14x128xf32>
    %10 = vector.extract_strided_slice %4 {offsets = [1, 0], sizes = [14, 4], strides = [1, 1]} : vector<16x4xf32> to vector<14x4xf32>
    %c1 = arith.constant 1 : index
    %c0_9 = arith.constant 0 : index
    %c0_10 = arith.constant 0 : index
    %11 = vector.load %arg2[%c1, %c0_9, %c0_10] : memref<9x4x128xf32, #tpu.memory_space<vmem>>, vector<1x4x128xf32>
    %12 = vector.shape_cast %11 : vector<1x4x128xf32> to vector<4x128xf32>
    %cst_11 = arith.constant dense<0.000000e+00> : vector<14x128xf32>
    %13 = tpu.matmul %10, %12, %cst_11 {dimension_numbers = #tpu.dot_dimension_numbers<[1], [0], [0], [1], [0, 0, 1, 1], [], []>} : vector<14x4xf32>, vector<4x128xf32>, vector<14x128xf32> -> vector<14x128xf32>
    %14 = arith.addf %9, %13 : vector<14x128xf32>
    %15 = vector.extract_strided_slice %4 {offsets = [2, 0], sizes = [14, 4], strides = [1, 1]} : vector<16x4xf32> to vector<14x4xf32>
    %c2 = arith.constant 2 : index
    %c0_12 = arith.constant 0 : index
    %c0_13 = arith.constant 0 : index
    %16 = vector.load %arg2[%c2, %c0_12, %c0_13] : memref<9x4x128xf32, #tpu.memory_space<vmem>>, vector<1x4x128xf32>
    %17 = vector.shape_cast %16 : vector<1x4x128xf32> to vector<4x128xf32>
    %cst_14 = arith.constant dense<0.000000e+00> : vector<14x128xf32>
    %18 = tpu.matmul %15, %17, %cst_14 {dimension_numbers = #tpu.dot_dimension_numbers<[1], [0], [0], [1], [0, 0, 1, 1], [], []>} : vector<14x4xf32>, vector<4x128xf32>, vector<14x128xf32> -> vector<14x128xf32>
    %19 = arith.addf %14, %18 : vector<14x128xf32>
    %c0_15 = arith.constant 0 : index
    %c1_16 = arith.constant 1 : index
    %c0_17 = arith.constant 0 : index
    %c0_18 = arith.constant 0 : index
    %20 = vector.load %arg1[%c0_15, %c1_16, %c0_17, %c0_18] : memref<1x16x16x4xf32, #tpu.memory_space<vmem>>, vector<1x1x16x4xf32>
    %21 = vector.shape_cast %20 : vector<1x1x16x4xf32> to vector<16x4xf32>
    %22 = vector.extract_strided_slice %21 {offsets = [0, 0], sizes = [14, 4], strides = [1, 1]} : vector<16x4xf32> to vector<14x4xf32>
    %c3 = arith.constant 3 : index
    %c0_19 = arith.constant 0 : index
    %c0_20 = arith.constant 0 : index
    %23 = vector.load %arg2[%c3, %c0_19, %c0_20] : memref<9x4x128xf32, #tpu.memory_space<vmem>>, vector<1x4x128xf32>
    %24 = vector.shape_cast %23 : vector<1x4x128xf32> to vector<4x128xf32>
    %cst_21 = arith.constant dense<0.000000e+00> : vector<14x128xf32>
    %25 = tpu.matmul %22, %24, %cst_21 {dimension_numbers = #tpu.dot_dimension_numbers<[1], [0], [0], [1], [0, 0, 1, 1], [], []>} : vector<14x4xf32>, vector<4x128xf32>, vector<14x128xf32> -> vector<14x128xf32>
    %26 = arith.addf %19, %25 : vector<14x128xf32>
    %27 = vector.extract_strided_slice %21 {offsets = [1, 0], sizes = [14, 4], strides = [1, 1]} : vector<16x4xf32> to vector<14x4xf32>
    %c4 = arith.constant 4 : index
    %c0_22 = arith.constant 0 : index
    %c0_23 = arith.constant 0 : index
    %28 = vector.load %arg2[%c4, %c0_22, %c0_23] : memref<9x4x128xf32, #tpu.memory_space<vmem>>, vector<1x4x128xf32>
    %29 = vector.shape_cast %28 : vector<1x4x128xf32> to vector<4x128xf32>
    %cst_24 = arith.constant dense<0.000000e+00> : vector<14x128xf32>
    %30 = tpu.matmul %27, %29, %cst_24 {dimension_numbers = #tpu.dot_dimension_numbers<[1], [0], [0], [1], [0, 0, 1, 1], [], []>} : vector<14x4xf32>, vector<4x128xf32>, vector<14x128xf32> -> vector<14x128xf32>
    %31 = arith.addf %26, %30 : vector<14x128xf32>
    %32 = vector.extract_strided_slice %21 {offsets = [2, 0], sizes = [14, 4], strides = [1, 1]} : vector<16x4xf32> to vector<14x4xf32>
    %c5 = arith.constant 5 : index
    %c0_25 = arith.constant 0 : index
    %c0_26 = arith.constant 0 : index
    %33 = vector.load %arg2[%c5, %c0_25, %c0_26] : memref<9x4x128xf32, #tpu.memory_space<vmem>>, vector<1x4x128xf32>
    %34 = vector.shape_cast %33 : vector<1x4x128xf32> to vector<4x128xf32>
    %cst_27 = arith.constant dense<0.000000e+00> : vector<14x128xf32>
    %35 = tpu.matmul %32, %34, %cst_27 {dimension_numbers = #tpu.dot_dimension_numbers<[1], [0], [0], [1], [0, 0, 1, 1], [], []>} : vector<14x4xf32>, vector<4x128xf32>, vector<14x128xf32> -> vector<14x128xf32>
    %36 = arith.addf %31, %35 : vector<14x128xf32>
    %c0_28 = arith.constant 0 : index
    %c2_29 = arith.constant 2 : index
    %c0_30 = arith.constant 0 : index
    %c0_31 = arith.constant 0 : index
    %37 = vector.load %arg1[%c0_28, %c2_29, %c0_30, %c0_31] : memref<1x16x16x4xf32, #tpu.memory_space<vmem>>, vector<1x1x16x4xf32>
    %38 = vector.shape_cast %37 : vector<1x1x16x4xf32> to vector<16x4xf32>
    %39 = vector.extract_strided_slice %38 {offsets = [0, 0], sizes = [14, 4], strides = [1, 1]} : vector<16x4xf32> to vector<14x4xf32>
    %c6 = arith.constant 6 : index
    %c0_32 = arith.constant 0 : index
    %c0_33 = arith.constant 0 : index
    %40 = vector.load %arg2[%c6, %c0_32, %c0_33] : memref<9x4x128xf32, #tpu.memory_space<vmem>>, vector<1x4x128xf32>
    %41 = vector.shape_cast %40 : vector<1x4x128xf32> to vector<4x128xf32>
    %cst_34 = arith.constant dense<0.000000e+00> : vector<14x128xf32>
    %42 = tpu.matmul %39, %41, %cst_34 {dimension_numbers = #tpu.dot_dimension_numbers<[1], [0], [0], [1], [0, 0, 1, 1], [], []>} : vector<14x4xf32>, vector<4x128xf32>, vector<14x128xf32> -> vector<14x128xf32>
    %43 = arith.addf %36, %42 : vector<14x128xf32>
    %44 = vector.extract_strided_slice %38 {offsets = [1, 0], sizes = [14, 4], strides = [1, 1]} : vector<16x4xf32> to vector<14x4xf32>
    %c7 = arith.constant 7 : index
    %c0_35 = arith.constant 0 : index
    %c0_36 = arith.constant 0 : index
    %45 = vector.load %arg2[%c7, %c0_35, %c0_36] : memref<9x4x128xf32, #tpu.memory_space<vmem>>, vector<1x4x128xf32>
    %46 = vector.shape_cast %45 : vector<1x4x128xf32> to vector<4x128xf32>
    %cst_37 = arith.constant dense<0.000000e+00> : vector<14x128xf32>
    %47 = tpu.matmul %44, %46, %cst_37 {dimension_numbers = #tpu.dot_dimension_numbers<[1], [0], [0], [1], [0, 0, 1, 1], [], []>} : vector<14x4xf32>, vector<4x128xf32>, vector<14x128xf32> -> vector<14x128xf32>
    %48 = arith.addf %43, %47 : vector<14x128xf32>
    %49 = vector.extract_strided_slice %38 {offsets = [2, 0], sizes = [14, 4], strides = [1, 1]} : vector<16x4xf32> to vector<14x4xf32>
    %c8 = arith.constant 8 : index
    %c0_38 = arith.constant 0 : index
    %c0_39 = arith.constant 0 : index
    %50 = vector.load %arg2[%c8, %c0_38, %c0_39] : memref<9x4x128xf32, #tpu.memory_space<vmem>>, vector<1x4x128xf32>
    %51 = vector.shape_cast %50 : vector<1x4x128xf32> to vector<4x128xf32>
    %cst_40 = arith.constant dense<0.000000e+00> : vector<14x128xf32>
    %52 = tpu.matmul %49, %51, %cst_40 {dimension_numbers = #tpu.dot_dimension_numbers<[1], [0], [0], [1], [0, 0, 1, 1], [], []>} : vector<14x4xf32>, vector<4x128xf32>, vector<14x128xf32> -> vector<14x128xf32>
    %53 = arith.addf %48, %52 : vector<14x128xf32>
    %c0_41 = arith.constant 0 : index
    %c0_42 = arith.constant 0 : index
    %c0_43 = arith.constant 0 : index
    %c0_44 = arith.constant 0 : index
    %54 = vector.load %arg3[%c0_41, %c0_42, %c0_43, %c0_44] : memref<1x14x14x128xf32, #tpu.memory_space<vmem>>, vector<1x1x14x128xf32>
    %55 = vector.shape_cast %54 : vector<1x1x14x128xf32> to vector<14x128xf32>
    %56 = vector.shape_cast %53 : vector<14x128xf32> to vector<1x1x14x128xf32>
    tpu.vector_store %arg3[%c0_41, %c0_42, %c0_43, %c0_44], %56 {strides = array<i32>} : memref<1x14x14x128xf32, #tpu.memory_space<vmem>>, vector<1x1x14x128xf32>,
    %cst_45 = arith.constant dense<0.000000e+00> : vector<128xf32>
    %57 = vector.multi_reduction <add>, %53, %cst_45 [0] : vector<14x128xf32> to vector<128xf32>
    %58 = vector.shape_cast %57 : vector<128xf32> to vector<1x128xf32>
    %59 = arith.addf %0, %58 : vector<1x128xf32>
    %60 = arith.mulf %53, %53 : vector<14x128xf32>
    %cst_46 = arith.constant dense<0.000000e+00> : vector<128xf32>
    %61 = vector.multi_reduction <add>, %60, %cst_46 [0] : vector<14x128xf32> to vector<128xf32>
    %62 = vector.shape_cast %61 : vector<128xf32> to vector<1x128xf32>
    %63 = arith.addf %1, %62 : vector<1x128xf32>
    %cst_47 = arith.constant 0.000000e+00 : f32
    %64 = vector.broadcast %cst_47 : f32 to vector<14x128xf32>
    %c0_48 = arith.constant 0 : index
    %c1_49 = arith.constant 1 : index
    %c0_50 = arith.constant 0 : index
    %c0_51 = arith.constant 0 : index
    %65 = vector.load %arg1[%c0_48, %c1_49, %c0_50, %c0_51] : memref<1x16x16x4xf32, #tpu.memory_space<vmem>>, vector<1x1x16x4xf32>
    %66 = vector.shape_cast %65 : vector<1x1x16x4xf32> to vector<16x4xf32>
    %67 = vector.extract_strided_slice %66 {offsets = [0, 0], sizes = [14, 4], strides = [1, 1]} : vector<16x4xf32> to vector<14x4xf32>
    %c0_52 = arith.constant 0 : index
    %c0_53 = arith.constant 0 : index
    %c0_54 = arith.constant 0 : index
    %68 = vector.load %arg2[%c0_52, %c0_53, %c0_54] : memref<9x4x128xf32, #tpu.memory_space<vmem>>, vector<1x4x128xf32>
    %69 = vector.shape_cast %68 : vector<1x4x128xf32> to vector<4x128xf32>
    %cst_55 = arith.constant dense<0.000000e+00> : vector<14x128xf32>
    %70 = tpu.matmul %67, %69, %cst_55 {dimension_numbers = #tpu.dot_dimension_numbers<[1], [0], [0], [1], [0, 0, 1, 1], [], []>} : vector<14x4xf32>, vector<4x128xf32>, vector<14x128xf32> -> vector<14x128xf32>
    %71 = arith.addf %64, %70 : vector<14x128xf32>
    %72 = vector.extract_strided_slice %66 {offsets = [1, 0], sizes = [14, 4], strides = [1, 1]} : vector<16x4xf32> to vector<14x4xf32>
    %c1_56 = arith.constant 1 : index
    %c0_57 = arith.constant 0 : index
    %c0_58 = arith.constant 0 : index
    %73 = vector.load %arg2[%c1_56, %c0_57, %c0_58] : memref<9x4x128xf32, #tpu.memory_space<vmem>>, vector<1x4x128xf32>
    %74 = vector.shape_cast %73 : vector<1x4x128xf32> to vector<4x128xf32>
    %cst_59 = arith.constant dense<0.000000e+00> : vector<14x128xf32>
    %75 = tpu.matmul %72, %74, %cst_59 {dimension_numbers = #tpu.dot_dimension_numbers<[1], [0], [0], [1], [0, 0, 1, 1], [], []>} : vector<14x4xf32>, vector<4x128xf32>, vector<14x128xf32> -> vector<14x128xf32>
    %76 = arith.addf %71, %75 : vector<14x128xf32>
    %77 = vector.extract_strided_slice %66 {offsets = [2, 0], sizes = [14, 4], strides = [1, 1]} : vector<16x4xf32> to vector<14x4xf32>
    %c2_60 = arith.constant 2 : index
    %c0_61 = arith.constant 0 : index
    %c0_62 = arith.constant 0 : index
    %78 = vector.load %arg2[%c2_60, %c0_61, %c0_62] : memref<9x4x128xf32, #tpu.memory_space<vmem>>, vector<1x4x128xf32>
    %79 = vector.shape_cast %78 : vector<1x4x128xf32> to vector<4x128xf32>
    %cst_63 = arith.constant dense<0.000000e+00> : vector<14x128xf32>
    %80 = tpu.matmul %77, %79, %cst_63 {dimension_numbers = #tpu.dot_dimension_numbers<[1], [0], [0], [1], [0, 0, 1, 1], [], []>} : vector<14x4xf32>, vector<4x128xf32>, vector<14x128xf32> -> vector<14x128xf32>
    %81 = arith.addf %76, %80 : vector<14x128xf32>
    %c0_64 = arith.constant 0 : index
    %c2_65 = arith.constant 2 : index
    %c0_66 = arith.constant 0 : index
    %c0_67 = arith.constant 0 : index
    %82 = vector.load %arg1[%c0_64, %c2_65, %c0_66, %c0_67] : memref<1x16x16x4xf32, #tpu.memory_space<vmem>>, vector<1x1x16x4xf32>
    %83 = vector.shape_cast %82 : vector<1x1x16x4xf32> to vector<16x4xf32>
    %84 = vector.extract_strided_slice %83 {offsets = [0, 0], sizes = [14, 4], strides = [1, 1]} : vector<16x4xf32> to vector<14x4xf32>
    %c3_68 = arith.constant 3 : index
    %c0_69 = arith.constant 0 : index
    %c0_70 = arith.constant 0 : index
    %85 = vector.load %arg2[%c3_68, %c0_69, %c0_70] : memref<9x4x128xf32, #tpu.memory_space<vmem>>, vector<1x4x128xf32>
    %86 = vector.shape_cast %85 : vector<1x4x128xf32> to vector<4x128xf32>
    %cst_71 = arith.constant dense<0.000000e+00> : vector<14x128xf32>
    %87 = tpu.matmul %84, %86, %cst_71 {dimension_numbers = #tpu.dot_dimension_numbers<[1], [0], [0], [1], [0, 0, 1, 1], [], []>} : vector<14x4xf32>, vector<4x128xf32>, vector<14x128xf32> -> vector<14x128xf32>
    %88 = arith.addf %81, %87 : vector<14x128xf32>
    %89 = vector.extract_strided_slice %83 {offsets = [1, 0], sizes = [14, 4], strides = [1, 1]} : vector<16x4xf32> to vector<14x4xf32>
    %c4_72 = arith.constant 4 : index
    %c0_73 = arith.constant 0 : index
    %c0_74 = arith.constant 0 : index
    %90 = vector.load %arg2[%c4_72, %c0_73, %c0_74] : memref<9x4x128xf32, #tpu.memory_space<vmem>>, vector<1x4x128xf32>
    %91 = vector.shape_cast %90 : vector<1x4x128xf32> to vector<4x128xf32>
    %cst_75 = arith.constant dense<0.000000e+00> : vector<14x128xf32>
    %92 = tpu.matmul %89, %91, %cst_75 {dimension_numbers = #tpu.dot_dimension_numbers<[1], [0], [0], [1], [0, 0, 1, 1], [], []>} : vector<14x4xf32>, vector<4x128xf32>, vector<14x128xf32> -> vector<14x128xf32>
    %93 = arith.addf %88, %92 : vector<14x128xf32>
    %94 = vector.extract_strided_slice %83 {offsets = [2, 0], sizes = [14, 4], strides = [1, 1]} : vector<16x4xf32> to vector<14x4xf32>
    %c5_76 = arith.constant 5 : index
    %c0_77 = arith.constant 0 : index
    %c0_78 = arith.constant 0 : index
    %95 = vector.load %arg2[%c5_76, %c0_77, %c0_78] : memref<9x4x128xf32, #tpu.memory_space<vmem>>, vector<1x4x128xf32>
    %96 = vector.shape_cast %95 : vector<1x4x128xf32> to vector<4x128xf32>
    %cst_79 = arith.constant dense<0.000000e+00> : vector<14x128xf32>
    %97 = tpu.matmul %94, %96, %cst_79 {dimension_numbers = #tpu.dot_dimension_numbers<[1], [0], [0], [1], [0, 0, 1, 1], [], []>} : vector<14x4xf32>, vector<4x128xf32>, vector<14x128xf32> -> vector<14x128xf32>
    %98 = arith.addf %93, %97 : vector<14x128xf32>
    %c0_80 = arith.constant 0 : index
    %c3_81 = arith.constant 3 : index
    %c0_82 = arith.constant 0 : index
    %c0_83 = arith.constant 0 : index
    %99 = vector.load %arg1[%c0_80, %c3_81, %c0_82, %c0_83] : memref<1x16x16x4xf32, #tpu.memory_space<vmem>>, vector<1x1x16x4xf32>
    %100 = vector.shape_cast %99 : vector<1x1x16x4xf32> to vector<16x4xf32>
    %101 = vector.extract_strided_slice %100 {offsets = [0, 0], sizes = [14, 4], strides = [1, 1]} : vector<16x4xf32> to vector<14x4xf32>
    %c6_84 = arith.constant 6 : index
    %c0_85 = arith.constant 0 : index
    %c0_86 = arith.constant 0 : index
    %102 = vector.load %arg2[%c6_84, %c0_85, %c0_86] : memref<9x4x128xf32, #tpu.memory_space<vmem>>, vector<1x4x128xf32>
    %103 = vector.shape_cast %102 : vector<1x4x128xf32> to vector<4x128xf32>
    %cst_87 = arith.constant dense<0.000000e+00> : vector<14x128xf32>
    %104 = tpu.matmul %101, %103, %cst_87 {dimension_numbers = #tpu.dot_dimension_numbers<[1], [0], [0], [1], [0, 0, 1, 1], [], []>} : vector<14x4xf32>, vector<4x128xf32>, vector<14x128xf32> -> vector<14x128xf32>
    %105 = arith.addf %98, %104 : vector<14x128xf32>
    %106 = vector.extract_strided_slice %100 {offsets = [1, 0], sizes = [14, 4], strides = [1, 1]} : vector<16x4xf32> to vector<14x4xf32>
    %c7_88 = arith.constant 7 : index
    %c0_89 = arith.constant 0 : index
    %c0_90 = arith.constant 0 : index
    %107 = vector.load %arg2[%c7_88, %c0_89, %c0_90] : memref<9x4x128xf32, #tpu.memory_space<vmem>>, vector<1x4x128xf32>
    %108 = vector.shape_cast %107 : vector<1x4x128xf32> to vector<4x128xf32>
    %cst_91 = arith.constant dense<0.000000e+00> : vector<14x128xf32>
    %109 = tpu.matmul %106, %108, %cst_91 {dimension_numbers = #tpu.dot_dimension_numbers<[1], [0], [0], [1], [0, 0, 1, 1], [], []>} : vector<14x4xf32>, vector<4x128xf32>, vector<14x128xf32> -> vector<14x128xf32>
    %110 = arith.addf %105, %109 : vector<14x128xf32>
    %111 = vector.extract_strided_slice %100 {offsets = [2, 0], sizes = [14, 4], strides = [1, 1]} : vector<16x4xf32> to vector<14x4xf32>
    %c8_92 = arith.constant 8 : index
    %c0_93 = arith.constant 0 : index
    %c0_94 = arith.constant 0 : index
    %112 = vector.load %arg2[%c8_92, %c0_93, %c0_94] : memref<9x4x128xf32, #tpu.memory_space<vmem>>, vector<1x4x128xf32>
    %113 = vector.shape_cast %112 : vector<1x4x128xf32> to vector<4x128xf32>
    %cst_95 = arith.constant dense<0.000000e+00> : vector<14x128xf32>
    %114 = tpu.matmul %111, %113, %cst_95 {dimension_numbers = #tpu.dot_dimension_numbers<[1], [0], [0], [1], [0, 0, 1, 1], [], []>} : vector<14x4xf32>, vector<4x128xf32>, vector<14x128xf32> -> vector<14x128xf32>
    %115 = arith.addf %110, %114 : vector<14x128xf32>
    %c0_96 = arith.constant 0 : index
    %c1_97 = arith.constant 1 : index
    %c0_98 = arith.constant 0 : index
    %c0_99 = arith.constant 0 : index
    %116 = vector.load %arg3[%c0_96, %c1_97, %c0_98, %c0_99] : memref<1x14x14x128xf32, #tpu.memory_space<vmem>>, vector<1x1x14x128xf32>
    %117 = vector.shape_cast %116 : vector<1x1x14x128xf32> to vector<14x128xf32>
    %118 = vector.shape_cast %115 : vector<14x128xf32> to vector<1x1x14x128xf32>
    tpu.vector_store %arg3[%c0_96, %c1_97, %c0_98, %c0_99], %118 {strides = array<i32>} : memref<1x14x14x128xf32, #tpu.memory_space<vmem>>, vector<1x1x14x128xf32>,
    %cst_100 = arith.constant dense<0.000000e+00> : vector<128xf32>
    %119 = vector.multi_reduction <add>, %115, %cst_100 [0] : vector<14x128xf32> to vector<128xf32>
    %120 = vector.shape_cast %119 : vector<128xf32> to vector<1x128xf32>
    %121 = arith.addf %59, %120 : vector<1x128xf32>
    %122 = arith.mulf %115, %115 : vector<14x128xf32>
    %cst_101 = arith.constant dense<0.000000e+00> : vector<128xf32>
    %123 = vector.multi_reduction <add>, %122, %cst_101 [0] : vector<14x128xf32> to vector<128xf32>
    %124 = vector.shape_cast %123 : vector<128xf32> to vector<1x128xf32>
    %125 = arith.addf %63, %124 : vector<1x128xf32>
    %cst_102 = arith.constant 0.000000e+00 : f32
    %126 = vector.broadcast %cst_102 : f32 to vector<14x128xf32>
    %c0_103 = arith.constant 0 : index
    %c2_104 = arith.constant 2 : index
    %c0_105 = arith.constant 0 : index
    %c0_106 = arith.constant 0 : index
    %127 = vector.load %arg1[%c0_103, %c2_104, %c0_105, %c0_106] : memref<1x16x16x4xf32, #tpu.memory_space<vmem>>, vector<1x1x16x4xf32>
    %128 = vector.shape_cast %127 : vector<1x1x16x4xf32> to vector<16x4xf32>
    %129 = vector.extract_strided_slice %128 {offsets = [0, 0], sizes = [14, 4], strides = [1, 1]} : vector<16x4xf32> to vector<14x4xf32>
    %c0_107 = arith.constant 0 : index
    %c0_108 = arith.constant 0 : index
    %c0_109 = arith.constant 0 : index
    %130 = vector.load %arg2[%c0_107, %c0_108, %c0_109] : memref<9x4x128xf32, #tpu.memory_space<vmem>>, vector<1x4x128xf32>
    %131 = vector.shape_cast %130 : vector<1x4x128xf32> to vector<4x128xf32>
    %cst_110 = arith.constant dense<0.000000e+00> : vector<14x128xf32>
    %132 = tpu.matmul %129, %131, %cst_110 {dimension_numbers = #tpu.dot_dimension_numbers<[1], [0], [0], [1], [0, 0, 1, 1], [], []>} : vector<14x4xf32>, vector<4x128xf32>, vector<14x128xf32> -> vector<14x128xf32>
    %133 = arith.addf %126, %132 : vector<14x128xf32>
    %134 = vector.extract_strided_slice %128 {offsets = [1, 0], sizes = [14, 4], strides = [1, 1]} : vector<16x4xf32> to vector<14x4xf32>
    %c1_111 = arith.constant 1 : index
    %c0_112 = arith.constant 0 : index
    %c0_113 = arith.constant 0 : index
    %135 = vector.load %arg2[%c1_111, %c0_112, %c0_113] : memref<9x4x128xf32, #tpu.memory_space<vmem>>, vector<1x4x128xf32>
    %136 = vector.shape_cast %135 : vector<1x4x128xf32> to vector<4x128xf32>
    %cst_114 = arith.constant dense<0.000000e+00> : vector<14x128xf32>
    %137 = tpu.matmul %134, %136, %cst_114 {dimension_numbers = #tpu.dot_dimension_numbers<[1], [0], [0], [1], [0, 0, 1, 1], [], []>} : vector<14x4xf32>, vector<4x128xf32>, vector<14x128xf32> -> vector<14x128xf32>
    %138 = arith.addf %133, %137 : vector<14x128xf32>
    %139 = vector.extract_strided_slice %128 {offsets = [2, 0], sizes = [14, 4], strides = [1, 1]} : vector<16x4xf32> to vector<14x4xf32>
    %c2_115 = arith.constant 2 : index
    %c0_116 = arith.constant 0 : index
    %c0_117 = arith.constant 0 : index
    %140 = vector.load %arg2[%c2_115, %c0_116, %c0_117] : memref<9x4x128xf32, #tpu.memory_space<vmem>>, vector<1x4x128xf32>
    %141 = vector.shape_cast %140 : vector<1x4x128xf32> to vector<4x128xf32>
    %cst_118 = arith.constant dense<0.000000e+00> : vector<14x128xf32>
    %142 = tpu.matmul %139, %141, %cst_118 {dimension_numbers = #tpu.dot_dimension_numbers<[1], [0], [0], [1], [0, 0, 1, 1], [], []>} : vector<14x4xf32>, vector<4x128xf32>, vector<14x128xf32> -> vector<14x128xf32>
    %143 = arith.addf %138, %142 : vector<14x128xf32>
    %c0_119 = arith.constant 0 : index
    %c3_120 = arith.constant 3 : index
    %c0_121 = arith.constant 0 : index
    %c0_122 = arith.constant 0 : index
    %144 = vector.load %arg1[%c0_119, %c3_120, %c0_121, %c0_122] : memref<1x16x16x4xf32, #tpu.memory_space<vmem>>, vector<1x1x16x4xf32>
    %145 = vector.shape_cast %144 : vector<1x1x16x4xf32> to vector<16x4xf32>
    %146 = vector.extract_strided_slice %145 {offsets = [0, 0], sizes = [14, 4], strides = [1, 1]} : vector<16x4xf32> to vector<14x4xf32>
    %c3_123 = arith.constant 3 : index
    %c0_124 = arith.constant 0 : index
    %c0_125 = arith.constant 0 : index
    %147 = vector.load %arg2[%c3_123, %c0_124, %c0_125] : memref<9x4x128xf32, #tpu.memory_space<vmem>>, vector<1x4x128xf32>
    %148 = vector.shape_cast %147 : vector<1x4x128xf32> to vector<4x128xf32>
    %cst_126 = arith.constant dense<0.000000e+00> : vector<14x128xf32>
    %149 = tpu.matmul %146, %148, %cst_126 {dimension_numbers = #tpu.dot_dimension_numbers<[1], [0], [0], [1], [0, 0, 1, 1], [], []>} : vector<14x4xf32>, vector<4x128xf32>, vector<14x128xf32> -> vector<14x128xf32>
    %150 = arith.addf %143, %149 : vector<14x128xf32>
    %151 = vector.extract_strided_slice %145 {offsets = [1, 0], sizes = [14, 4], strides = [1, 1]} : vector<16x4xf32> to vector<14x4xf32>
    %c4_127 = arith.constant 4 : index
    %c0_128 = arith.constant 0 : index
    %c0_129 = arith.constant 0 : index
    %152 = vector.load %arg2[%c4_127, %c0_128, %c0_129] : memref<9x4x128xf32, #tpu.memory_space<vmem>>, vector<1x4x128xf32>
    %153 = vector.shape_cast %152 : vector<1x4x128xf32> to vector<4x128xf32>
    %cst_130 = arith.constant dense<0.000000e+00> : vector<14x128xf32>
    %154 = tpu.matmul %151, %153, %cst_130 {dimension_numbers = #tpu.dot_dimension_numbers<[1], [0], [0], [1], [0, 0, 1, 1], [], []>} : vector<14x4xf32>, vector<4x128xf32>, vector<14x128xf32> -> vector<14x128xf32>
    %155 = arith.addf %150, %154 : vector<14x128xf32>
    %156 = vector.extract_strided_slice %145 {offsets = [2, 0], sizes = [14, 4], strides = [1, 1]} : vector<16x4xf32> to vector<14x4xf32>
    %c5_131 = arith.constant 5 : index
    %c0_132 = arith.constant 0 : index
    %c0_133 = arith.constant 0 : index
    %157 = vector.load %arg2[%c5_131, %c0_132, %c0_133] : memref<9x4x128xf32, #tpu.memory_space<vmem>>, vector<1x4x128xf32>
    %158 = vector.shape_cast %157 : vector<1x4x128xf32> to vector<4x128xf32>
    %cst_134 = arith.constant dense<0.000000e+00> : vector<14x128xf32>
    %159 = tpu.matmul %156, %158, %cst_134 {dimension_numbers = #tpu.dot_dimension_numbers<[1], [0], [0], [1], [0, 0, 1, 1], [], []>} : vector<14x4xf32>, vector<4x128xf32>, vector<14x128xf32> -> vector<14x128xf32>
    %160 = arith.addf %155, %159 : vector<14x128xf32>
    %c0_135 = arith.constant 0 : index
    %c4_136 = arith.constant 4 : index
    %c0_137 = arith.constant 0 : index
    %c0_138 = arith.constant 0 : index
    %161 = vector.load %arg1[%c0_135, %c4_136, %c0_137, %c0_138] : memref<1x16x16x4xf32, #tpu.memory_space<vmem>>, vector<1x1x16x4xf32>
    %162 = vector.shape_cast %161 : vector<1x1x16x4xf32> to vector<16x4xf32>
    %163 = vector.extract_strided_slice %162 {offsets = [0, 0], sizes = [14, 4], strides = [1, 1]} : vector<16x4xf32> to vector<14x4xf32>
    %c6_139 = arith.constant 6 : index
    %c0_140 = arith.constant 0 : index
    %c0_141 = arith.constant 0 : index
    %164 = vector.load %arg2[%c6_139, %c0_140, %c0_141] : memref<9x4x128xf32, #tpu.memory_space<vmem>>, vector<1x4x128xf32>
    %165 = vector.shape_cast %164 : vector<1x4x128xf32> to vector<4x128xf32>
    %cst_142 = arith.constant dense<0.000000e+00> : vector<14x128xf32>
    %166 = tpu.matmul %163, %165, %cst_142 {dimension_numbers = #tpu.dot_dimension_numbers<[1], [0], [0], [1], [0, 0, 1, 1], [], []>} : vector<14x4xf32>, vector<4x128xf32>, vector<14x128xf32> -> vector<14x128xf32>
    %167 = arith.addf %160, %166 : vector<14x128xf32>
    %168 = vector.extract_strided_slice %162 {offsets = [1, 0], sizes = [14, 4], strides = [1, 1]} : vector<16x4xf32> to vector<14x4xf32>
    %c7_143 = arith.constant 7 : index
    %c0_144 = arith.constant 0 : index
    %c0_145 = arith.constant 0 : index
    %169 = vector.load %arg2[%c7_143, %c0_144, %c0_145] : memref<9x4x128xf32, #tpu.memory_space<vmem>>, vector<1x4x128xf32>
    %170 = vector.shape_cast %169 : vector<1x4x128xf32> to vector<4x128xf32>
    %cst_146 = arith.constant dense<0.000000e+00> : vector<14x128xf32>
    %171 = tpu.matmul %168, %170, %cst_146 {dimension_numbers = #tpu.dot_dimension_numbers<[1], [0], [0], [1], [0, 0, 1, 1], [], []>} : vector<14x4xf32>, vector<4x128xf32>, vector<14x128xf32> -> vector<14x128xf32>
    %172 = arith.addf %167, %171 : vector<14x128xf32>
    %173 = vector.extract_strided_slice %162 {offsets = [2, 0], sizes = [14, 4], strides = [1, 1]} : vector<16x4xf32> to vector<14x4xf32>
    %c8_147 = arith.constant 8 : index
    %c0_148 = arith.constant 0 : index
    %c0_149 = arith.constant 0 : index
    %174 = vector.load %arg2[%c8_147, %c0_148, %c0_149] : memref<9x4x128xf32, #tpu.memory_space<vmem>>, vector<1x4x128xf32>
    %175 = vector.shape_cast %174 : vector<1x4x128xf32> to vector<4x128xf32>
    %cst_150 = arith.constant dense<0.000000e+00> : vector<14x128xf32>
    %176 = tpu.matmul %173, %175, %cst_150 {dimension_numbers = #tpu.dot_dimension_numbers<[1], [0], [0], [1], [0, 0, 1, 1], [], []>} : vector<14x4xf32>, vector<4x128xf32>, vector<14x128xf32> -> vector<14x128xf32>
    %177 = arith.addf %172, %176 : vector<14x128xf32>
    %c0_151 = arith.constant 0 : index
    %c2_152 = arith.constant 2 : index
    %c0_153 = arith.constant 0 : index
    %c0_154 = arith.constant 0 : index
    %178 = vector.load %arg3[%c0_151, %c2_152, %c0_153, %c0_154] : memref<1x14x14x128xf32, #tpu.memory_space<vmem>>, vector<1x1x14x128xf32>
    %179 = vector.shape_cast %178 : vector<1x1x14x128xf32> to vector<14x128xf32>
    %180 = vector.shape_cast %177 : vector<14x128xf32> to vector<1x1x14x128xf32>
    tpu.vector_store %arg3[%c0_151, %c2_152, %c0_153, %c0_154], %180 {strides = array<i32>} : memref<1x14x14x128xf32, #tpu.memory_space<vmem>>, vector<1x1x14x128xf32>,
    %cst_155 = arith.constant dense<0.000000e+00> : vector<128xf32>
    %181 = vector.multi_reduction <add>, %177, %cst_155 [0] : vector<14x128xf32> to vector<128xf32>
    %182 = vector.shape_cast %181 : vector<128xf32> to vector<1x128xf32>
    %183 = arith.addf %121, %182 : vector<1x128xf32>
    %184 = arith.mulf %177, %177 : vector<14x128xf32>
    %cst_156 = arith.constant dense<0.000000e+00> : vector<128xf32>
    %185 = vector.multi_reduction <add>, %184, %cst_156 [0] : vector<14x128xf32> to vector<128xf32>
    %186 = vector.shape_cast %185 : vector<128xf32> to vector<1x128xf32>
    %187 = arith.addf %125, %186 : vector<1x128xf32>
    %cst_157 = arith.constant 0.000000e+00 : f32
    %188 = vector.broadcast %cst_157 : f32 to vector<14x128xf32>
    %c0_158 = arith.constant 0 : index
    %c3_159 = arith.constant 3 : index
    %c0_160 = arith.constant 0 : index
    %c0_161 = arith.constant 0 : index
    %189 = vector.load %arg1[%c0_158, %c3_159, %c0_160, %c0_161] : memref<1x16x16x4xf32, #tpu.memory_space<vmem>>, vector<1x1x16x4xf32>
    %190 = vector.shape_cast %189 : vector<1x1x16x4xf32> to vector<16x4xf32>
    %191 = vector.extract_strided_slice %190 {offsets = [0, 0], sizes = [14, 4], strides = [1, 1]} : vector<16x4xf32> to vector<14x4xf32>
    %c0_162 = arith.constant 0 : index
    %c0_163 = arith.constant 0 : index
    %c0_164 = arith.constant 0 : index
    %192 = vector.load %arg2[%c0_162, %c0_163, %c0_164] : memref<9x4x128xf32, #tpu.memory_space<vmem>>, vector<1x4x128xf32>
    %193 = vector.shape_cast %192 : vector<1x4x128xf32> to vector<4x128xf32>
    %cst_165 = arith.constant dense<0.000000e+00> : vector<14x128xf32>
    %194 = tpu.matmul %191, %193, %cst_165 {dimension_numbers = #tpu.dot_dimension_numbers<[1], [0], [0], [1], [0, 0, 1, 1], [], []>} : vector<14x4xf32>, vector<4x128xf32>, vector<14x128xf32> -> vector<14x128xf32>
    %195 = arith.addf %188, %194 : vector<14x128xf32>
    %196 = vector.extract_strided_slice %190 {offsets = [1, 0], sizes = [14, 4], strides = [1, 1]} : vector<16x4xf32> to vector<14x4xf32>
    %c1_166 = arith.constant 1 : index
    %c0_167 = arith.constant 0 : index
    %c0_168 = arith.constant 0 : index
    %197 = vector.load %arg2[%c1_166, %c0_167, %c0_168] : memref<9x4x128xf32, #tpu.memory_space<vmem>>, vector<1x4x128xf32>
    %198 = vector.shape_cast %197 : vector<1x4x128xf32> to vector<4x128xf32>
    %cst_169 = arith.constant dense<0.000000e+00> : vector<14x128xf32>
    %199 = tpu.matmul %196, %198, %cst_169 {dimension_numbers = #tpu.dot_dimension_numbers<[1], [0], [0], [1], [0, 0, 1, 1], [], []>} : vector<14x4xf32>, vector<4x128xf32>, vector<14x128xf32> -> vector<14x128xf32>
    %200 = arith.addf %195, %199 : vector<14x128xf32>
    %201 = vector.extract_strided_slice %190 {offsets = [2, 0], sizes = [14, 4], strides = [1, 1]} : vector<16x4xf32> to vector<14x4xf32>
    %c2_170 = arith.constant 2 : index
    %c0_171 = arith.constant 0 : index
    %c0_172 = arith.constant 0 : index
    %202 = vector.load %arg2[%c2_170, %c0_171, %c0_172] : memref<9x4x128xf32, #tpu.memory_space<vmem>>, vector<1x4x128xf32>
    %203 = vector.shape_cast %202 : vector<1x4x128xf32> to vector<4x128xf32>
    %cst_173 = arith.constant dense<0.000000e+00> : vector<14x128xf32>
    %204 = tpu.matmul %201, %203, %cst_173 {dimension_numbers = #tpu.dot_dimension_numbers<[1], [0], [0], [1], [0, 0, 1, 1], [], []>} : vector<14x4xf32>, vector<4x128xf32>, vector<14x128xf32> -> vector<14x128xf32>
    %205 = arith.addf %200, %204 : vector<14x128xf32>
    %c0_174 = arith.constant 0 : index
    %c4_175 = arith.constant 4 : index
    %c0_176 = arith.constant 0 : index
    %c0_177 = arith.constant 0 : index
    %206 = vector.load %arg1[%c0_174, %c4_175, %c0_176, %c0_177] : memref<1x16x16x4xf32, #tpu.memory_space<vmem>>, vector<1x1x16x4xf32>
    %207 = vector.shape_cast %206 : vector<1x1x16x4xf32> to vector<16x4xf32>
    %208 = vector.extract_strided_slice %207 {offsets = [0, 0], sizes = [14, 4], strides = [1, 1]} : vector<16x4xf32> to vector<14x4xf32>
    %c3_178 = arith.constant 3 : index
    %c0_179 = arith.constant 0 : index
    %c0_180 = arith.constant 0 : index
    %209 = vector.load %arg2[%c3_178, %c0_179, %c0_180] : memref<9x4x128xf32, #tpu.memory_space<vmem>>, vector<1x4x128xf32>
    %210 = vector.shape_cast %209 : vector<1x4x128xf32> to vector<4x128xf32>
    %cst_181 = arith.constant dense<0.000000e+00> : vector<14x128xf32>
    %211 = tpu.matmul %208, %210, %cst_181 {dimension_numbers = #tpu.dot_dimension_numbers<[1], [0], [0], [1], [0, 0, 1, 1], [], []>} : vector<14x4xf32>, vector<4x128xf32>, vector<14x128xf32> -> vector<14x128xf32>
    %212 = arith.addf %205, %211 : vector<14x128xf32>
    %213 = vector.extract_strided_slice %207 {offsets = [1, 0], sizes = [14, 4], strides = [1, 1]} : vector<16x4xf32> to vector<14x4xf32>
    %c4_182 = arith.constant 4 : index
    %c0_183 = arith.constant 0 : index
    %c0_184 = arith.constant 0 : index
    %214 = vector.load %arg2[%c4_182, %c0_183, %c0_184] : memref<9x4x128xf32, #tpu.memory_space<vmem>>, vector<1x4x128xf32>
    %215 = vector.shape_cast %214 : vector<1x4x128xf32> to vector<4x128xf32>
    %cst_185 = arith.constant dense<0.000000e+00> : vector<14x128xf32>
    %216 = tpu.matmul %213, %215, %cst_185 {dimension_numbers = #tpu.dot_dimension_numbers<[1], [0], [0], [1], [0, 0, 1, 1], [], []>} : vector<14x4xf32>, vector<4x128xf32>, vector<14x128xf32> -> vector<14x128xf32>
    %217 = arith.addf %212, %216 : vector<14x128xf32>
    %218 = vector.extract_strided_slice %207 {offsets = [2, 0], sizes = [14, 4], strides = [1, 1]} : vector<16x4xf32> to vector<14x4xf32>
    %c5_186 = arith.constant 5 : index
    %c0_187 = arith.constant 0 : index
    %c0_188 = arith.constant 0 : index
    %219 = vector.load %arg2[%c5_186, %c0_187, %c0_188] : memref<9x4x128xf32, #tpu.memory_space<vmem>>, vector<1x4x128xf32>
    %220 = vector.shape_cast %219 : vector<1x4x128xf32> to vector<4x128xf32>
    %cst_189 = arith.constant dense<0.000000e+00> : vector<14x128xf32>
    %221 = tpu.matmul %218, %220, %cst_189 {dimension_numbers = #tpu.dot_dimension_numbers<[1], [0], [0], [1], [0, 0, 1, 1], [], []>} : vector<14x4xf32>, vector<4x128xf32>, vector<14x128xf32> -> vector<14x128xf32>
    %222 = arith.addf %217, %221 : vector<14x128xf32>
    %c0_190 = arith.constant 0 : index
    %c5_191 = arith.constant 5 : index
    %c0_192 = arith.constant 0 : index
    %c0_193 = arith.constant 0 : index
    %223 = vector.load %arg1[%c0_190, %c5_191, %c0_192, %c0_193] : memref<1x16x16x4xf32, #tpu.memory_space<vmem>>, vector<1x1x16x4xf32>
    %224 = vector.shape_cast %223 : vector<1x1x16x4xf32> to vector<16x4xf32>
    %225 = vector.extract_strided_slice %224 {offsets = [0, 0], sizes = [14, 4], strides = [1, 1]} : vector<16x4xf32> to vector<14x4xf32>
    %c6_194 = arith.constant 6 : index
    %c0_195 = arith.constant 0 : index
    %c0_196 = arith.constant 0 : index
    %226 = vector.load %arg2[%c6_194, %c0_195, %c0_196] : memref<9x4x128xf32, #tpu.memory_space<vmem>>, vector<1x4x128xf32>
    %227 = vector.shape_cast %226 : vector<1x4x128xf32> to vector<4x128xf32>
    %cst_197 = arith.constant dense<0.000000e+00> : vector<14x128xf32>
    %228 = tpu.matmul %225, %227, %cst_197 {dimension_numbers = #tpu.dot_dimension_numbers<[1], [0], [0], [1], [0, 0, 1, 1], [], []>} : vector<14x4xf32>, vector<4x128xf32>, vector<14x128xf32> -> vector<14x128xf32>
    %229 = arith.addf %222, %228 : vector<14x128xf32>
    %230 = vector.extract_strided_slice %224 {offsets = [1, 0], sizes = [14, 4], strides = [1, 1]} : vector<16x4xf32> to vector<14x4xf32>
    %c7_198 = arith.constant 7 : index
    %c0_199 = arith.constant 0 : index
    %c0_200 = arith.constant 0 : index
    %231 = vector.load %arg2[%c7_198, %c0_199, %c0_200] : memref<9x4x128xf32, #tpu.memory_space<vmem>>, vector<1x4x128xf32>
    %232 = vector.shape_cast %231 : vector<1x4x128xf32> to vector<4x128xf32>
    %cst_201 = arith.constant dense<0.000000e+00> : vector<14x128xf32>
    %233 = tpu.matmul %230, %232, %cst_201 {dimension_numbers = #tpu.dot_dimension_numbers<[1], [0], [0], [1], [0, 0, 1, 1], [], []>} : vector<14x4xf32>, vector<4x128xf32>, vector<14x128xf32> -> vector<14x128xf32>
    %234 = arith.addf %229, %233 : vector<14x128xf32>
    %235 = vector.extract_strided_slice %224 {offsets = [2, 0], sizes = [14, 4], strides = [1, 1]} : vector<16x4xf32> to vector<14x4xf32>
    %c8_202 = arith.constant 8 : index
    %c0_203 = arith.constant 0 : index
    %c0_204 = arith.constant 0 : index
    %236 = vector.load %arg2[%c8_202, %c0_203, %c0_204] : memref<9x4x128xf32, #tpu.memory_space<vmem>>, vector<1x4x128xf32>
    %237 = vector.shape_cast %236 : vector<1x4x128xf32> to vector<4x128xf32>
    %cst_205 = arith.constant dense<0.000000e+00> : vector<14x128xf32>
    %238 = tpu.matmul %235, %237, %cst_205 {dimension_numbers = #tpu.dot_dimension_numbers<[1], [0], [0], [1], [0, 0, 1, 1], [], []>} : vector<14x4xf32>, vector<4x128xf32>, vector<14x128xf32> -> vector<14x128xf32>
    %239 = arith.addf %234, %238 : vector<14x128xf32>
    %c0_206 = arith.constant 0 : index
    %c3_207 = arith.constant 3 : index
    %c0_208 = arith.constant 0 : index
    %c0_209 = arith.constant 0 : index
    %240 = vector.load %arg3[%c0_206, %c3_207, %c0_208, %c0_209] : memref<1x14x14x128xf32, #tpu.memory_space<vmem>>, vector<1x1x14x128xf32>
    %241 = vector.shape_cast %240 : vector<1x1x14x128xf32> to vector<14x128xf32>
    %242 = vector.shape_cast %239 : vector<14x128xf32> to vector<1x1x14x128xf32>
    tpu.vector_store %arg3[%c0_206, %c3_207, %c0_208, %c0_209], %242 {strides = array<i32>} : memref<1x14x14x128xf32, #tpu.memory_space<vmem>>, vector<1x1x14x128xf32>,
    %cst_210 = arith.constant dense<0.000000e+00> : vector<128xf32>
    %243 = vector.multi_reduction <add>, %239, %cst_210 [0] : vector<14x128xf32> to vector<128xf32>
    %244 = vector.shape_cast %243 : vector<128xf32> to vector<1x128xf32>
    %245 = arith.addf %183, %244 : vector<1x128xf32>
    %246 = arith.mulf %239, %239 : vector<14x128xf32>
    %cst_211 = arith.constant dense<0.000000e+00> : vector<128xf32>
    %247 = vector.multi_reduction <add>, %246, %cst_211 [0] : vector<14x128xf32> to vector<128xf32>
    %248 = vector.shape_cast %247 : vector<128xf32> to vector<1x128xf32>
    %249 = arith.addf %187, %248 : vector<1x128xf32>
    %cst_212 = arith.constant 0.000000e+00 : f32
    %250 = vector.broadcast %cst_212 : f32 to vector<14x128xf32>
    %c0_213 = arith.constant 0 : index
    %c4_214 = arith.constant 4 : index
    %c0_215 = arith.constant 0 : index
    %c0_216 = arith.constant 0 : index
    %251 = vector.load %arg1[%c0_213, %c4_214, %c0_215, %c0_216] : memref<1x16x16x4xf32, #tpu.memory_space<vmem>>, vector<1x1x16x4xf32>
    %252 = vector.shape_cast %251 : vector<1x1x16x4xf32> to vector<16x4xf32>
    %253 = vector.extract_strided_slice %252 {offsets = [0, 0], sizes = [14, 4], strides = [1, 1]} : vector<16x4xf32> to vector<14x4xf32>
    %c0_217 = arith.constant 0 : index
    %c0_218 = arith.constant 0 : index
    %c0_219 = arith.constant 0 : index
    %254 = vector.load %arg2[%c0_217, %c0_218, %c0_219] : memref<9x4x128xf32, #tpu.memory_space<vmem>>, vector<1x4x128xf32>
    %255 = vector.shape_cast %254 : vector<1x4x128xf32> to vector<4x128xf32>
    %cst_220 = arith.constant dense<0.000000e+00> : vector<14x128xf32>
    %256 = tpu.matmul %253, %255, %cst_220 {dimension_numbers = #tpu.dot_dimension_numbers<[1], [0], [0], [1], [0, 0, 1, 1], [], []>} : vector<14x4xf32>, vector<4x128xf32>, vector<14x128xf32> -> vector<14x128xf32>
    %257 = arith.addf %250, %256 : vector<14x128xf32>
    %258 = vector.extract_strided_slice %252 {offsets = [1, 0], sizes = [14, 4], strides = [1, 1]} : vector<16x4xf32> to vector<14x4xf32>
    %c1_221 = arith.constant 1 : index
    %c0_222 = arith.constant 0 : index
    %c0_223 = arith.constant 0 : index
    %259 = vector.load %arg2[%c1_221, %c0_222, %c0_223] : memref<9x4x128xf32, #tpu.memory_space<vmem>>, vector<1x4x128xf32>
    %260 = vector.shape_cast %259 : vector<1x4x128xf32> to vector<4x128xf32>
    %cst_224 = arith.constant dense<0.000000e+00> : vector<14x128xf32>
    %261 = tpu.matmul %258, %260, %cst_224 {dimension_numbers = #tpu.dot_dimension_numbers<[1], [0], [0], [1], [0, 0, 1, 1], [], []>} : vector<14x4xf32>, vector<4x128xf32>, vector<14x128xf32> -> vector<14x128xf32>
    %262 = arith.addf %257, %261 : vector<14x128xf32>
    %263 = vector.extract_strided_slice %252 {offsets = [2, 0], sizes = [14, 4], strides = [1, 1]} : vector<16x4xf32> to vector<14x4xf32>
    %c2_225 = arith.constant 2 : index
    %c0_226 = arith.constant 0 : index
    %c0_227 = arith.constant 0 : index
    %264 = vector.load %arg2[%c2_225, %c0_226, %c0_227] : memref<9x4x128xf32, #tpu.memory_space<vmem>>, vector<1x4x128xf32>
    %265 = vector.shape_cast %264 : vector<1x4x128xf32> to vector<4x128xf32>
    %cst_228 = arith.constant dense<0.000000e+00> : vector<14x128xf32>
    %266 = tpu.matmul %263, %265, %cst_228 {dimension_numbers = #tpu.dot_dimension_numbers<[1], [0], [0], [1], [0, 0, 1, 1], [], []>} : vector<14x4xf32>, vector<4x128xf32>, vector<14x128xf32> -> vector<14x128xf32>
    %267 = arith.addf %262, %266 : vector<14x128xf32>
    %c0_229 = arith.constant 0 : index
    %c5_230 = arith.constant 5 : index
    %c0_231 = arith.constant 0 : index
    %c0_232 = arith.constant 0 : index
    %268 = vector.load %arg1[%c0_229, %c5_230, %c0_231, %c0_232] : memref<1x16x16x4xf32, #tpu.memory_space<vmem>>, vector<1x1x16x4xf32>
    %269 = vector.shape_cast %268 : vector<1x1x16x4xf32> to vector<16x4xf32>
    %270 = vector.extract_strided_slice %269 {offsets = [0, 0], sizes = [14, 4], strides = [1, 1]} : vector<16x4xf32> to vector<14x4xf32>
    %c3_233 = arith.constant 3 : index
    %c0_234 = arith.constant 0 : index
    %c0_235 = arith.constant 0 : index
    %271 = vector.load %arg2[%c3_233, %c0_234, %c0_235] : memref<9x4x128xf32, #tpu.memory_space<vmem>>, vector<1x4x128xf32>
    %272 = vector.shape_cast %271 : vector<1x4x128xf32> to vector<4x128xf32>
    %cst_236 = arith.constant dense<0.000000e+00> : vector<14x128xf32>
    %273 = tpu.matmul %270, %272, %cst_236 {dimension_numbers = #tpu.dot_dimension_numbers<[1], [0], [0], [1], [0, 0, 1, 1], [], []>} : vector<14x4xf32>, vector<4x128xf32>, vector<14x128xf32> -> vector<14x128xf32>
    %274 = arith.addf %267, %273 : vector<14x128xf32>
    %275 = vector.extract_strided_slice %269 {offsets = [1, 0], sizes = [14, 4], strides = [1, 1]} : vector<16x4xf32> to vector<14x4xf32>
    %c4_237 = arith.constant 4 : index
    %c0_238 = arith.constant 0 : index
    %c0_239 = arith.constant 0 : index
    %276 = vector.load %arg2[%c4_237, %c0_238, %c0_239] : memref<9x4x128xf32, #tpu.memory_space<vmem>>, vector<1x4x128xf32>
    %277 = vector.shape_cast %276 : vector<1x4x128xf32> to vector<4x128xf32>
    %cst_240 = arith.constant dense<0.000000e+00> : vector<14x128xf32>
    %278 = tpu.matmul %275, %277, %cst_240 {dimension_numbers = #tpu.dot_dimension_numbers<[1], [0], [0], [1], [0, 0, 1, 1], [], []>} : vector<14x4xf32>, vector<4x128xf32>, vector<14x128xf32> -> vector<14x128xf32>
    %279 = arith.addf %274, %278 : vector<14x128xf32>
    %280 = vector.extract_strided_slice %269 {offsets = [2, 0], sizes = [14, 4], strides = [1, 1]} : vector<16x4xf32> to vector<14x4xf32>
    %c5_241 = arith.constant 5 : index
    %c0_242 = arith.constant 0 : index
    %c0_243 = arith.constant 0 : index
    %281 = vector.load %arg2[%c5_241, %c0_242, %c0_243] : memref<9x4x128xf32, #tpu.memory_space<vmem>>, vector<1x4x128xf32>
    %282 = vector.shape_cast %281 : vector<1x4x128xf32> to vector<4x128xf32>
    %cst_244 = arith.constant dense<0.000000e+00> : vector<14x128xf32>
    %283 = tpu.matmul %280, %282, %cst_244 {dimension_numbers = #tpu.dot_dimension_numbers<[1], [0], [0], [1], [0, 0, 1, 1], [], []>} : vector<14x4xf32>, vector<4x128xf32>, vector<14x128xf32> -> vector<14x128xf32>
    %284 = arith.addf %279, %283 : vector<14x128xf32>
    %c0_245 = arith.constant 0 : index
    %c6_246 = arith.constant 6 : index
    %c0_247 = arith.constant 0 : index
    %c0_248 = arith.constant 0 : index
    %285 = vector.load %arg1[%c0_245, %c6_246, %c0_247, %c0_248] : memref<1x16x16x4xf32, #tpu.memory_space<vmem>>, vector<1x1x16x4xf32>
    %286 = vector.shape_cast %285 : vector<1x1x16x4xf32> to vector<16x4xf32>
    %287 = vector.extract_strided_slice %286 {offsets = [0, 0], sizes = [14, 4], strides = [1, 1]} : vector<16x4xf32> to vector<14x4xf32>
    %c6_249 = arith.constant 6 : index
    %c0_250 = arith.constant 0 : index
    %c0_251 = arith.constant 0 : index
    %288 = vector.load %arg2[%c6_249, %c0_250, %c0_251] : memref<9x4x128xf32, #tpu.memory_space<vmem>>, vector<1x4x128xf32>
    %289 = vector.shape_cast %288 : vector<1x4x128xf32> to vector<4x128xf32>
    %cst_252 = arith.constant dense<0.000000e+00> : vector<14x128xf32>
    %290 = tpu.matmul %287, %289, %cst_252 {dimension_numbers = #tpu.dot_dimension_numbers<[1], [0], [0], [1], [0, 0, 1, 1], [], []>} : vector<14x4xf32>, vector<4x128xf32>, vector<14x128xf32> -> vector<14x128xf32>
    %291 = arith.addf %284, %290 : vector<14x128xf32>
    %292 = vector.extract_strided_slice %286 {offsets = [1, 0], sizes = [14, 4], strides = [1, 1]} : vector<16x4xf32> to vector<14x4xf32>
    %c7_253 = arith.constant 7 : index
    %c0_254 = arith.constant 0 : index
    %c0_255 = arith.constant 0 : index
    %293 = vector.load %arg2[%c7_253, %c0_254, %c0_255] : memref<9x4x128xf32, #tpu.memory_space<vmem>>, vector<1x4x128xf32>
    %294 = vector.shape_cast %293 : vector<1x4x128xf32> to vector<4x128xf32>
    %cst_256 = arith.constant dense<0.000000e+00> : vector<14x128xf32>
    %295 = tpu.matmul %292, %294, %cst_256 {dimension_numbers = #tpu.dot_dimension_numbers<[1], [0], [0], [1], [0, 0, 1, 1], [], []>} : vector<14x4xf32>, vector<4x128xf32>, vector<14x128xf32> -> vector<14x128xf32>
    %296 = arith.addf %291, %295 : vector<14x128xf32>
    %297 = vector.extract_strided_slice %286 {offsets = [2, 0], sizes = [14, 4], strides = [1, 1]} : vector<16x4xf32> to vector<14x4xf32>
    %c8_257 = arith.constant 8 : index
    %c0_258 = arith.constant 0 : index
    %c0_259 = arith.constant 0 : index
    %298 = vector.load %arg2[%c8_257, %c0_258, %c0_259] : memref<9x4x128xf32, #tpu.memory_space<vmem>>, vector<1x4x128xf32>
    %299 = vector.shape_cast %298 : vector<1x4x128xf32> to vector<4x128xf32>
    %cst_260 = arith.constant dense<0.000000e+00> : vector<14x128xf32>
    %300 = tpu.matmul %297, %299, %cst_260 {dimension_numbers = #tpu.dot_dimension_numbers<[1], [0], [0], [1], [0, 0, 1, 1], [], []>} : vector<14x4xf32>, vector<4x128xf32>, vector<14x128xf32> -> vector<14x128xf32>
    %301 = arith.addf %296, %300 : vector<14x128xf32>
    %c0_261 = arith.constant 0 : index
    %c4_262 = arith.constant 4 : index
    %c0_263 = arith.constant 0 : index
    %c0_264 = arith.constant 0 : index
    %302 = vector.load %arg3[%c0_261, %c4_262, %c0_263, %c0_264] : memref<1x14x14x128xf32, #tpu.memory_space<vmem>>, vector<1x1x14x128xf32>
    %303 = vector.shape_cast %302 : vector<1x1x14x128xf32> to vector<14x128xf32>
    %304 = vector.shape_cast %301 : vector<14x128xf32> to vector<1x1x14x128xf32>
    tpu.vector_store %arg3[%c0_261, %c4_262, %c0_263, %c0_264], %304 {strides = array<i32>} : memref<1x14x14x128xf32, #tpu.memory_space<vmem>>, vector<1x1x14x128xf32>,
    %cst_265 = arith.constant dense<0.000000e+00> : vector<128xf32>
    %305 = vector.multi_reduction <add>, %301, %cst_265 [0] : vector<14x128xf32> to vector<128xf32>
    %306 = vector.shape_cast %305 : vector<128xf32> to vector<1x128xf32>
    %307 = arith.addf %245, %306 : vector<1x128xf32>
    %308 = arith.mulf %301, %301 : vector<14x128xf32>
    %cst_266 = arith.constant dense<0.000000e+00> : vector<128xf32>
    %309 = vector.multi_reduction <add>, %308, %cst_266 [0] : vector<14x128xf32> to vector<128xf32>
    %310 = vector.shape_cast %309 : vector<128xf32> to vector<1x128xf32>
    %311 = arith.addf %249, %310 : vector<1x128xf32>
    %cst_267 = arith.constant 0.000000e+00 : f32
    %312 = vector.broadcast %cst_267 : f32 to vector<14x128xf32>
    %c0_268 = arith.constant 0 : index
    %c5_269 = arith.constant 5 : index
    %c0_270 = arith.constant 0 : index
    %c0_271 = arith.constant 0 : index
    %313 = vector.load %arg1[%c0_268, %c5_269, %c0_270, %c0_271] : memref<1x16x16x4xf32, #tpu.memory_space<vmem>>, vector<1x1x16x4xf32>
    %314 = vector.shape_cast %313 : vector<1x1x16x4xf32> to vector<16x4xf32>
    %315 = vector.extract_strided_slice %314 {offsets = [0, 0], sizes = [14, 4], strides = [1, 1]} : vector<16x4xf32> to vector<14x4xf32>
    %c0_272 = arith.constant 0 : index
    %c0_273 = arith.constant 0 : index
    %c0_274 = arith.constant 0 : index
    %316 = vector.load %arg2[%c0_272, %c0_273, %c0_274] : memref<9x4x128xf32, #tpu.memory_space<vmem>>, vector<1x4x128xf32>
    %317 = vector.shape_cast %316 : vector<1x4x128xf32> to vector<4x128xf32>
    %cst_275 = arith.constant dense<0.000000e+00> : vector<14x128xf32>
    %318 = tpu.matmul %315, %317, %cst_275 {dimension_numbers = #tpu.dot_dimension_numbers<[1], [0], [0], [1], [0, 0, 1, 1], [], []>} : vector<14x4xf32>, vector<4x128xf32>, vector<14x128xf32> -> vector<14x128xf32>
    %319 = arith.addf %312, %318 : vector<14x128xf32>
    %320 = vector.extract_strided_slice %314 {offsets = [1, 0], sizes = [14, 4], strides = [1, 1]} : vector<16x4xf32> to vector<14x4xf32>
    %c1_276 = arith.constant 1 : index
    %c0_277 = arith.constant 0 : index
    %c0_278 = arith.constant 0 : index
    %321 = vector.load %arg2[%c1_276, %c0_277, %c0_278] : memref<9x4x128xf32, #tpu.memory_space<vmem>>, vector<1x4x128xf32>
    %322 = vector.shape_cast %321 : vector<1x4x128xf32> to vector<4x128xf32>
    %cst_279 = arith.constant dense<0.000000e+00> : vector<14x128xf32>
    %323 = tpu.matmul %320, %322, %cst_279 {dimension_numbers = #tpu.dot_dimension_numbers<[1], [0], [0], [1], [0, 0, 1, 1], [], []>} : vector<14x4xf32>, vector<4x128xf32>, vector<14x128xf32> -> vector<14x128xf32>
    %324 = arith.addf %319, %323 : vector<14x128xf32>
    %325 = vector.extract_strided_slice %314 {offsets = [2, 0], sizes = [14, 4], strides = [1, 1]} : vector<16x4xf32> to vector<14x4xf32>
    %c2_280 = arith.constant 2 : index
    %c0_281 = arith.constant 0 : index
    %c0_282 = arith.constant 0 : index
    %326 = vector.load %arg2[%c2_280, %c0_281, %c0_282] : memref<9x4x128xf32, #tpu.memory_space<vmem>>, vector<1x4x128xf32>
    %327 = vector.shape_cast %326 : vector<1x4x128xf32> to vector<4x128xf32>
    %cst_283 = arith.constant dense<0.000000e+00> : vector<14x128xf32>
    %328 = tpu.matmul %325, %327, %cst_283 {dimension_numbers = #tpu.dot_dimension_numbers<[1], [0], [0], [1], [0, 0, 1, 1], [], []>} : vector<14x4xf32>, vector<4x128xf32>, vector<14x128xf32> -> vector<14x128xf32>
    %329 = arith.addf %324, %328 : vector<14x128xf32>
    %c0_284 = arith.constant 0 : index
    %c6_285 = arith.constant 6 : index
    %c0_286 = arith.constant 0 : index
    %c0_287 = arith.constant 0 : index
    %330 = vector.load %arg1[%c0_284, %c6_285, %c0_286, %c0_287] : memref<1x16x16x4xf32, #tpu.memory_space<vmem>>, vector<1x1x16x4xf32>
    %331 = vector.shape_cast %330 : vector<1x1x16x4xf32> to vector<16x4xf32>
    %332 = vector.extract_strided_slice %331 {offsets = [0, 0], sizes = [14, 4], strides = [1, 1]} : vector<16x4xf32> to vector<14x4xf32>
    %c3_288 = arith.constant 3 : index
    %c0_289 = arith.constant 0 : index
    %c0_290 = arith.constant 0 : index
    %333 = vector.load %arg2[%c3_288, %c0_289, %c0_290] : memref<9x4x128xf32, #tpu.memory_space<vmem>>, vector<1x4x128xf32>
    %334 = vector.shape_cast %333 : vector<1x4x128xf32> to vector<4x128xf32>
    %cst_291 = arith.constant dense<0.000000e+00> : vector<14x128xf32>
    %335 = tpu.matmul %332, %334, %cst_291 {dimension_numbers = #tpu.dot_dimension_numbers<[1], [0], [0], [1], [0, 0, 1, 1], [], []>} : vector<14x4xf32>, vector<4x128xf32>, vector<14x128xf32> -> vector<14x128xf32>
    %336 = arith.addf %329, %335 : vector<14x128xf32>
    %337 = vector.extract_strided_slice %331 {offsets = [1, 0], sizes = [14, 4], strides = [1, 1]} : vector<16x4xf32> to vector<14x4xf32>
    %c4_292 = arith.constant 4 : index
    %c0_293 = arith.constant 0 : index
    %c0_294 = arith.constant 0 : index
    %338 = vector.load %arg2[%c4_292, %c0_293, %c0_294] : memref<9x4x128xf32, #tpu.memory_space<vmem>>, vector<1x4x128xf32>
    %339 = vector.shape_cast %338 : vector<1x4x128xf32> to vector<4x128xf32>
    %cst_295 = arith.constant dense<0.000000e+00> : vector<14x128xf32>
    %340 = tpu.matmul %337, %339, %cst_295 {dimension_numbers = #tpu.dot_dimension_numbers<[1], [0], [0], [1], [0, 0, 1, 1], [], []>} : vector<14x4xf32>, vector<4x128xf32>, vector<14x128xf32> -> vector<14x128xf32>
    %341 = arith.addf %336, %340 : vector<14x128xf32>
    %342 = vector.extract_strided_slice %331 {offsets = [2, 0], sizes = [14, 4], strides = [1, 1]} : vector<16x4xf32> to vector<14x4xf32>
    %c5_296 = arith.constant 5 : index
    %c0_297 = arith.constant 0 : index
    %c0_298 = arith.constant 0 : index
    %343 = vector.load %arg2[%c5_296, %c0_297, %c0_298] : memref<9x4x128xf32, #tpu.memory_space<vmem>>, vector<1x4x128xf32>
    %344 = vector.shape_cast %343 : vector<1x4x128xf32> to vector<4x128xf32>
    %cst_299 = arith.constant dense<0.000000e+00> : vector<14x128xf32>
    %345 = tpu.matmul %342, %344, %cst_299 {dimension_numbers = #tpu.dot_dimension_numbers<[1], [0], [0], [1], [0, 0, 1, 1], [], []>} : vector<14x4xf32>, vector<4x128xf32>, vector<14x128xf32> -> vector<14x128xf32>
    %346 = arith.addf %341, %345 : vector<14x128xf32>
    %c0_300 = arith.constant 0 : index
    %c7_301 = arith.constant 7 : index
    %c0_302 = arith.constant 0 : index
    %c0_303 = arith.constant 0 : index
    %347 = vector.load %arg1[%c0_300, %c7_301, %c0_302, %c0_303] : memref<1x16x16x4xf32, #tpu.memory_space<vmem>>, vector<1x1x16x4xf32>
    %348 = vector.shape_cast %347 : vector<1x1x16x4xf32> to vector<16x4xf32>
    %349 = vector.extract_strided_slice %348 {offsets = [0, 0], sizes = [14, 4], strides = [1, 1]} : vector<16x4xf32> to vector<14x4xf32>
    %c6_304 = arith.constant 6 : index
    %c0_305 = arith.constant 0 : index
    %c0_306 = arith.constant 0 : index
    %350 = vector.load %arg2[%c6_304, %c0_305, %c0_306] : memref<9x4x128xf32, #tpu.memory_space<vmem>>, vector<1x4x128xf32>
    %351 = vector.shape_cast %350 : vector<1x4x128xf32> to vector<4x128xf32>
    %cst_307 = arith.constant dense<0.000000e+00> : vector<14x128xf32>
    %352 = tpu.matmul %349, %351, %cst_307 {dimension_numbers = #tpu.dot_dimension_numbers<[1], [0], [0], [1], [0, 0, 1, 1], [], []>} : vector<14x4xf32>, vector<4x128xf32>, vector<14x128xf32> -> vector<14x128xf32>
    %353 = arith.addf %346, %352 : vector<14x128xf32>
    %354 = vector.extract_strided_slice %348 {offsets = [1, 0], sizes = [14, 4], strides = [1, 1]} : vector<16x4xf32> to vector<14x4xf32>
    %c7_308 = arith.constant 7 : index
    %c0_309 = arith.constant 0 : index
    %c0_310 = arith.constant 0 : index
    %355 = vector.load %arg2[%c7_308, %c0_309, %c0_310] : memref<9x4x128xf32, #tpu.memory_space<vmem>>, vector<1x4x128xf32>
    %356 = vector.shape_cast %355 : vector<1x4x128xf32> to vector<4x128xf32>
    %cst_311 = arith.constant dense<0.000000e+00> : vector<14x128xf32>
    %357 = tpu.matmul %354, %356, %cst_311 {dimension_numbers = #tpu.dot_dimension_numbers<[1], [0], [0], [1], [0, 0, 1, 1], [], []>} : vector<14x4xf32>, vector<4x128xf32>, vector<14x128xf32> -> vector<14x128xf32>
    %358 = arith.addf %353, %357 : vector<14x128xf32>
    %359 = vector.extract_strided_slice %348 {offsets = [2, 0], sizes = [14, 4], strides = [1, 1]} : vector<16x4xf32> to vector<14x4xf32>
    %c8_312 = arith.constant 8 : index
    %c0_313 = arith.constant 0 : index
    %c0_314 = arith.constant 0 : index
    %360 = vector.load %arg2[%c8_312, %c0_313, %c0_314] : memref<9x4x128xf32, #tpu.memory_space<vmem>>, vector<1x4x128xf32>
    %361 = vector.shape_cast %360 : vector<1x4x128xf32> to vector<4x128xf32>
    %cst_315 = arith.constant dense<0.000000e+00> : vector<14x128xf32>
    %362 = tpu.matmul %359, %361, %cst_315 {dimension_numbers = #tpu.dot_dimension_numbers<[1], [0], [0], [1], [0, 0, 1, 1], [], []>} : vector<14x4xf32>, vector<4x128xf32>, vector<14x128xf32> -> vector<14x128xf32>
    %363 = arith.addf %358, %362 : vector<14x128xf32>
    %c0_316 = arith.constant 0 : index
    %c5_317 = arith.constant 5 : index
    %c0_318 = arith.constant 0 : index
    %c0_319 = arith.constant 0 : index
    %364 = vector.load %arg3[%c0_316, %c5_317, %c0_318, %c0_319] : memref<1x14x14x128xf32, #tpu.memory_space<vmem>>, vector<1x1x14x128xf32>
    %365 = vector.shape_cast %364 : vector<1x1x14x128xf32> to vector<14x128xf32>
    %366 = vector.shape_cast %363 : vector<14x128xf32> to vector<1x1x14x128xf32>
    tpu.vector_store %arg3[%c0_316, %c5_317, %c0_318, %c0_319], %366 {strides = array<i32>} : memref<1x14x14x128xf32, #tpu.memory_space<vmem>>, vector<1x1x14x128xf32>,
    %cst_320 = arith.constant dense<0.000000e+00> : vector<128xf32>
    %367 = vector.multi_reduction <add>, %363, %cst_320 [0] : vector<14x128xf32> to vector<128xf32>
    %368 = vector.shape_cast %367 : vector<128xf32> to vector<1x128xf32>
    %369 = arith.addf %307, %368 : vector<1x128xf32>
    %370 = arith.mulf %363, %363 : vector<14x128xf32>
    %cst_321 = arith.constant dense<0.000000e+00> : vector<128xf32>
    %371 = vector.multi_reduction <add>, %370, %cst_321 [0] : vector<14x128xf32> to vector<128xf32>
    %372 = vector.shape_cast %371 : vector<128xf32> to vector<1x128xf32>
    %373 = arith.addf %311, %372 : vector<1x128xf32>
    %cst_322 = arith.constant 0.000000e+00 : f32
    %374 = vector.broadcast %cst_322 : f32 to vector<14x128xf32>
    %c0_323 = arith.constant 0 : index
    %c6_324 = arith.constant 6 : index
    %c0_325 = arith.constant 0 : index
    %c0_326 = arith.constant 0 : index
    %375 = vector.load %arg1[%c0_323, %c6_324, %c0_325, %c0_326] : memref<1x16x16x4xf32, #tpu.memory_space<vmem>>, vector<1x1x16x4xf32>
    %376 = vector.shape_cast %375 : vector<1x1x16x4xf32> to vector<16x4xf32>
    %377 = vector.extract_strided_slice %376 {offsets = [0, 0], sizes = [14, 4], strides = [1, 1]} : vector<16x4xf32> to vector<14x4xf32>
    %c0_327 = arith.constant 0 : index
    %c0_328 = arith.constant 0 : index
    %c0_329 = arith.constant 0 : index
    %378 = vector.load %arg2[%c0_327, %c0_328, %c0_329] : memref<9x4x128xf32, #tpu.memory_space<vmem>>, vector<1x4x128xf32>
    %379 = vector.shape_cast %378 : vector<1x4x128xf32> to vector<4x128xf32>
    %cst_330 = arith.constant dense<0.000000e+00> : vector<14x128xf32>
    %380 = tpu.matmul %377, %379, %cst_330 {dimension_numbers = #tpu.dot_dimension_numbers<[1], [0], [0], [1], [0, 0, 1, 1], [], []>} : vector<14x4xf32>, vector<4x128xf32>, vector<14x128xf32> -> vector<14x128xf32>
    %381 = arith.addf %374, %380 : vector<14x128xf32>
    %382 = vector.extract_strided_slice %376 {offsets = [1, 0], sizes = [14, 4], strides = [1, 1]} : vector<16x4xf32> to vector<14x4xf32>
    %c1_331 = arith.constant 1 : index
    %c0_332 = arith.constant 0 : index
    %c0_333 = arith.constant 0 : index
    %383 = vector.load %arg2[%c1_331, %c0_332, %c0_333] : memref<9x4x128xf32, #tpu.memory_space<vmem>>, vector<1x4x128xf32>
    %384 = vector.shape_cast %383 : vector<1x4x128xf32> to vector<4x128xf32>
    %cst_334 = arith.constant dense<0.000000e+00> : vector<14x128xf32>
    %385 = tpu.matmul %382, %384, %cst_334 {dimension_numbers = #tpu.dot_dimension_numbers<[1], [0], [0], [1], [0, 0, 1, 1], [], []>} : vector<14x4xf32>, vector<4x128xf32>, vector<14x128xf32> -> vector<14x128xf32>
    %386 = arith.addf %381, %385 : vector<14x128xf32>
    %387 = vector.extract_strided_slice %376 {offsets = [2, 0], sizes = [14, 4], strides = [1, 1]} : vector<16x4xf32> to vector<14x4xf32>
    %c2_335 = arith.constant 2 : index
    %c0_336 = arith.constant 0 : index
    %c0_337 = arith.constant 0 : index
    %388 = vector.load %arg2[%c2_335, %c0_336, %c0_337] : memref<9x4x128xf32, #tpu.memory_space<vmem>>, vector<1x4x128xf32>
    %389 = vector.shape_cast %388 : vector<1x4x128xf32> to vector<4x128xf32>
    %cst_338 = arith.constant dense<0.000000e+00> : vector<14x128xf32>
    %390 = tpu.matmul %387, %389, %cst_338 {dimension_numbers = #tpu.dot_dimension_numbers<[1], [0], [0], [1], [0, 0, 1, 1], [], []>} : vector<14x4xf32>, vector<4x128xf32>, vector<14x128xf32> -> vector<14x128xf32>
    %391 = arith.addf %386, %390 : vector<14x128xf32>
    %c0_339 = arith.constant 0 : index
    %c7_340 = arith.constant 7 : index
    %c0_341 = arith.constant 0 : index
    %c0_342 = arith.constant 0 : index
    %392 = vector.load %arg1[%c0_339, %c7_340, %c0_341, %c0_342] : memref<1x16x16x4xf32, #tpu.memory_space<vmem>>, vector<1x1x16x4xf32>
    %393 = vector.shape_cast %392 : vector<1x1x16x4xf32> to vector<16x4xf32>
    %394 = vector.extract_strided_slice %393 {offsets = [0, 0], sizes = [14, 4], strides = [1, 1]} : vector<16x4xf32> to vector<14x4xf32>
    %c3_343 = arith.constant 3 : index
    %c0_344 = arith.constant 0 : index
    %c0_345 = arith.constant 0 : index
    %395 = vector.load %arg2[%c3_343, %c0_344, %c0_345] : memref<9x4x128xf32, #tpu.memory_space<vmem>>, vector<1x4x128xf32>
    %396 = vector.shape_cast %395 : vector<1x4x128xf32> to vector<4x128xf32>
    %cst_346 = arith.constant dense<0.000000e+00> : vector<14x128xf32>
    %397 = tpu.matmul %394, %396, %cst_346 {dimension_numbers = #tpu.dot_dimension_numbers<[1], [0], [0], [1], [0, 0, 1, 1], [], []>} : vector<14x4xf32>, vector<4x128xf32>, vector<14x128xf32> -> vector<14x128xf32>
    %398 = arith.addf %391, %397 : vector<14x128xf32>
    %399 = vector.extract_strided_slice %393 {offsets = [1, 0], sizes = [14, 4], strides = [1, 1]} : vector<16x4xf32> to vector<14x4xf32>
    %c4_347 = arith.constant 4 : index
    %c0_348 = arith.constant 0 : index
    %c0_349 = arith.constant 0 : index
    %400 = vector.load %arg2[%c4_347, %c0_348, %c0_349] : memref<9x4x128xf32, #tpu.memory_space<vmem>>, vector<1x4x128xf32>
    %401 = vector.shape_cast %400 : vector<1x4x128xf32> to vector<4x128xf32>
    %cst_350 = arith.constant dense<0.000000e+00> : vector<14x128xf32>
    %402 = tpu.matmul %399, %401, %cst_350 {dimension_numbers = #tpu.dot_dimension_numbers<[1], [0], [0], [1], [0, 0, 1, 1], [], []>} : vector<14x4xf32>, vector<4x128xf32>, vector<14x128xf32> -> vector<14x128xf32>
    %403 = arith.addf %398, %402 : vector<14x128xf32>
    %404 = vector.extract_strided_slice %393 {offsets = [2, 0], sizes = [14, 4], strides = [1, 1]} : vector<16x4xf32> to vector<14x4xf32>
    %c5_351 = arith.constant 5 : index
    %c0_352 = arith.constant 0 : index
    %c0_353 = arith.constant 0 : index
    %405 = vector.load %arg2[%c5_351, %c0_352, %c0_353] : memref<9x4x128xf32, #tpu.memory_space<vmem>>, vector<1x4x128xf32>
    %406 = vector.shape_cast %405 : vector<1x4x128xf32> to vector<4x128xf32>
    %cst_354 = arith.constant dense<0.000000e+00> : vector<14x128xf32>
    %407 = tpu.matmul %404, %406, %cst_354 {dimension_numbers = #tpu.dot_dimension_numbers<[1], [0], [0], [1], [0, 0, 1, 1], [], []>} : vector<14x4xf32>, vector<4x128xf32>, vector<14x128xf32> -> vector<14x128xf32>
    %408 = arith.addf %403, %407 : vector<14x128xf32>
    %c0_355 = arith.constant 0 : index
    %c8_356 = arith.constant 8 : index
    %c0_357 = arith.constant 0 : index
    %c0_358 = arith.constant 0 : index
    %409 = vector.load %arg1[%c0_355, %c8_356, %c0_357, %c0_358] : memref<1x16x16x4xf32, #tpu.memory_space<vmem>>, vector<1x1x16x4xf32>
    %410 = vector.shape_cast %409 : vector<1x1x16x4xf32> to vector<16x4xf32>
    %411 = vector.extract_strided_slice %410 {offsets = [0, 0], sizes = [14, 4], strides = [1, 1]} : vector<16x4xf32> to vector<14x4xf32>
    %c6_359 = arith.constant 6 : index
    %c0_360 = arith.constant 0 : index
    %c0_361 = arith.constant 0 : index
    %412 = vector.load %arg2[%c6_359, %c0_360, %c0_361] : memref<9x4x128xf32, #tpu.memory_space<vmem>>, vector<1x4x128xf32>
    %413 = vector.shape_cast %412 : vector<1x4x128xf32> to vector<4x128xf32>
    %cst_362 = arith.constant dense<0.000000e+00> : vector<14x128xf32>
    %414 = tpu.matmul %411, %413, %cst_362 {dimension_numbers = #tpu.dot_dimension_numbers<[1], [0], [0], [1], [0, 0, 1, 1], [], []>} : vector<14x4xf32>, vector<4x128xf32>, vector<14x128xf32> -> vector<14x128xf32>
    %415 = arith.addf %408, %414 : vector<14x128xf32>
    %416 = vector.extract_strided_slice %410 {offsets = [1, 0], sizes = [14, 4], strides = [1, 1]} : vector<16x4xf32> to vector<14x4xf32>
    %c7_363 = arith.constant 7 : index
    %c0_364 = arith.constant 0 : index
    %c0_365 = arith.constant 0 : index
    %417 = vector.load %arg2[%c7_363, %c0_364, %c0_365] : memref<9x4x128xf32, #tpu.memory_space<vmem>>, vector<1x4x128xf32>
    %418 = vector.shape_cast %417 : vector<1x4x128xf32> to vector<4x128xf32>
    %cst_366 = arith.constant dense<0.000000e+00> : vector<14x128xf32>
    %419 = tpu.matmul %416, %418, %cst_366 {dimension_numbers = #tpu.dot_dimension_numbers<[1], [0], [0], [1], [0, 0, 1, 1], [], []>} : vector<14x4xf32>, vector<4x128xf32>, vector<14x128xf32> -> vector<14x128xf32>
    %420 = arith.addf %415, %419 : vector<14x128xf32>
    %421 = vector.extract_strided_slice %410 {offsets = [2, 0], sizes = [14, 4], strides = [1, 1]} : vector<16x4xf32> to vector<14x4xf32>
    %c8_367 = arith.constant 8 : index
    %c0_368 = arith.constant 0 : index
    %c0_369 = arith.constant 0 : index
    %422 = vector.load %arg2[%c8_367, %c0_368, %c0_369] : memref<9x4x128xf32, #tpu.memory_space<vmem>>, vector<1x4x128xf32>
    %423 = vector.shape_cast %422 : vector<1x4x128xf32> to vector<4x128xf32>
    %cst_370 = arith.constant dense<0.000000e+00> : vector<14x128xf32>
    %424 = tpu.matmul %421, %423, %cst_370 {dimension_numbers = #tpu.dot_dimension_numbers<[1], [0], [0], [1], [0, 0, 1, 1], [], []>} : vector<14x4xf32>, vector<4x128xf32>, vector<14x128xf32> -> vector<14x128xf32>
    %425 = arith.addf %420, %424 : vector<14x128xf32>
    %c0_371 = arith.constant 0 : index
    %c6_372 = arith.constant 6 : index
    %c0_373 = arith.constant 0 : index
    %c0_374 = arith.constant 0 : index
    %426 = vector.load %arg3[%c0_371, %c6_372, %c0_373, %c0_374] : memref<1x14x14x128xf32, #tpu.memory_space<vmem>>, vector<1x1x14x128xf32>
    %427 = vector.shape_cast %426 : vector<1x1x14x128xf32> to vector<14x128xf32>
    %428 = vector.shape_cast %425 : vector<14x128xf32> to vector<1x1x14x128xf32>
    tpu.vector_store %arg3[%c0_371, %c6_372, %c0_373, %c0_374], %428 {strides = array<i32>} : memref<1x14x14x128xf32, #tpu.memory_space<vmem>>, vector<1x1x14x128xf32>,
    %cst_375 = arith.constant dense<0.000000e+00> : vector<128xf32>
    %429 = vector.multi_reduction <add>, %425, %cst_375 [0] : vector<14x128xf32> to vector<128xf32>
    %430 = vector.shape_cast %429 : vector<128xf32> to vector<1x128xf32>
    %431 = arith.addf %369, %430 : vector<1x128xf32>
    %432 = arith.mulf %425, %425 : vector<14x128xf32>
    %cst_376 = arith.constant dense<0.000000e+00> : vector<128xf32>
    %433 = vector.multi_reduction <add>, %432, %cst_376 [0] : vector<14x128xf32> to vector<128xf32>
    %434 = vector.shape_cast %433 : vector<128xf32> to vector<1x128xf32>
    %435 = arith.addf %373, %434 : vector<1x128xf32>
    %cst_377 = arith.constant 0.000000e+00 : f32
    %436 = vector.broadcast %cst_377 : f32 to vector<14x128xf32>
    %c0_378 = arith.constant 0 : index
    %c7_379 = arith.constant 7 : index
    %c0_380 = arith.constant 0 : index
    %c0_381 = arith.constant 0 : index
    %437 = vector.load %arg1[%c0_378, %c7_379, %c0_380, %c0_381] : memref<1x16x16x4xf32, #tpu.memory_space<vmem>>, vector<1x1x16x4xf32>
    %438 = vector.shape_cast %437 : vector<1x1x16x4xf32> to vector<16x4xf32>
    %439 = vector.extract_strided_slice %438 {offsets = [0, 0], sizes = [14, 4], strides = [1, 1]} : vector<16x4xf32> to vector<14x4xf32>
    %c0_382 = arith.constant 0 : index
    %c0_383 = arith.constant 0 : index
    %c0_384 = arith.constant 0 : index
    %440 = vector.load %arg2[%c0_382, %c0_383, %c0_384] : memref<9x4x128xf32, #tpu.memory_space<vmem>>, vector<1x4x128xf32>
    %441 = vector.shape_cast %440 : vector<1x4x128xf32> to vector<4x128xf32>
    %cst_385 = arith.constant dense<0.000000e+00> : vector<14x128xf32>
    %442 = tpu.matmul %439, %441, %cst_385 {dimension_numbers = #tpu.dot_dimension_numbers<[1], [0], [0], [1], [0, 0, 1, 1], [], []>} : vector<14x4xf32>, vector<4x128xf32>, vector<14x128xf32> -> vector<14x128xf32>
    %443 = arith.addf %436, %442 : vector<14x128xf32>
    %444 = vector.extract_strided_slice %438 {offsets = [1, 0], sizes = [14, 4], strides = [1, 1]} : vector<16x4xf32> to vector<14x4xf32>
    %c1_386 = arith.constant 1 : index
    %c0_387 = arith.constant 0 : index
    %c0_388 = arith.constant 0 : index
    %445 = vector.load %arg2[%c1_386, %c0_387, %c0_388] : memref<9x4x128xf32, #tpu.memory_space<vmem>>, vector<1x4x128xf32>
    %446 = vector.shape_cast %445 : vector<1x4x128xf32> to vector<4x128xf32>
    %cst_389 = arith.constant dense<0.000000e+00> : vector<14x128xf32>
    %447 = tpu.matmul %444, %446, %cst_389 {dimension_numbers = #tpu.dot_dimension_numbers<[1], [0], [0], [1], [0, 0, 1, 1], [], []>} : vector<14x4xf32>, vector<4x128xf32>, vector<14x128xf32> -> vector<14x128xf32>
    %448 = arith.addf %443, %447 : vector<14x128xf32>
    %449 = vector.extract_strided_slice %438 {offsets = [2, 0], sizes = [14, 4], strides = [1, 1]} : vector<16x4xf32> to vector<14x4xf32>
    %c2_390 = arith.constant 2 : index
    %c0_391 = arith.constant 0 : index
    %c0_392 = arith.constant 0 : index
    %450 = vector.load %arg2[%c2_390, %c0_391, %c0_392] : memref<9x4x128xf32, #tpu.memory_space<vmem>>, vector<1x4x128xf32>
    %451 = vector.shape_cast %450 : vector<1x4x128xf32> to vector<4x128xf32>
    %cst_393 = arith.constant dense<0.000000e+00> : vector<14x128xf32>
    %452 = tpu.matmul %449, %451, %cst_393 {dimension_numbers = #tpu.dot_dimension_numbers<[1], [0], [0], [1], [0, 0, 1, 1], [], []>} : vector<14x4xf32>, vector<4x128xf32>, vector<14x128xf32> -> vector<14x128xf32>
    %453 = arith.addf %448, %452 : vector<14x128xf32>
    %c0_394 = arith.constant 0 : index
    %c8_395 = arith.constant 8 : index
    %c0_396 = arith.constant 0 : index
    %c0_397 = arith.constant 0 : index
    %454 = vector.load %arg1[%c0_394, %c8_395, %c0_396, %c0_397] : memref<1x16x16x4xf32, #tpu.memory_space<vmem>>, vector<1x1x16x4xf32>
    %455 = vector.shape_cast %454 : vector<1x1x16x4xf32> to vector<16x4xf32>
    %456 = vector.extract_strided_slice %455 {offsets = [0, 0], sizes = [14, 4], strides = [1, 1]} : vector<16x4xf32> to vector<14x4xf32>
    %c3_398 = arith.constant 3 : index
    %c0_399 = arith.constant 0 : index
    %c0_400 = arith.constant 0 : index
    %457 = vector.load %arg2[%c3_398, %c0_399, %c0_400] : memref<9x4x128xf32, #tpu.memory_space<vmem>>, vector<1x4x128xf32>
    %458 = vector.shape_cast %457 : vector<1x4x128xf32> to vector<4x128xf32>
    %cst_401 = arith.constant dense<0.000000e+00> : vector<14x128xf32>
    %459 = tpu.matmul %456, %458, %cst_401 {dimension_numbers = #tpu.dot_dimension_numbers<[1], [0], [0], [1], [0, 0, 1, 1], [], []>} : vector<14x4xf32>, vector<4x128xf32>, vector<14x128xf32> -> vector<14x128xf32>
    %460 = arith.addf %453, %459 : vector<14x128xf32>
    %461 = vector.extract_strided_slice %455 {offsets = [1, 0], sizes = [14, 4], strides = [1, 1]} : vector<16x4xf32> to vector<14x4xf32>
    %c4_402 = arith.constant 4 : index
    %c0_403 = arith.constant 0 : index
    %c0_404 = arith.constant 0 : index
    %462 = vector.load %arg2[%c4_402, %c0_403, %c0_404] : memref<9x4x128xf32, #tpu.memory_space<vmem>>, vector<1x4x128xf32>
    %463 = vector.shape_cast %462 : vector<1x4x128xf32> to vector<4x128xf32>
    %cst_405 = arith.constant dense<0.000000e+00> : vector<14x128xf32>
    %464 = tpu.matmul %461, %463, %cst_405 {dimension_numbers = #tpu.dot_dimension_numbers<[1], [0], [0], [1], [0, 0, 1, 1], [], []>} : vector<14x4xf32>, vector<4x128xf32>, vector<14x128xf32> -> vector<14x128xf32>
    %465 = arith.addf %460, %464 : vector<14x128xf32>
    %466 = vector.extract_strided_slice %455 {offsets = [2, 0], sizes = [14, 4], strides = [1, 1]} : vector<16x4xf32> to vector<14x4xf32>
    %c5_406 = arith.constant 5 : index
    %c0_407 = arith.constant 0 : index
    %c0_408 = arith.constant 0 : index
    %467 = vector.load %arg2[%c5_406, %c0_407, %c0_408] : memref<9x4x128xf32, #tpu.memory_space<vmem>>, vector<1x4x128xf32>
    %468 = vector.shape_cast %467 : vector<1x4x128xf32> to vector<4x128xf32>
    %cst_409 = arith.constant dense<0.000000e+00> : vector<14x128xf32>
    %469 = tpu.matmul %466, %468, %cst_409 {dimension_numbers = #tpu.dot_dimension_numbers<[1], [0], [0], [1], [0, 0, 1, 1], [], []>} : vector<14x4xf32>, vector<4x128xf32>, vector<14x128xf32> -> vector<14x128xf32>
    %470 = arith.addf %465, %469 : vector<14x128xf32>
    %c0_410 = arith.constant 0 : index
    %c9 = arith.constant 9 : index
    %c0_411 = arith.constant 0 : index
    %c0_412 = arith.constant 0 : index
    %471 = vector.load %arg1[%c0_410, %c9, %c0_411, %c0_412] : memref<1x16x16x4xf32, #tpu.memory_space<vmem>>, vector<1x1x16x4xf32>
    %472 = vector.shape_cast %471 : vector<1x1x16x4xf32> to vector<16x4xf32>
    %473 = vector.extract_strided_slice %472 {offsets = [0, 0], sizes = [14, 4], strides = [1, 1]} : vector<16x4xf32> to vector<14x4xf32>
    %c6_413 = arith.constant 6 : index
    %c0_414 = arith.constant 0 : index
    %c0_415 = arith.constant 0 : index
    %474 = vector.load %arg2[%c6_413, %c0_414, %c0_415] : memref<9x4x128xf32, #tpu.memory_space<vmem>>, vector<1x4x128xf32>
    %475 = vector.shape_cast %474 : vector<1x4x128xf32> to vector<4x128xf32>
    %cst_416 = arith.constant dense<0.000000e+00> : vector<14x128xf32>
    %476 = tpu.matmul %473, %475, %cst_416 {dimension_numbers = #tpu.dot_dimension_numbers<[1], [0], [0], [1], [0, 0, 1, 1], [], []>} : vector<14x4xf32>, vector<4x128xf32>, vector<14x128xf32> -> vector<14x128xf32>
    %477 = arith.addf %470, %476 : vector<14x128xf32>
    %478 = vector.extract_strided_slice %472 {offsets = [1, 0], sizes = [14, 4], strides = [1, 1]} : vector<16x4xf32> to vector<14x4xf32>
    %c7_417 = arith.constant 7 : index
    %c0_418 = arith.constant 0 : index
    %c0_419 = arith.constant 0 : index
    %479 = vector.load %arg2[%c7_417, %c0_418, %c0_419] : memref<9x4x128xf32, #tpu.memory_space<vmem>>, vector<1x4x128xf32>
    %480 = vector.shape_cast %479 : vector<1x4x128xf32> to vector<4x128xf32>
    %cst_420 = arith.constant dense<0.000000e+00> : vector<14x128xf32>
    %481 = tpu.matmul %478, %480, %cst_420 {dimension_numbers = #tpu.dot_dimension_numbers<[1], [0], [0], [1], [0, 0, 1, 1], [], []>} : vector<14x4xf32>, vector<4x128xf32>, vector<14x128xf32> -> vector<14x128xf32>
    %482 = arith.addf %477, %481 : vector<14x128xf32>
    %483 = vector.extract_strided_slice %472 {offsets = [2, 0], sizes = [14, 4], strides = [1, 1]} : vector<16x4xf32> to vector<14x4xf32>
    %c8_421 = arith.constant 8 : index
    %c0_422 = arith.constant 0 : index
    %c0_423 = arith.constant 0 : index
    %484 = vector.load %arg2[%c8_421, %c0_422, %c0_423] : memref<9x4x128xf32, #tpu.memory_space<vmem>>, vector<1x4x128xf32>
    %485 = vector.shape_cast %484 : vector<1x4x128xf32> to vector<4x128xf32>
    %cst_424 = arith.constant dense<0.000000e+00> : vector<14x128xf32>
    %486 = tpu.matmul %483, %485, %cst_424 {dimension_numbers = #tpu.dot_dimension_numbers<[1], [0], [0], [1], [0, 0, 1, 1], [], []>} : vector<14x4xf32>, vector<4x128xf32>, vector<14x128xf32> -> vector<14x128xf32>
    %487 = arith.addf %482, %486 : vector<14x128xf32>
    %c0_425 = arith.constant 0 : index
    %c7_426 = arith.constant 7 : index
    %c0_427 = arith.constant 0 : index
    %c0_428 = arith.constant 0 : index
    %488 = vector.load %arg3[%c0_425, %c7_426, %c0_427, %c0_428] : memref<1x14x14x128xf32, #tpu.memory_space<vmem>>, vector<1x1x14x128xf32>
    %489 = vector.shape_cast %488 : vector<1x1x14x128xf32> to vector<14x128xf32>
    %490 = vector.shape_cast %487 : vector<14x128xf32> to vector<1x1x14x128xf32>
    tpu.vector_store %arg3[%c0_425, %c7_426, %c0_427, %c0_428], %490 {strides = array<i32>} : memref<1x14x14x128xf32, #tpu.memory_space<vmem>>, vector<1x1x14x128xf32>,
    %cst_429 = arith.constant dense<0.000000e+00> : vector<128xf32>
    %491 = vector.multi_reduction <add>, %487, %cst_429 [0] : vector<14x128xf32> to vector<128xf32>
    %492 = vector.shape_cast %491 : vector<128xf32> to vector<1x128xf32>
    %493 = arith.addf %431, %492 : vector<1x128xf32>
    %494 = arith.mulf %487, %487 : vector<14x128xf32>
    %cst_430 = arith.constant dense<0.000000e+00> : vector<128xf32>
    %495 = vector.multi_reduction <add>, %494, %cst_430 [0] : vector<14x128xf32> to vector<128xf32>
    %496 = vector.shape_cast %495 : vector<128xf32> to vector<1x128xf32>
    %497 = arith.addf %435, %496 : vector<1x128xf32>
    %cst_431 = arith.constant 0.000000e+00 : f32
    %498 = vector.broadcast %cst_431 : f32 to vector<14x128xf32>
    %c0_432 = arith.constant 0 : index
    %c8_433 = arith.constant 8 : index
    %c0_434 = arith.constant 0 : index
    %c0_435 = arith.constant 0 : index
    %499 = vector.load %arg1[%c0_432, %c8_433, %c0_434, %c0_435] : memref<1x16x16x4xf32, #tpu.memory_space<vmem>>, vector<1x1x16x4xf32>
    %500 = vector.shape_cast %499 : vector<1x1x16x4xf32> to vector<16x4xf32>
    %501 = vector.extract_strided_slice %500 {offsets = [0, 0], sizes = [14, 4], strides = [1, 1]} : vector<16x4xf32> to vector<14x4xf32>
    %c0_436 = arith.constant 0 : index
    %c0_437 = arith.constant 0 : index
    %c0_438 = arith.constant 0 : index
    %502 = vector.load %arg2[%c0_436, %c0_437, %c0_438] : memref<9x4x128xf32, #tpu.memory_space<vmem>>, vector<1x4x128xf32>
    %503 = vector.shape_cast %502 : vector<1x4x128xf32> to vector<4x128xf32>
    %cst_439 = arith.constant dense<0.000000e+00> : vector<14x128xf32>
    %504 = tpu.matmul %501, %503, %cst_439 {dimension_numbers = #tpu.dot_dimension_numbers<[1], [0], [0], [1], [0, 0, 1, 1], [], []>} : vector<14x4xf32>, vector<4x128xf32>, vector<14x128xf32> -> vector<14x128xf32>
    %505 = arith.addf %498, %504 : vector<14x128xf32>
    %506 = vector.extract_strided_slice %500 {offsets = [1, 0], sizes = [14, 4], strides = [1, 1]} : vector<16x4xf32> to vector<14x4xf32>
    %c1_440 = arith.constant 1 : index
    %c0_441 = arith.constant 0 : index
    %c0_442 = arith.constant 0 : index
    %507 = vector.load %arg2[%c1_440, %c0_441, %c0_442] : memref<9x4x128xf32, #tpu.memory_space<vmem>>, vector<1x4x128xf32>
    %508 = vector.shape_cast %507 : vector<1x4x128xf32> to vector<4x128xf32>
    %cst_443 = arith.constant dense<0.000000e+00> : vector<14x128xf32>
    %509 = tpu.matmul %506, %508, %cst_443 {dimension_numbers = #tpu.dot_dimension_numbers<[1], [0], [0], [1], [0, 0, 1, 1], [], []>} : vector<14x4xf32>, vector<4x128xf32>, vector<14x128xf32> -> vector<14x128xf32>
    %510 = arith.addf %505, %509 : vector<14x128xf32>
    %511 = vector.extract_strided_slice %500 {offsets = [2, 0], sizes = [14, 4], strides = [1, 1]} : vector<16x4xf32> to vector<14x4xf32>
    %c2_444 = arith.constant 2 : index
    %c0_445 = arith.constant 0 : index
    %c0_446 = arith.constant 0 : index
    %512 = vector.load %arg2[%c2_444, %c0_445, %c0_446] : memref<9x4x128xf32, #tpu.memory_space<vmem>>, vector<1x4x128xf32>
    %513 = vector.shape_cast %512 : vector<1x4x128xf32> to vector<4x128xf32>
    %cst_447 = arith.constant dense<0.000000e+00> : vector<14x128xf32>
    %514 = tpu.matmul %511, %513, %cst_447 {dimension_numbers = #tpu.dot_dimension_numbers<[1], [0], [0], [1], [0, 0, 1, 1], [], []>} : vector<14x4xf32>, vector<4x128xf32>, vector<14x128xf32> -> vector<14x128xf32>
    %515 = arith.addf %510, %514 : vector<14x128xf32>
    %c0_448 = arith.constant 0 : index
    %c9_449 = arith.constant 9 : index
    %c0_450 = arith.constant 0 : index
    %c0_451 = arith.constant 0 : index
    %516 = vector.load %arg1[%c0_448, %c9_449, %c0_450, %c0_451] : memref<1x16x16x4xf32, #tpu.memory_space<vmem>>, vector<1x1x16x4xf32>
    %517 = vector.shape_cast %516 : vector<1x1x16x4xf32> to vector<16x4xf32>
    %518 = vector.extract_strided_slice %517 {offsets = [0, 0], sizes = [14, 4], strides = [1, 1]} : vector<16x4xf32> to vector<14x4xf32>
    %c3_452 = arith.constant 3 : index
    %c0_453 = arith.constant 0 : index
    %c0_454 = arith.constant 0 : index
    %519 = vector.load %arg2[%c3_452, %c0_453, %c0_454] : memref<9x4x128xf32, #tpu.memory_space<vmem>>, vector<1x4x128xf32>
    %520 = vector.shape_cast %519 : vector<1x4x128xf32> to vector<4x128xf32>
    %cst_455 = arith.constant dense<0.000000e+00> : vector<14x128xf32>
    %521 = tpu.matmul %518, %520, %cst_455 {dimension_numbers = #tpu.dot_dimension_numbers<[1], [0], [0], [1], [0, 0, 1, 1], [], []>} : vector<14x4xf32>, vector<4x128xf32>, vector<14x128xf32> -> vector<14x128xf32>
    %522 = arith.addf %515, %521 : vector<14x128xf32>
    %523 = vector.extract_strided_slice %517 {offsets = [1, 0], sizes = [14, 4], strides = [1, 1]} : vector<16x4xf32> to vector<14x4xf32>
    %c4_456 = arith.constant 4 : index
    %c0_457 = arith.constant 0 : index
    %c0_458 = arith.constant 0 : index
    %524 = vector.load %arg2[%c4_456, %c0_457, %c0_458] : memref<9x4x128xf32, #tpu.memory_space<vmem>>, vector<1x4x128xf32>
    %525 = vector.shape_cast %524 : vector<1x4x128xf32> to vector<4x128xf32>
    %cst_459 = arith.constant dense<0.000000e+00> : vector<14x128xf32>
    %526 = tpu.matmul %523, %525, %cst_459 {dimension_numbers = #tpu.dot_dimension_numbers<[1], [0], [0], [1], [0, 0, 1, 1], [], []>} : vector<14x4xf32>, vector<4x128xf32>, vector<14x128xf32> -> vector<14x128xf32>
    %527 = arith.addf %522, %526 : vector<14x128xf32>
    %528 = vector.extract_strided_slice %517 {offsets = [2, 0], sizes = [14, 4], strides = [1, 1]} : vector<16x4xf32> to vector<14x4xf32>
    %c5_460 = arith.constant 5 : index
    %c0_461 = arith.constant 0 : index
    %c0_462 = arith.constant 0 : index
    %529 = vector.load %arg2[%c5_460, %c0_461, %c0_462] : memref<9x4x128xf32, #tpu.memory_space<vmem>>, vector<1x4x128xf32>
    %530 = vector.shape_cast %529 : vector<1x4x128xf32> to vector<4x128xf32>
    %cst_463 = arith.constant dense<0.000000e+00> : vector<14x128xf32>
    %531 = tpu.matmul %528, %530, %cst_463 {dimension_numbers = #tpu.dot_dimension_numbers<[1], [0], [0], [1], [0, 0, 1, 1], [], []>} : vector<14x4xf32>, vector<4x128xf32>, vector<14x128xf32> -> vector<14x128xf32>
    %532 = arith.addf %527, %531 : vector<14x128xf32>
    %c0_464 = arith.constant 0 : index
    %c10 = arith.constant 10 : index
    %c0_465 = arith.constant 0 : index
    %c0_466 = arith.constant 0 : index
    %533 = vector.load %arg1[%c0_464, %c10, %c0_465, %c0_466] : memref<1x16x16x4xf32, #tpu.memory_space<vmem>>, vector<1x1x16x4xf32>
    %534 = vector.shape_cast %533 : vector<1x1x16x4xf32> to vector<16x4xf32>
    %535 = vector.extract_strided_slice %534 {offsets = [0, 0], sizes = [14, 4], strides = [1, 1]} : vector<16x4xf32> to vector<14x4xf32>
    %c6_467 = arith.constant 6 : index
    %c0_468 = arith.constant 0 : index
    %c0_469 = arith.constant 0 : index
    %536 = vector.load %arg2[%c6_467, %c0_468, %c0_469] : memref<9x4x128xf32, #tpu.memory_space<vmem>>, vector<1x4x128xf32>
    %537 = vector.shape_cast %536 : vector<1x4x128xf32> to vector<4x128xf32>
    %cst_470 = arith.constant dense<0.000000e+00> : vector<14x128xf32>
    %538 = tpu.matmul %535, %537, %cst_470 {dimension_numbers = #tpu.dot_dimension_numbers<[1], [0], [0], [1], [0, 0, 1, 1], [], []>} : vector<14x4xf32>, vector<4x128xf32>, vector<14x128xf32> -> vector<14x128xf32>
    %539 = arith.addf %532, %538 : vector<14x128xf32>
    %540 = vector.extract_strided_slice %534 {offsets = [1, 0], sizes = [14, 4], strides = [1, 1]} : vector<16x4xf32> to vector<14x4xf32>
    %c7_471 = arith.constant 7 : index
    %c0_472 = arith.constant 0 : index
    %c0_473 = arith.constant 0 : index
    %541 = vector.load %arg2[%c7_471, %c0_472, %c0_473] : memref<9x4x128xf32, #tpu.memory_space<vmem>>, vector<1x4x128xf32>
    %542 = vector.shape_cast %541 : vector<1x4x128xf32> to vector<4x128xf32>
    %cst_474 = arith.constant dense<0.000000e+00> : vector<14x128xf32>
    %543 = tpu.matmul %540, %542, %cst_474 {dimension_numbers = #tpu.dot_dimension_numbers<[1], [0], [0], [1], [0, 0, 1, 1], [], []>} : vector<14x4xf32>, vector<4x128xf32>, vector<14x128xf32> -> vector<14x128xf32>
    %544 = arith.addf %539, %543 : vector<14x128xf32>
    %545 = vector.extract_strided_slice %534 {offsets = [2, 0], sizes = [14, 4], strides = [1, 1]} : vector<16x4xf32> to vector<14x4xf32>
    %c8_475 = arith.constant 8 : index
    %c0_476 = arith.constant 0 : index
    %c0_477 = arith.constant 0 : index
    %546 = vector.load %arg2[%c8_475, %c0_476, %c0_477] : memref<9x4x128xf32, #tpu.memory_space<vmem>>, vector<1x4x128xf32>
    %547 = vector.shape_cast %546 : vector<1x4x128xf32> to vector<4x128xf32>
    %cst_478 = arith.constant dense<0.000000e+00> : vector<14x128xf32>
    %548 = tpu.matmul %545, %547, %cst_478 {dimension_numbers = #tpu.dot_dimension_numbers<[1], [0], [0], [1], [0, 0, 1, 1], [], []>} : vector<14x4xf32>, vector<4x128xf32>, vector<14x128xf32> -> vector<14x128xf32>
    %549 = arith.addf %544, %548 : vector<14x128xf32>
    %c0_479 = arith.constant 0 : index
    %c8_480 = arith.constant 8 : index
    %c0_481 = arith.constant 0 : index
    %c0_482 = arith.constant 0 : index
    %550 = vector.load %arg3[%c0_479, %c8_480, %c0_481, %c0_482] : memref<1x14x14x128xf32, #tpu.memory_space<vmem>>, vector<1x1x14x128xf32>
    %551 = vector.shape_cast %550 : vector<1x1x14x128xf32> to vector<14x128xf32>
    %552 = vector.shape_cast %549 : vector<14x128xf32> to vector<1x1x14x128xf32>
    tpu.vector_store %arg3[%c0_479, %c8_480, %c0_481, %c0_482], %552 {strides = array<i32>} : memref<1x14x14x128xf32, #tpu.memory_space<vmem>>, vector<1x1x14x128xf32>,
    %cst_483 = arith.constant dense<0.000000e+00> : vector<128xf32>
    %553 = vector.multi_reduction <add>, %549, %cst_483 [0] : vector<14x128xf32> to vector<128xf32>
    %554 = vector.shape_cast %553 : vector<128xf32> to vector<1x128xf32>
    %555 = arith.addf %493, %554 : vector<1x128xf32>
    %556 = arith.mulf %549, %549 : vector<14x128xf32>
    %cst_484 = arith.constant dense<0.000000e+00> : vector<128xf32>
    %557 = vector.multi_reduction <add>, %556, %cst_484 [0] : vector<14x128xf32> to vector<128xf32>
    %558 = vector.shape_cast %557 : vector<128xf32> to vector<1x128xf32>
    %559 = arith.addf %497, %558 : vector<1x128xf32>
    %cst_485 = arith.constant 0.000000e+00 : f32
    %560 = vector.broadcast %cst_485 : f32 to vector<14x128xf32>
    %c0_486 = arith.constant 0 : index
    %c9_487 = arith.constant 9 : index
    %c0_488 = arith.constant 0 : index
    %c0_489 = arith.constant 0 : index
    %561 = vector.load %arg1[%c0_486, %c9_487, %c0_488, %c0_489] : memref<1x16x16x4xf32, #tpu.memory_space<vmem>>, vector<1x1x16x4xf32>
    %562 = vector.shape_cast %561 : vector<1x1x16x4xf32> to vector<16x4xf32>
    %563 = vector.extract_strided_slice %562 {offsets = [0, 0], sizes = [14, 4], strides = [1, 1]} : vector<16x4xf32> to vector<14x4xf32>
    %c0_490 = arith.constant 0 : index
    %c0_491 = arith.constant 0 : index
    %c0_492 = arith.constant 0 : index
    %564 = vector.load %arg2[%c0_490, %c0_491, %c0_492] : memref<9x4x128xf32, #tpu.memory_space<vmem>>, vector<1x4x128xf32>
    %565 = vector.shape_cast %564 : vector<1x4x128xf32> to vector<4x128xf32>
    %cst_493 = arith.constant dense<0.000000e+00> : vector<14x128xf32>
    %566 = tpu.matmul %563, %565, %cst_493 {dimension_numbers = #tpu.dot_dimension_numbers<[1], [0], [0], [1], [0, 0, 1, 1], [], []>} : vector<14x4xf32>, vector<4x128xf32>, vector<14x128xf32> -> vector<14x128xf32>
    %567 = arith.addf %560, %566 : vector<14x128xf32>
    %568 = vector.extract_strided_slice %562 {offsets = [1, 0], sizes = [14, 4], strides = [1, 1]} : vector<16x4xf32> to vector<14x4xf32>
    %c1_494 = arith.constant 1 : index
    %c0_495 = arith.constant 0 : index
    %c0_496 = arith.constant 0 : index
    %569 = vector.load %arg2[%c1_494, %c0_495, %c0_496] : memref<9x4x128xf32, #tpu.memory_space<vmem>>, vector<1x4x128xf32>
    %570 = vector.shape_cast %569 : vector<1x4x128xf32> to vector<4x128xf32>
    %cst_497 = arith.constant dense<0.000000e+00> : vector<14x128xf32>
    %571 = tpu.matmul %568, %570, %cst_497 {dimension_numbers = #tpu.dot_dimension_numbers<[1], [0], [0], [1], [0, 0, 1, 1], [], []>} : vector<14x4xf32>, vector<4x128xf32>, vector<14x128xf32> -> vector<14x128xf32>
    %572 = arith.addf %567, %571 : vector<14x128xf32>
    %573 = vector.extract_strided_slice %562 {offsets = [2, 0], sizes = [14, 4], strides = [1, 1]} : vector<16x4xf32> to vector<14x4xf32>
    %c2_498 = arith.constant 2 : index
    %c0_499 = arith.constant 0 : index
    %c0_500 = arith.constant 0 : index
    %574 = vector.load %arg2[%c2_498, %c0_499, %c0_500] : memref<9x4x128xf32, #tpu.memory_space<vmem>>, vector<1x4x128xf32>
    %575 = vector.shape_cast %574 : vector<1x4x128xf32> to vector<4x128xf32>
    %cst_501 = arith.constant dense<0.000000e+00> : vector<14x128xf32>
    %576 = tpu.matmul %573, %575, %cst_501 {dimension_numbers = #tpu.dot_dimension_numbers<[1], [0], [0], [1], [0, 0, 1, 1], [], []>} : vector<14x4xf32>, vector<4x128xf32>, vector<14x128xf32> -> vector<14x128xf32>
    %577 = arith.addf %572, %576 : vector<14x128xf32>
    %c0_502 = arith.constant 0 : index
    %c10_503 = arith.constant 10 : index
    %c0_504 = arith.constant 0 : index
    %c0_505 = arith.constant 0 : index
    %578 = vector.load %arg1[%c0_502, %c10_503, %c0_504, %c0_505] : memref<1x16x16x4xf32, #tpu.memory_space<vmem>>, vector<1x1x16x4xf32>
    %579 = vector.shape_cast %578 : vector<1x1x16x4xf32> to vector<16x4xf32>
    %580 = vector.extract_strided_slice %579 {offsets = [0, 0], sizes = [14, 4], strides = [1, 1]} : vector<16x4xf32> to vector<14x4xf32>
    %c3_506 = arith.constant 3 : index
    %c0_507 = arith.constant 0 : index
    %c0_508 = arith.constant 0 : index
    %581 = vector.load %arg2[%c3_506, %c0_507, %c0_508] : memref<9x4x128xf32, #tpu.memory_space<vmem>>, vector<1x4x128xf32>
    %582 = vector.shape_cast %581 : vector<1x4x128xf32> to vector<4x128xf32>
    %cst_509 = arith.constant dense<0.000000e+00> : vector<14x128xf32>
    %583 = tpu.matmul %580, %582, %cst_509 {dimension_numbers = #tpu.dot_dimension_numbers<[1], [0], [0], [1], [0, 0, 1, 1], [], []>} : vector<14x4xf32>, vector<4x128xf32>, vector<14x128xf32> -> vector<14x128xf32>
    %584 = arith.addf %577, %583 : vector<14x128xf32>
    %585 = vector.extract_strided_slice %579 {offsets = [1, 0], sizes = [14, 4], strides = [1, 1]} : vector<16x4xf32> to vector<14x4xf32>
    %c4_510 = arith.constant 4 : index
    %c0_511 = arith.constant 0 : index
    %c0_512 = arith.constant 0 : index
    %586 = vector.load %arg2[%c4_510, %c0_511, %c0_512] : memref<9x4x128xf32, #tpu.memory_space<vmem>>, vector<1x4x128xf32>
    %587 = vector.shape_cast %586 : vector<1x4x128xf32> to vector<4x128xf32>
    %cst_513 = arith.constant dense<0.000000e+00> : vector<14x128xf32>
    %588 = tpu.matmul %585, %587, %cst_513 {dimension_numbers = #tpu.dot_dimension_numbers<[1], [0], [0], [1], [0, 0, 1, 1], [], []>} : vector<14x4xf32>, vector<4x128xf32>, vector<14x128xf32> -> vector<14x128xf32>
    %589 = arith.addf %584, %588 : vector<14x128xf32>
    %590 = vector.extract_strided_slice %579 {offsets = [2, 0], sizes = [14, 4], strides = [1, 1]} : vector<16x4xf32> to vector<14x4xf32>
    %c5_514 = arith.constant 5 : index
    %c0_515 = arith.constant 0 : index
    %c0_516 = arith.constant 0 : index
    %591 = vector.load %arg2[%c5_514, %c0_515, %c0_516] : memref<9x4x128xf32, #tpu.memory_space<vmem>>, vector<1x4x128xf32>
    %592 = vector.shape_cast %591 : vector<1x4x128xf32> to vector<4x128xf32>
    %cst_517 = arith.constant dense<0.000000e+00> : vector<14x128xf32>
    %593 = tpu.matmul %590, %592, %cst_517 {dimension_numbers = #tpu.dot_dimension_numbers<[1], [0], [0], [1], [0, 0, 1, 1], [], []>} : vector<14x4xf32>, vector<4x128xf32>, vector<14x128xf32> -> vector<14x128xf32>
    %594 = arith.addf %589, %593 : vector<14x128xf32>
    %c0_518 = arith.constant 0 : index
    %c11 = arith.constant 11 : index
    %c0_519 = arith.constant 0 : index
    %c0_520 = arith.constant 0 : index
    %595 = vector.load %arg1[%c0_518, %c11, %c0_519, %c0_520] : memref<1x16x16x4xf32, #tpu.memory_space<vmem>>, vector<1x1x16x4xf32>
    %596 = vector.shape_cast %595 : vector<1x1x16x4xf32> to vector<16x4xf32>
    %597 = vector.extract_strided_slice %596 {offsets = [0, 0], sizes = [14, 4], strides = [1, 1]} : vector<16x4xf32> to vector<14x4xf32>
    %c6_521 = arith.constant 6 : index
    %c0_522 = arith.constant 0 : index
    %c0_523 = arith.constant 0 : index
    %598 = vector.load %arg2[%c6_521, %c0_522, %c0_523] : memref<9x4x128xf32, #tpu.memory_space<vmem>>, vector<1x4x128xf32>
    %599 = vector.shape_cast %598 : vector<1x4x128xf32> to vector<4x128xf32>
    %cst_524 = arith.constant dense<0.000000e+00> : vector<14x128xf32>
    %600 = tpu.matmul %597, %599, %cst_524 {dimension_numbers = #tpu.dot_dimension_numbers<[1], [0], [0], [1], [0, 0, 1, 1], [], []>} : vector<14x4xf32>, vector<4x128xf32>, vector<14x128xf32> -> vector<14x128xf32>
    %601 = arith.addf %594, %600 : vector<14x128xf32>
    %602 = vector.extract_strided_slice %596 {offsets = [1, 0], sizes = [14, 4], strides = [1, 1]} : vector<16x4xf32> to vector<14x4xf32>
    %c7_525 = arith.constant 7 : index
    %c0_526 = arith.constant 0 : index
    %c0_527 = arith.constant 0 : index
    %603 = vector.load %arg2[%c7_525, %c0_526, %c0_527] : memref<9x4x128xf32, #tpu.memory_space<vmem>>, vector<1x4x128xf32>
    %604 = vector.shape_cast %603 : vector<1x4x128xf32> to vector<4x128xf32>
    %cst_528 = arith.constant dense<0.000000e+00> : vector<14x128xf32>
    %605 = tpu.matmul %602, %604, %cst_528 {dimension_numbers = #tpu.dot_dimension_numbers<[1], [0], [0], [1], [0, 0, 1, 1], [], []>} : vector<14x4xf32>, vector<4x128xf32>, vector<14x128xf32> -> vector<14x128xf32>
    %606 = arith.addf %601, %605 : vector<14x128xf32>
    %607 = vector.extract_strided_slice %596 {offsets = [2, 0], sizes = [14, 4], strides = [1, 1]} : vector<16x4xf32> to vector<14x4xf32>
    %c8_529 = arith.constant 8 : index
    %c0_530 = arith.constant 0 : index
    %c0_531 = arith.constant 0 : index
    %608 = vector.load %arg2[%c8_529, %c0_530, %c0_531] : memref<9x4x128xf32, #tpu.memory_space<vmem>>, vector<1x4x128xf32>
    %609 = vector.shape_cast %608 : vector<1x4x128xf32> to vector<4x128xf32>
    %cst_532 = arith.constant dense<0.000000e+00> : vector<14x128xf32>
    %610 = tpu.matmul %607, %609, %cst_532 {dimension_numbers = #tpu.dot_dimension_numbers<[1], [0], [0], [1], [0, 0, 1, 1], [], []>} : vector<14x4xf32>, vector<4x128xf32>, vector<14x128xf32> -> vector<14x128xf32>
    %611 = arith.addf %606, %610 : vector<14x128xf32>
    %c0_533 = arith.constant 0 : index
    %c9_534 = arith.constant 9 : index
    %c0_535 = arith.constant 0 : index
    %c0_536 = arith.constant 0 : index
    %612 = vector.load %arg3[%c0_533, %c9_534, %c0_535, %c0_536] : memref<1x14x14x128xf32, #tpu.memory_space<vmem>>, vector<1x1x14x128xf32>
    %613 = vector.shape_cast %612 : vector<1x1x14x128xf32> to vector<14x128xf32>
    %614 = vector.shape_cast %611 : vector<14x128xf32> to vector<1x1x14x128xf32>
    tpu.vector_store %arg3[%c0_533, %c9_534, %c0_535, %c0_536], %614 {strides = array<i32>} : memref<1x14x14x128xf32, #tpu.memory_space<vmem>>, vector<1x1x14x128xf32>,
    %cst_537 = arith.constant dense<0.000000e+00> : vector<128xf32>
    %615 = vector.multi_reduction <add>, %611, %cst_537 [0] : vector<14x128xf32> to vector<128xf32>
    %616 = vector.shape_cast %615 : vector<128xf32> to vector<1x128xf32>
    %617 = arith.addf %555, %616 : vector<1x128xf32>
    %618 = arith.mulf %611, %611 : vector<14x128xf32>
    %cst_538 = arith.constant dense<0.000000e+00> : vector<128xf32>
    %619 = vector.multi_reduction <add>, %618, %cst_538 [0] : vector<14x128xf32> to vector<128xf32>
    %620 = vector.shape_cast %619 : vector<128xf32> to vector<1x128xf32>
    %621 = arith.addf %559, %620 : vector<1x128xf32>
    %cst_539 = arith.constant 0.000000e+00 : f32
    %622 = vector.broadcast %cst_539 : f32 to vector<14x128xf32>
    %c0_540 = arith.constant 0 : index
    %c10_541 = arith.constant 10 : index
    %c0_542 = arith.constant 0 : index
    %c0_543 = arith.constant 0 : index
    %623 = vector.load %arg1[%c0_540, %c10_541, %c0_542, %c0_543] : memref<1x16x16x4xf32, #tpu.memory_space<vmem>>, vector<1x1x16x4xf32>
    %624 = vector.shape_cast %623 : vector<1x1x16x4xf32> to vector<16x4xf32>
    %625 = vector.extract_strided_slice %624 {offsets = [0, 0], sizes = [14, 4], strides = [1, 1]} : vector<16x4xf32> to vector<14x4xf32>
    %c0_544 = arith.constant 0 : index
    %c0_545 = arith.constant 0 : index
    %c0_546 = arith.constant 0 : index
    %626 = vector.load %arg2[%c0_544, %c0_545, %c0_546] : memref<9x4x128xf32, #tpu.memory_space<vmem>>, vector<1x4x128xf32>
    %627 = vector.shape_cast %626 : vector<1x4x128xf32> to vector<4x128xf32>
    %cst_547 = arith.constant dense<0.000000e+00> : vector<14x128xf32>
    %628 = tpu.matmul %625, %627, %cst_547 {dimension_numbers = #tpu.dot_dimension_numbers<[1], [0], [0], [1], [0, 0, 1, 1], [], []>} : vector<14x4xf32>, vector<4x128xf32>, vector<14x128xf32> -> vector<14x128xf32>
    %629 = arith.addf %622, %628 : vector<14x128xf32>
    %630 = vector.extract_strided_slice %624 {offsets = [1, 0], sizes = [14, 4], strides = [1, 1]} : vector<16x4xf32> to vector<14x4xf32>
    %c1_548 = arith.constant 1 : index
    %c0_549 = arith.constant 0 : index
    %c0_550 = arith.constant 0 : index
    %631 = vector.load %arg2[%c1_548, %c0_549, %c0_550] : memref<9x4x128xf32, #tpu.memory_space<vmem>>, vector<1x4x128xf32>
    %632 = vector.shape_cast %631 : vector<1x4x128xf32> to vector<4x128xf32>
    %cst_551 = arith.constant dense<0.000000e+00> : vector<14x128xf32>
    %633 = tpu.matmul %630, %632, %cst_551 {dimension_numbers = #tpu.dot_dimension_numbers<[1], [0], [0], [1], [0, 0, 1, 1], [], []>} : vector<14x4xf32>, vector<4x128xf32>, vector<14x128xf32> -> vector<14x128xf32>
    %634 = arith.addf %629, %633 : vector<14x128xf32>
    %635 = vector.extract_strided_slice %624 {offsets = [2, 0], sizes = [14, 4], strides = [1, 1]} : vector<16x4xf32> to vector<14x4xf32>
    %c2_552 = arith.constant 2 : index
    %c0_553 = arith.constant 0 : index
    %c0_554 = arith.constant 0 : index
    %636 = vector.load %arg2[%c2_552, %c0_553, %c0_554] : memref<9x4x128xf32, #tpu.memory_space<vmem>>, vector<1x4x128xf32>
    %637 = vector.shape_cast %636 : vector<1x4x128xf32> to vector<4x128xf32>
    %cst_555 = arith.constant dense<0.000000e+00> : vector<14x128xf32>
    %638 = tpu.matmul %635, %637, %cst_555 {dimension_numbers = #tpu.dot_dimension_numbers<[1], [0], [0], [1], [0, 0, 1, 1], [], []>} : vector<14x4xf32>, vector<4x128xf32>, vector<14x128xf32> -> vector<14x128xf32>
    %639 = arith.addf %634, %638 : vector<14x128xf32>
    %c0_556 = arith.constant 0 : index
    %c11_557 = arith.constant 11 : index
    %c0_558 = arith.constant 0 : index
    %c0_559 = arith.constant 0 : index
    %640 = vector.load %arg1[%c0_556, %c11_557, %c0_558, %c0_559] : memref<1x16x16x4xf32, #tpu.memory_space<vmem>>, vector<1x1x16x4xf32>
    %641 = vector.shape_cast %640 : vector<1x1x16x4xf32> to vector<16x4xf32>
    %642 = vector.extract_strided_slice %641 {offsets = [0, 0], sizes = [14, 4], strides = [1, 1]} : vector<16x4xf32> to vector<14x4xf32>
    %c3_560 = arith.constant 3 : index
    %c0_561 = arith.constant 0 : index
    %c0_562 = arith.constant 0 : index
    %643 = vector.load %arg2[%c3_560, %c0_561, %c0_562] : memref<9x4x128xf32, #tpu.memory_space<vmem>>, vector<1x4x128xf32>
    %644 = vector.shape_cast %643 : vector<1x4x128xf32> to vector<4x128xf32>
    %cst_563 = arith.constant dense<0.000000e+00> : vector<14x128xf32>
    %645 = tpu.matmul %642, %644, %cst_563 {dimension_numbers = #tpu.dot_dimension_numbers<[1], [0], [0], [1], [0, 0, 1, 1], [], []>} : vector<14x4xf32>, vector<4x128xf32>, vector<14x128xf32> -> vector<14x128xf32>
    %646 = arith.addf %639, %645 : vector<14x128xf32>
    %647 = vector.extract_strided_slice %641 {offsets = [1, 0], sizes = [14, 4], strides = [1, 1]} : vector<16x4xf32> to vector<14x4xf32>
    %c4_564 = arith.constant 4 : index
    %c0_565 = arith.constant 0 : index
    %c0_566 = arith.constant 0 : index
    %648 = vector.load %arg2[%c4_564, %c0_565, %c0_566] : memref<9x4x128xf32, #tpu.memory_space<vmem>>, vector<1x4x128xf32>
    %649 = vector.shape_cast %648 : vector<1x4x128xf32> to vector<4x128xf32>
    %cst_567 = arith.constant dense<0.000000e+00> : vector<14x128xf32>
    %650 = tpu.matmul %647, %649, %cst_567 {dimension_numbers = #tpu.dot_dimension_numbers<[1], [0], [0], [1], [0, 0, 1, 1], [], []>} : vector<14x4xf32>, vector<4x128xf32>, vector<14x128xf32> -> vector<14x128xf32>
    %651 = arith.addf %646, %650 : vector<14x128xf32>
    %652 = vector.extract_strided_slice %641 {offsets = [2, 0], sizes = [14, 4], strides = [1, 1]} : vector<16x4xf32> to vector<14x4xf32>
    %c5_568 = arith.constant 5 : index
    %c0_569 = arith.constant 0 : index
    %c0_570 = arith.constant 0 : index
    %653 = vector.load %arg2[%c5_568, %c0_569, %c0_570] : memref<9x4x128xf32, #tpu.memory_space<vmem>>, vector<1x4x128xf32>
    %654 = vector.shape_cast %653 : vector<1x4x128xf32> to vector<4x128xf32>
    %cst_571 = arith.constant dense<0.000000e+00> : vector<14x128xf32>
    %655 = tpu.matmul %652, %654, %cst_571 {dimension_numbers = #tpu.dot_dimension_numbers<[1], [0], [0], [1], [0, 0, 1, 1], [], []>} : vector<14x4xf32>, vector<4x128xf32>, vector<14x128xf32> -> vector<14x128xf32>
    %656 = arith.addf %651, %655 : vector<14x128xf32>
    %c0_572 = arith.constant 0 : index
    %c12 = arith.constant 12 : index
    %c0_573 = arith.constant 0 : index
    %c0_574 = arith.constant 0 : index
    %657 = vector.load %arg1[%c0_572, %c12, %c0_573, %c0_574] : memref<1x16x16x4xf32, #tpu.memory_space<vmem>>, vector<1x1x16x4xf32>
    %658 = vector.shape_cast %657 : vector<1x1x16x4xf32> to vector<16x4xf32>
    %659 = vector.extract_strided_slice %658 {offsets = [0, 0], sizes = [14, 4], strides = [1, 1]} : vector<16x4xf32> to vector<14x4xf32>
    %c6_575 = arith.constant 6 : index
    %c0_576 = arith.constant 0 : index
    %c0_577 = arith.constant 0 : index
    %660 = vector.load %arg2[%c6_575, %c0_576, %c0_577] : memref<9x4x128xf32, #tpu.memory_space<vmem>>, vector<1x4x128xf32>
    %661 = vector.shape_cast %660 : vector<1x4x128xf32> to vector<4x128xf32>
    %cst_578 = arith.constant dense<0.000000e+00> : vector<14x128xf32>
    %662 = tpu.matmul %659, %661, %cst_578 {dimension_numbers = #tpu.dot_dimension_numbers<[1], [0], [0], [1], [0, 0, 1, 1], [], []>} : vector<14x4xf32>, vector<4x128xf32>, vector<14x128xf32> -> vector<14x128xf32>
    %663 = arith.addf %656, %662 : vector<14x128xf32>
    %664 = vector.extract_strided_slice %658 {offsets = [1, 0], sizes = [14, 4], strides = [1, 1]} : vector<16x4xf32> to vector<14x4xf32>
    %c7_579 = arith.constant 7 : index
    %c0_580 = arith.constant 0 : index
    %c0_581 = arith.constant 0 : index
    %665 = vector.load %arg2[%c7_579, %c0_580, %c0_581] : memref<9x4x128xf32, #tpu.memory_space<vmem>>, vector<1x4x128xf32>
    %666 = vector.shape_cast %665 : vector<1x4x128xf32> to vector<4x128xf32>
    %cst_582 = arith.constant dense<0.000000e+00> : vector<14x128xf32>
    %667 = tpu.matmul %664, %666, %cst_582 {dimension_numbers = #tpu.dot_dimension_numbers<[1], [0], [0], [1], [0, 0, 1, 1], [], []>} : vector<14x4xf32>, vector<4x128xf32>, vector<14x128xf32> -> vector<14x128xf32>
    %668 = arith.addf %663, %667 : vector<14x128xf32>
    %669 = vector.extract_strided_slice %658 {offsets = [2, 0], sizes = [14, 4], strides = [1, 1]} : vector<16x4xf32> to vector<14x4xf32>
    %c8_583 = arith.constant 8 : index
    %c0_584 = arith.constant 0 : index
    %c0_585 = arith.constant 0 : index
    %670 = vector.load %arg2[%c8_583, %c0_584, %c0_585] : memref<9x4x128xf32, #tpu.memory_space<vmem>>, vector<1x4x128xf32>
    %671 = vector.shape_cast %670 : vector<1x4x128xf32> to vector<4x128xf32>
    %cst_586 = arith.constant dense<0.000000e+00> : vector<14x128xf32>
    %672 = tpu.matmul %669, %671, %cst_586 {dimension_numbers = #tpu.dot_dimension_numbers<[1], [0], [0], [1], [0, 0, 1, 1], [], []>} : vector<14x4xf32>, vector<4x128xf32>, vector<14x128xf32> -> vector<14x128xf32>
    %673 = arith.addf %668, %672 : vector<14x128xf32>
    %c0_587 = arith.constant 0 : index
    %c10_588 = arith.constant 10 : index
    %c0_589 = arith.constant 0 : index
    %c0_590 = arith.constant 0 : index
    %674 = vector.load %arg3[%c0_587, %c10_588, %c0_589, %c0_590] : memref<1x14x14x128xf32, #tpu.memory_space<vmem>>, vector<1x1x14x128xf32>
    %675 = vector.shape_cast %674 : vector<1x1x14x128xf32> to vector<14x128xf32>
    %676 = vector.shape_cast %673 : vector<14x128xf32> to vector<1x1x14x128xf32>
    tpu.vector_store %arg3[%c0_587, %c10_588, %c0_589, %c0_590], %676 {strides = array<i32>} : memref<1x14x14x128xf32, #tpu.memory_space<vmem>>, vector<1x1x14x128xf32>,
    %cst_591 = arith.constant dense<0.000000e+00> : vector<128xf32>
    %677 = vector.multi_reduction <add>, %673, %cst_591 [0] : vector<14x128xf32> to vector<128xf32>
    %678 = vector.shape_cast %677 : vector<128xf32> to vector<1x128xf32>
    %679 = arith.addf %617, %678 : vector<1x128xf32>
    %680 = arith.mulf %673, %673 : vector<14x128xf32>
    %cst_592 = arith.constant dense<0.000000e+00> : vector<128xf32>
    %681 = vector.multi_reduction <add>, %680, %cst_592 [0] : vector<14x128xf32> to vector<128xf32>
    %682 = vector.shape_cast %681 : vector<128xf32> to vector<1x128xf32>
    %683 = arith.addf %621, %682 : vector<1x128xf32>
    %cst_593 = arith.constant 0.000000e+00 : f32
    %684 = vector.broadcast %cst_593 : f32 to vector<14x128xf32>
    %c0_594 = arith.constant 0 : index
    %c11_595 = arith.constant 11 : index
    %c0_596 = arith.constant 0 : index
    %c0_597 = arith.constant 0 : index
    %685 = vector.load %arg1[%c0_594, %c11_595, %c0_596, %c0_597] : memref<1x16x16x4xf32, #tpu.memory_space<vmem>>, vector<1x1x16x4xf32>
    %686 = vector.shape_cast %685 : vector<1x1x16x4xf32> to vector<16x4xf32>
    %687 = vector.extract_strided_slice %686 {offsets = [0, 0], sizes = [14, 4], strides = [1, 1]} : vector<16x4xf32> to vector<14x4xf32>
    %c0_598 = arith.constant 0 : index
    %c0_599 = arith.constant 0 : index
    %c0_600 = arith.constant 0 : index
    %688 = vector.load %arg2[%c0_598, %c0_599, %c0_600] : memref<9x4x128xf32, #tpu.memory_space<vmem>>, vector<1x4x128xf32>
    %689 = vector.shape_cast %688 : vector<1x4x128xf32> to vector<4x128xf32>
    %cst_601 = arith.constant dense<0.000000e+00> : vector<14x128xf32>
    %690 = tpu.matmul %687, %689, %cst_601 {dimension_numbers = #tpu.dot_dimension_numbers<[1], [0], [0], [1], [0, 0, 1, 1], [], []>} : vector<14x4xf32>, vector<4x128xf32>, vector<14x128xf32> -> vector<14x128xf32>
    %691 = arith.addf %684, %690 : vector<14x128xf32>
    %692 = vector.extract_strided_slice %686 {offsets = [1, 0], sizes = [14, 4], strides = [1, 1]} : vector<16x4xf32> to vector<14x4xf32>
    %c1_602 = arith.constant 1 : index
    %c0_603 = arith.constant 0 : index
    %c0_604 = arith.constant 0 : index
    %693 = vector.load %arg2[%c1_602, %c0_603, %c0_604] : memref<9x4x128xf32, #tpu.memory_space<vmem>>, vector<1x4x128xf32>
    %694 = vector.shape_cast %693 : vector<1x4x128xf32> to vector<4x128xf32>
    %cst_605 = arith.constant dense<0.000000e+00> : vector<14x128xf32>
    %695 = tpu.matmul %692, %694, %cst_605 {dimension_numbers = #tpu.dot_dimension_numbers<[1], [0], [0], [1], [0, 0, 1, 1], [], []>} : vector<14x4xf32>, vector<4x128xf32>, vector<14x128xf32> -> vector<14x128xf32>
    %696 = arith.addf %691, %695 : vector<14x128xf32>
    %697 = vector.extract_strided_slice %686 {offsets = [2, 0], sizes = [14, 4], strides = [1, 1]} : vector<16x4xf32> to vector<14x4xf32>
    %c2_606 = arith.constant 2 : index
    %c0_607 = arith.constant 0 : index
    %c0_608 = arith.constant 0 : index
    %698 = vector.load %arg2[%c2_606, %c0_607, %c0_608] : memref<9x4x128xf32, #tpu.memory_space<vmem>>, vector<1x4x128xf32>
    %699 = vector.shape_cast %698 : vector<1x4x128xf32> to vector<4x128xf32>
    %cst_609 = arith.constant dense<0.000000e+00> : vector<14x128xf32>
    %700 = tpu.matmul %697, %699, %cst_609 {dimension_numbers = #tpu.dot_dimension_numbers<[1], [0], [0], [1], [0, 0, 1, 1], [], []>} : vector<14x4xf32>, vector<4x128xf32>, vector<14x128xf32> -> vector<14x128xf32>
    %701 = arith.addf %696, %700 : vector<14x128xf32>
    %c0_610 = arith.constant 0 : index
    %c12_611 = arith.constant 12 : index
    %c0_612 = arith.constant 0 : index
    %c0_613 = arith.constant 0 : index
    %702 = vector.load %arg1[%c0_610, %c12_611, %c0_612, %c0_613] : memref<1x16x16x4xf32, #tpu.memory_space<vmem>>, vector<1x1x16x4xf32>
    %703 = vector.shape_cast %702 : vector<1x1x16x4xf32> to vector<16x4xf32>
    %704 = vector.extract_strided_slice %703 {offsets = [0, 0], sizes = [14, 4], strides = [1, 1]} : vector<16x4xf32> to vector<14x4xf32>
    %c3_614 = arith.constant 3 : index
    %c0_615 = arith.constant 0 : index
    %c0_616 = arith.constant 0 : index
    %705 = vector.load %arg2[%c3_614, %c0_615, %c0_616] : memref<9x4x128xf32, #tpu.memory_space<vmem>>, vector<1x4x128xf32>
    %706 = vector.shape_cast %705 : vector<1x4x128xf32> to vector<4x128xf32>
    %cst_617 = arith.constant dense<0.000000e+00> : vector<14x128xf32>
    %707 = tpu.matmul %704, %706, %cst_617 {dimension_numbers = #tpu.dot_dimension_numbers<[1], [0], [0], [1], [0, 0, 1, 1], [], []>} : vector<14x4xf32>, vector<4x128xf32>, vector<14x128xf32> -> vector<14x128xf32>
    %708 = arith.addf %701, %707 : vector<14x128xf32>
    %709 = vector.extract_strided_slice %703 {offsets = [1, 0], sizes = [14, 4], strides = [1, 1]} : vector<16x4xf32> to vector<14x4xf32>
    %c4_618 = arith.constant 4 : index
    %c0_619 = arith.constant 0 : index
    %c0_620 = arith.constant 0 : index
    %710 = vector.load %arg2[%c4_618, %c0_619, %c0_620] : memref<9x4x128xf32, #tpu.memory_space<vmem>>, vector<1x4x128xf32>
    %711 = vector.shape_cast %710 : vector<1x4x128xf32> to vector<4x128xf32>
    %cst_621 = arith.constant dense<0.000000e+00> : vector<14x128xf32>
    %712 = tpu.matmul %709, %711, %cst_621 {dimension_numbers = #tpu.dot_dimension_numbers<[1], [0], [0], [1], [0, 0, 1, 1], [], []>} : vector<14x4xf32>, vector<4x128xf32>, vector<14x128xf32> -> vector<14x128xf32>
    %713 = arith.addf %708, %712 : vector<14x128xf32>
    %714 = vector.extract_strided_slice %703 {offsets = [2, 0], sizes = [14, 4], strides = [1, 1]} : vector<16x4xf32> to vector<14x4xf32>
    %c5_622 = arith.constant 5 : index
    %c0_623 = arith.constant 0 : index
    %c0_624 = arith.constant 0 : index
    %715 = vector.load %arg2[%c5_622, %c0_623, %c0_624] : memref<9x4x128xf32, #tpu.memory_space<vmem>>, vector<1x4x128xf32>
    %716 = vector.shape_cast %715 : vector<1x4x128xf32> to vector<4x128xf32>
    %cst_625 = arith.constant dense<0.000000e+00> : vector<14x128xf32>
    %717 = tpu.matmul %714, %716, %cst_625 {dimension_numbers = #tpu.dot_dimension_numbers<[1], [0], [0], [1], [0, 0, 1, 1], [], []>} : vector<14x4xf32>, vector<4x128xf32>, vector<14x128xf32> -> vector<14x128xf32>
    %718 = arith.addf %713, %717 : vector<14x128xf32>
    %c0_626 = arith.constant 0 : index
    %c13 = arith.constant 13 : index
    %c0_627 = arith.constant 0 : index
    %c0_628 = arith.constant 0 : index
    %719 = vector.load %arg1[%c0_626, %c13, %c0_627, %c0_628] : memref<1x16x16x4xf32, #tpu.memory_space<vmem>>, vector<1x1x16x4xf32>
    %720 = vector.shape_cast %719 : vector<1x1x16x4xf32> to vector<16x4xf32>
    %721 = vector.extract_strided_slice %720 {offsets = [0, 0], sizes = [14, 4], strides = [1, 1]} : vector<16x4xf32> to vector<14x4xf32>
    %c6_629 = arith.constant 6 : index
    %c0_630 = arith.constant 0 : index
    %c0_631 = arith.constant 0 : index
    %722 = vector.load %arg2[%c6_629, %c0_630, %c0_631] : memref<9x4x128xf32, #tpu.memory_space<vmem>>, vector<1x4x128xf32>
    %723 = vector.shape_cast %722 : vector<1x4x128xf32> to vector<4x128xf32>
    %cst_632 = arith.constant dense<0.000000e+00> : vector<14x128xf32>
    %724 = tpu.matmul %721, %723, %cst_632 {dimension_numbers = #tpu.dot_dimension_numbers<[1], [0], [0], [1], [0, 0, 1, 1], [], []>} : vector<14x4xf32>, vector<4x128xf32>, vector<14x128xf32> -> vector<14x128xf32>
    %725 = arith.addf %718, %724 : vector<14x128xf32>
    %726 = vector.extract_strided_slice %720 {offsets = [1, 0], sizes = [14, 4], strides = [1, 1]} : vector<16x4xf32> to vector<14x4xf32>
    %c7_633 = arith.constant 7 : index
    %c0_634 = arith.constant 0 : index
    %c0_635 = arith.constant 0 : index
    %727 = vector.load %arg2[%c7_633, %c0_634, %c0_635] : memref<9x4x128xf32, #tpu.memory_space<vmem>>, vector<1x4x128xf32>
    %728 = vector.shape_cast %727 : vector<1x4x128xf32> to vector<4x128xf32>
    %cst_636 = arith.constant dense<0.000000e+00> : vector<14x128xf32>
    %729 = tpu.matmul %726, %728, %cst_636 {dimension_numbers = #tpu.dot_dimension_numbers<[1], [0], [0], [1], [0, 0, 1, 1], [], []>} : vector<14x4xf32>, vector<4x128xf32>, vector<14x128xf32> -> vector<14x128xf32>
    %730 = arith.addf %725, %729 : vector<14x128xf32>
    %731 = vector.extract_strided_slice %720 {offsets = [2, 0], sizes = [14, 4], strides = [1, 1]} : vector<16x4xf32> to vector<14x4xf32>
    %c8_637 = arith.constant 8 : index
    %c0_638 = arith.constant 0 : index
    %c0_639 = arith.constant 0 : index
    %732 = vector.load %arg2[%c8_637, %c0_638, %c0_639] : memref<9x4x128xf32, #tpu.memory_space<vmem>>, vector<1x4x128xf32>
    %733 = vector.shape_cast %732 : vector<1x4x128xf32> to vector<4x128xf32>
    %cst_640 = arith.constant dense<0.000000e+00> : vector<14x128xf32>
    %734 = tpu.matmul %731, %733, %cst_640 {dimension_numbers = #tpu.dot_dimension_numbers<[1], [0], [0], [1], [0, 0, 1, 1], [], []>} : vector<14x4xf32>, vector<4x128xf32>, vector<14x128xf32> -> vector<14x128xf32>
    %735 = arith.addf %730, %734 : vector<14x128xf32>
    %c0_641 = arith.constant 0 : index
    %c11_642 = arith.constant 11 : index
    %c0_643 = arith.constant 0 : index
    %c0_644 = arith.constant 0 : index
    %736 = vector.load %arg3[%c0_641, %c11_642, %c0_643, %c0_644] : memref<1x14x14x128xf32, #tpu.memory_space<vmem>>, vector<1x1x14x128xf32>
    %737 = vector.shape_cast %736 : vector<1x1x14x128xf32> to vector<14x128xf32>
    %738 = vector.shape_cast %735 : vector<14x128xf32> to vector<1x1x14x128xf32>
    tpu.vector_store %arg3[%c0_641, %c11_642, %c0_643, %c0_644], %738 {strides = array<i32>} : memref<1x14x14x128xf32, #tpu.memory_space<vmem>>, vector<1x1x14x128xf32>,
    %cst_645 = arith.constant dense<0.000000e+00> : vector<128xf32>
    %739 = vector.multi_reduction <add>, %735, %cst_645 [0] : vector<14x128xf32> to vector<128xf32>
    %740 = vector.shape_cast %739 : vector<128xf32> to vector<1x128xf32>
    %741 = arith.addf %679, %740 : vector<1x128xf32>
    %742 = arith.mulf %735, %735 : vector<14x128xf32>
    %cst_646 = arith.constant dense<0.000000e+00> : vector<128xf32>
    %743 = vector.multi_reduction <add>, %742, %cst_646 [0] : vector<14x128xf32> to vector<128xf32>
    %744 = vector.shape_cast %743 : vector<128xf32> to vector<1x128xf32>
    %745 = arith.addf %683, %744 : vector<1x128xf32>
    %cst_647 = arith.constant 0.000000e+00 : f32
    %746 = vector.broadcast %cst_647 : f32 to vector<14x128xf32>
    %c0_648 = arith.constant 0 : index
    %c12_649 = arith.constant 12 : index
    %c0_650 = arith.constant 0 : index
    %c0_651 = arith.constant 0 : index
    %747 = vector.load %arg1[%c0_648, %c12_649, %c0_650, %c0_651] : memref<1x16x16x4xf32, #tpu.memory_space<vmem>>, vector<1x1x16x4xf32>
    %748 = vector.shape_cast %747 : vector<1x1x16x4xf32> to vector<16x4xf32>
    %749 = vector.extract_strided_slice %748 {offsets = [0, 0], sizes = [14, 4], strides = [1, 1]} : vector<16x4xf32> to vector<14x4xf32>
    %c0_652 = arith.constant 0 : index
    %c0_653 = arith.constant 0 : index
    %c0_654 = arith.constant 0 : index
    %750 = vector.load %arg2[%c0_652, %c0_653, %c0_654] : memref<9x4x128xf32, #tpu.memory_space<vmem>>, vector<1x4x128xf32>
    %751 = vector.shape_cast %750 : vector<1x4x128xf32> to vector<4x128xf32>
    %cst_655 = arith.constant dense<0.000000e+00> : vector<14x128xf32>
    %752 = tpu.matmul %749, %751, %cst_655 {dimension_numbers = #tpu.dot_dimension_numbers<[1], [0], [0], [1], [0, 0, 1, 1], [], []>} : vector<14x4xf32>, vector<4x128xf32>, vector<14x128xf32> -> vector<14x128xf32>
    %753 = arith.addf %746, %752 : vector<14x128xf32>
    %754 = vector.extract_strided_slice %748 {offsets = [1, 0], sizes = [14, 4], strides = [1, 1]} : vector<16x4xf32> to vector<14x4xf32>
    %c1_656 = arith.constant 1 : index
    %c0_657 = arith.constant 0 : index
    %c0_658 = arith.constant 0 : index
    %755 = vector.load %arg2[%c1_656, %c0_657, %c0_658] : memref<9x4x128xf32, #tpu.memory_space<vmem>>, vector<1x4x128xf32>
    %756 = vector.shape_cast %755 : vector<1x4x128xf32> to vector<4x128xf32>
    %cst_659 = arith.constant dense<0.000000e+00> : vector<14x128xf32>
    %757 = tpu.matmul %754, %756, %cst_659 {dimension_numbers = #tpu.dot_dimension_numbers<[1], [0], [0], [1], [0, 0, 1, 1], [], []>} : vector<14x4xf32>, vector<4x128xf32>, vector<14x128xf32> -> vector<14x128xf32>
    %758 = arith.addf %753, %757 : vector<14x128xf32>
    %759 = vector.extract_strided_slice %748 {offsets = [2, 0], sizes = [14, 4], strides = [1, 1]} : vector<16x4xf32> to vector<14x4xf32>
    %c2_660 = arith.constant 2 : index
    %c0_661 = arith.constant 0 : index
    %c0_662 = arith.constant 0 : index
    %760 = vector.load %arg2[%c2_660, %c0_661, %c0_662] : memref<9x4x128xf32, #tpu.memory_space<vmem>>, vector<1x4x128xf32>
    %761 = vector.shape_cast %760 : vector<1x4x128xf32> to vector<4x128xf32>
    %cst_663 = arith.constant dense<0.000000e+00> : vector<14x128xf32>
    %762 = tpu.matmul %759, %761, %cst_663 {dimension_numbers = #tpu.dot_dimension_numbers<[1], [0], [0], [1], [0, 0, 1, 1], [], []>} : vector<14x4xf32>, vector<4x128xf32>, vector<14x128xf32> -> vector<14x128xf32>
    %763 = arith.addf %758, %762 : vector<14x128xf32>
    %c0_664 = arith.constant 0 : index
    %c13_665 = arith.constant 13 : index
    %c0_666 = arith.constant 0 : index
    %c0_667 = arith.constant 0 : index
    %764 = vector.load %arg1[%c0_664, %c13_665, %c0_666, %c0_667] : memref<1x16x16x4xf32, #tpu.memory_space<vmem>>, vector<1x1x16x4xf32>
    %765 = vector.shape_cast %764 : vector<1x1x16x4xf32> to vector<16x4xf32>
    %766 = vector.extract_strided_slice %765 {offsets = [0, 0], sizes = [14, 4], strides = [1, 1]} : vector<16x4xf32> to vector<14x4xf32>
    %c3_668 = arith.constant 3 : index
    %c0_669 = arith.constant 0 : index
    %c0_670 = arith.constant 0 : index
    %767 = vector.load %arg2[%c3_668, %c0_669, %c0_670] : memref<9x4x128xf32, #tpu.memory_space<vmem>>, vector<1x4x128xf32>
    %768 = vector.shape_cast %767 : vector<1x4x128xf32> to vector<4x128xf32>
    %cst_671 = arith.constant dense<0.000000e+00> : vector<14x128xf32>
    %769 = tpu.matmul %766, %768, %cst_671 {dimension_numbers = #tpu.dot_dimension_numbers<[1], [0], [0], [1], [0, 0, 1, 1], [], []>} : vector<14x4xf32>, vector<4x128xf32>, vector<14x128xf32> -> vector<14x128xf32>
    %770 = arith.addf %763, %769 : vector<14x128xf32>
    %771 = vector.extract_strided_slice %765 {offsets = [1, 0], sizes = [14, 4], strides = [1, 1]} : vector<16x4xf32> to vector<14x4xf32>
    %c4_672 = arith.constant 4 : index
    %c0_673 = arith.constant 0 : index
    %c0_674 = arith.constant 0 : index
    %772 = vector.load %arg2[%c4_672, %c0_673, %c0_674] : memref<9x4x128xf32, #tpu.memory_space<vmem>>, vector<1x4x128xf32>
    %773 = vector.shape_cast %772 : vector<1x4x128xf32> to vector<4x128xf32>
    %cst_675 = arith.constant dense<0.000000e+00> : vector<14x128xf32>
    %774 = tpu.matmul %771, %773, %cst_675 {dimension_numbers = #tpu.dot_dimension_numbers<[1], [0], [0], [1], [0, 0, 1, 1], [], []>} : vector<14x4xf32>, vector<4x128xf32>, vector<14x128xf32> -> vector<14x128xf32>
    %775 = arith.addf %770, %774 : vector<14x128xf32>
    %776 = vector.extract_strided_slice %765 {offsets = [2, 0], sizes = [14, 4], strides = [1, 1]} : vector<16x4xf32> to vector<14x4xf32>
    %c5_676 = arith.constant 5 : index
    %c0_677 = arith.constant 0 : index
    %c0_678 = arith.constant 0 : index
    %777 = vector.load %arg2[%c5_676, %c0_677, %c0_678] : memref<9x4x128xf32, #tpu.memory_space<vmem>>, vector<1x4x128xf32>
    %778 = vector.shape_cast %777 : vector<1x4x128xf32> to vector<4x128xf32>
    %cst_679 = arith.constant dense<0.000000e+00> : vector<14x128xf32>
    %779 = tpu.matmul %776, %778, %cst_679 {dimension_numbers = #tpu.dot_dimension_numbers<[1], [0], [0], [1], [0, 0, 1, 1], [], []>} : vector<14x4xf32>, vector<4x128xf32>, vector<14x128xf32> -> vector<14x128xf32>
    %780 = arith.addf %775, %779 : vector<14x128xf32>
    %c0_680 = arith.constant 0 : index
    %c14 = arith.constant 14 : index
    %c0_681 = arith.constant 0 : index
    %c0_682 = arith.constant 0 : index
    %781 = vector.load %arg1[%c0_680, %c14, %c0_681, %c0_682] : memref<1x16x16x4xf32, #tpu.memory_space<vmem>>, vector<1x1x16x4xf32>
    %782 = vector.shape_cast %781 : vector<1x1x16x4xf32> to vector<16x4xf32>
    %783 = vector.extract_strided_slice %782 {offsets = [0, 0], sizes = [14, 4], strides = [1, 1]} : vector<16x4xf32> to vector<14x4xf32>
    %c6_683 = arith.constant 6 : index
    %c0_684 = arith.constant 0 : index
    %c0_685 = arith.constant 0 : index
    %784 = vector.load %arg2[%c6_683, %c0_684, %c0_685] : memref<9x4x128xf32, #tpu.memory_space<vmem>>, vector<1x4x128xf32>
    %785 = vector.shape_cast %784 : vector<1x4x128xf32> to vector<4x128xf32>
    %cst_686 = arith.constant dense<0.000000e+00> : vector<14x128xf32>
    %786 = tpu.matmul %783, %785, %cst_686 {dimension_numbers = #tpu.dot_dimension_numbers<[1], [0], [0], [1], [0, 0, 1, 1], [], []>} : vector<14x4xf32>, vector<4x128xf32>, vector<14x128xf32> -> vector<14x128xf32>
    %787 = arith.addf %780, %786 : vector<14x128xf32>
    %788 = vector.extract_strided_slice %782 {offsets = [1, 0], sizes = [14, 4], strides = [1, 1]} : vector<16x4xf32> to vector<14x4xf32>
    %c7_687 = arith.constant 7 : index
    %c0_688 = arith.constant 0 : index
    %c0_689 = arith.constant 0 : index
    %789 = vector.load %arg2[%c7_687, %c0_688, %c0_689] : memref<9x4x128xf32, #tpu.memory_space<vmem>>, vector<1x4x128xf32>
    %790 = vector.shape_cast %789 : vector<1x4x128xf32> to vector<4x128xf32>
    %cst_690 = arith.constant dense<0.000000e+00> : vector<14x128xf32>
    %791 = tpu.matmul %788, %790, %cst_690 {dimension_numbers = #tpu.dot_dimension_numbers<[1], [0], [0], [1], [0, 0, 1, 1], [], []>} : vector<14x4xf32>, vector<4x128xf32>, vector<14x128xf32> -> vector<14x128xf32>
    %792 = arith.addf %787, %791 : vector<14x128xf32>
    %793 = vector.extract_strided_slice %782 {offsets = [2, 0], sizes = [14, 4], strides = [1, 1]} : vector<16x4xf32> to vector<14x4xf32>
    %c8_691 = arith.constant 8 : index
    %c0_692 = arith.constant 0 : index
    %c0_693 = arith.constant 0 : index
    %794 = vector.load %arg2[%c8_691, %c0_692, %c0_693] : memref<9x4x128xf32, #tpu.memory_space<vmem>>, vector<1x4x128xf32>
    %795 = vector.shape_cast %794 : vector<1x4x128xf32> to vector<4x128xf32>
    %cst_694 = arith.constant dense<0.000000e+00> : vector<14x128xf32>
    %796 = tpu.matmul %793, %795, %cst_694 {dimension_numbers = #tpu.dot_dimension_numbers<[1], [0], [0], [1], [0, 0, 1, 1], [], []>} : vector<14x4xf32>, vector<4x128xf32>, vector<14x128xf32> -> vector<14x128xf32>
    %797 = arith.addf %792, %796 : vector<14x128xf32>
    %c0_695 = arith.constant 0 : index
    %c12_696 = arith.constant 12 : index
    %c0_697 = arith.constant 0 : index
    %c0_698 = arith.constant 0 : index
    %798 = vector.load %arg3[%c0_695, %c12_696, %c0_697, %c0_698] : memref<1x14x14x128xf32, #tpu.memory_space<vmem>>, vector<1x1x14x128xf32>
    %799 = vector.shape_cast %798 : vector<1x1x14x128xf32> to vector<14x128xf32>
    %800 = vector.shape_cast %797 : vector<14x128xf32> to vector<1x1x14x128xf32>
    tpu.vector_store %arg3[%c0_695, %c12_696, %c0_697, %c0_698], %800 {strides = array<i32>} : memref<1x14x14x128xf32, #tpu.memory_space<vmem>>, vector<1x1x14x128xf32>,
    %cst_699 = arith.constant dense<0.000000e+00> : vector<128xf32>
    %801 = vector.multi_reduction <add>, %797, %cst_699 [0] : vector<14x128xf32> to vector<128xf32>
    %802 = vector.shape_cast %801 : vector<128xf32> to vector<1x128xf32>
    %803 = arith.addf %741, %802 : vector<1x128xf32>
    %804 = arith.mulf %797, %797 : vector<14x128xf32>
    %cst_700 = arith.constant dense<0.000000e+00> : vector<128xf32>
    %805 = vector.multi_reduction <add>, %804, %cst_700 [0] : vector<14x128xf32> to vector<128xf32>
    %806 = vector.shape_cast %805 : vector<128xf32> to vector<1x128xf32>
    %807 = arith.addf %745, %806 : vector<1x128xf32>
    %cst_701 = arith.constant 0.000000e+00 : f32
    %808 = vector.broadcast %cst_701 : f32 to vector<14x128xf32>
    %c0_702 = arith.constant 0 : index
    %c13_703 = arith.constant 13 : index
    %c0_704 = arith.constant 0 : index
    %c0_705 = arith.constant 0 : index
    %809 = vector.load %arg1[%c0_702, %c13_703, %c0_704, %c0_705] : memref<1x16x16x4xf32, #tpu.memory_space<vmem>>, vector<1x1x16x4xf32>
    %810 = vector.shape_cast %809 : vector<1x1x16x4xf32> to vector<16x4xf32>
    %811 = vector.extract_strided_slice %810 {offsets = [0, 0], sizes = [14, 4], strides = [1, 1]} : vector<16x4xf32> to vector<14x4xf32>
    %c0_706 = arith.constant 0 : index
    %c0_707 = arith.constant 0 : index
    %c0_708 = arith.constant 0 : index
    %812 = vector.load %arg2[%c0_706, %c0_707, %c0_708] : memref<9x4x128xf32, #tpu.memory_space<vmem>>, vector<1x4x128xf32>
    %813 = vector.shape_cast %812 : vector<1x4x128xf32> to vector<4x128xf32>
    %cst_709 = arith.constant dense<0.000000e+00> : vector<14x128xf32>
    %814 = tpu.matmul %811, %813, %cst_709 {dimension_numbers = #tpu.dot_dimension_numbers<[1], [0], [0], [1], [0, 0, 1, 1], [], []>} : vector<14x4xf32>, vector<4x128xf32>, vector<14x128xf32> -> vector<14x128xf32>
    %815 = arith.addf %808, %814 : vector<14x128xf32>
    %816 = vector.extract_strided_slice %810 {offsets = [1, 0], sizes = [14, 4], strides = [1, 1]} : vector<16x4xf32> to vector<14x4xf32>
    %c1_710 = arith.constant 1 : index
    %c0_711 = arith.constant 0 : index
    %c0_712 = arith.constant 0 : index
    %817 = vector.load %arg2[%c1_710, %c0_711, %c0_712] : memref<9x4x128xf32, #tpu.memory_space<vmem>>, vector<1x4x128xf32>
    %818 = vector.shape_cast %817 : vector<1x4x128xf32> to vector<4x128xf32>
    %cst_713 = arith.constant dense<0.000000e+00> : vector<14x128xf32>
    %819 = tpu.matmul %816, %818, %cst_713 {dimension_numbers = #tpu.dot_dimension_numbers<[1], [0], [0], [1], [0, 0, 1, 1], [], []>} : vector<14x4xf32>, vector<4x128xf32>, vector<14x128xf32> -> vector<14x128xf32>
    %820 = arith.addf %815, %819 : vector<14x128xf32>
    %821 = vector.extract_strided_slice %810 {offsets = [2, 0], sizes = [14, 4], strides = [1, 1]} : vector<16x4xf32> to vector<14x4xf32>
    %c2_714 = arith.constant 2 : index
    %c0_715 = arith.constant 0 : index
    %c0_716 = arith.constant 0 : index
    %822 = vector.load %arg2[%c2_714, %c0_715, %c0_716] : memref<9x4x128xf32, #tpu.memory_space<vmem>>, vector<1x4x128xf32>
    %823 = vector.shape_cast %822 : vector<1x4x128xf32> to vector<4x128xf32>
    %cst_717 = arith.constant dense<0.000000e+00> : vector<14x128xf32>
    %824 = tpu.matmul %821, %823, %cst_717 {dimension_numbers = #tpu.dot_dimension_numbers<[1], [0], [0], [1], [0, 0, 1, 1], [], []>} : vector<14x4xf32>, vector<4x128xf32>, vector<14x128xf32> -> vector<14x128xf32>
    %825 = arith.addf %820, %824 : vector<14x128xf32>
    %c0_718 = arith.constant 0 : index
    %c14_719 = arith.constant 14 : index
    %c0_720 = arith.constant 0 : index
    %c0_721 = arith.constant 0 : index
    %826 = vector.load %arg1[%c0_718, %c14_719, %c0_720, %c0_721] : memref<1x16x16x4xf32, #tpu.memory_space<vmem>>, vector<1x1x16x4xf32>
    %827 = vector.shape_cast %826 : vector<1x1x16x4xf32> to vector<16x4xf32>
    %828 = vector.extract_strided_slice %827 {offsets = [0, 0], sizes = [14, 4], strides = [1, 1]} : vector<16x4xf32> to vector<14x4xf32>
    %c3_722 = arith.constant 3 : index
    %c0_723 = arith.constant 0 : index
    %c0_724 = arith.constant 0 : index
    %829 = vector.load %arg2[%c3_722, %c0_723, %c0_724] : memref<9x4x128xf32, #tpu.memory_space<vmem>>, vector<1x4x128xf32>
    %830 = vector.shape_cast %829 : vector<1x4x128xf32> to vector<4x128xf32>
    %cst_725 = arith.constant dense<0.000000e+00> : vector<14x128xf32>
    %831 = tpu.matmul %828, %830, %cst_725 {dimension_numbers = #tpu.dot_dimension_numbers<[1], [0], [0], [1], [0, 0, 1, 1], [], []>} : vector<14x4xf32>, vector<4x128xf32>, vector<14x128xf32> -> vector<14x128xf32>
    %832 = arith.addf %825, %831 : vector<14x128xf32>
    %833 = vector.extract_strided_slice %827 {offsets = [1, 0], sizes = [14, 4], strides = [1, 1]} : vector<16x4xf32> to vector<14x4xf32>
    %c4_726 = arith.constant 4 : index
    %c0_727 = arith.constant 0 : index
    %c0_728 = arith.constant 0 : index
    %834 = vector.load %arg2[%c4_726, %c0_727, %c0_728] : memref<9x4x128xf32, #tpu.memory_space<vmem>>, vector<1x4x128xf32>
    %835 = vector.shape_cast %834 : vector<1x4x128xf32> to vector<4x128xf32>
    %cst_729 = arith.constant dense<0.000000e+00> : vector<14x128xf32>
    %836 = tpu.matmul %833, %835, %cst_729 {dimension_numbers = #tpu.dot_dimension_numbers<[1], [0], [0], [1], [0, 0, 1, 1], [], []>} : vector<14x4xf32>, vector<4x128xf32>, vector<14x128xf32> -> vector<14x128xf32>
    %837 = arith.addf %832, %836 : vector<14x128xf32>
    %838 = vector.extract_strided_slice %827 {offsets = [2, 0], sizes = [14, 4], strides = [1, 1]} : vector<16x4xf32> to vector<14x4xf32>
    %c5_730 = arith.constant 5 : index
    %c0_731 = arith.constant 0 : index
    %c0_732 = arith.constant 0 : index
    %839 = vector.load %arg2[%c5_730, %c0_731, %c0_732] : memref<9x4x128xf32, #tpu.memory_space<vmem>>, vector<1x4x128xf32>
    %840 = vector.shape_cast %839 : vector<1x4x128xf32> to vector<4x128xf32>
    %cst_733 = arith.constant dense<0.000000e+00> : vector<14x128xf32>
    %841 = tpu.matmul %838, %840, %cst_733 {dimension_numbers = #tpu.dot_dimension_numbers<[1], [0], [0], [1], [0, 0, 1, 1], [], []>} : vector<14x4xf32>, vector<4x128xf32>, vector<14x128xf32> -> vector<14x128xf32>
    %842 = arith.addf %837, %841 : vector<14x128xf32>
    %c0_734 = arith.constant 0 : index
    %c15 = arith.constant 15 : index
    %c0_735 = arith.constant 0 : index
    %c0_736 = arith.constant 0 : index
    %843 = vector.load %arg1[%c0_734, %c15, %c0_735, %c0_736] : memref<1x16x16x4xf32, #tpu.memory_space<vmem>>, vector<1x1x16x4xf32>
    %844 = vector.shape_cast %843 : vector<1x1x16x4xf32> to vector<16x4xf32>
    %845 = vector.extract_strided_slice %844 {offsets = [0, 0], sizes = [14, 4], strides = [1, 1]} : vector<16x4xf32> to vector<14x4xf32>
    %c6_737 = arith.constant 6 : index
    %c0_738 = arith.constant 0 : index
    %c0_739 = arith.constant 0 : index
    %846 = vector.load %arg2[%c6_737, %c0_738, %c0_739] : memref<9x4x128xf32, #tpu.memory_space<vmem>>, vector<1x4x128xf32>
    %847 = vector.shape_cast %846 : vector<1x4x128xf32> to vector<4x128xf32>
    %cst_740 = arith.constant dense<0.000000e+00> : vector<14x128xf32>
    %848 = tpu.matmul %845, %847, %cst_740 {dimension_numbers = #tpu.dot_dimension_numbers<[1], [0], [0], [1], [0, 0, 1, 1], [], []>} : vector<14x4xf32>, vector<4x128xf32>, vector<14x128xf32> -> vector<14x128xf32>
    %849 = arith.addf %842, %848 : vector<14x128xf32>
    %850 = vector.extract_strided_slice %844 {offsets = [1, 0], sizes = [14, 4], strides = [1, 1]} : vector<16x4xf32> to vector<14x4xf32>
    %c7_741 = arith.constant 7 : index
    %c0_742 = arith.constant 0 : index
    %c0_743 = arith.constant 0 : index
    %851 = vector.load %arg2[%c7_741, %c0_742, %c0_743] : memref<9x4x128xf32, #tpu.memory_space<vmem>>, vector<1x4x128xf32>
    %852 = vector.shape_cast %851 : vector<1x4x128xf32> to vector<4x128xf32>
    %cst_744 = arith.constant dense<0.000000e+00> : vector<14x128xf32>
    %853 = tpu.matmul %850, %852, %cst_744 {dimension_numbers = #tpu.dot_dimension_numbers<[1], [0], [0], [1], [0, 0, 1, 1], [], []>} : vector<14x4xf32>, vector<4x128xf32>, vector<14x128xf32> -> vector<14x128xf32>
    %854 = arith.addf %849, %853 : vector<14x128xf32>
    %855 = vector.extract_strided_slice %844 {offsets = [2, 0], sizes = [14, 4], strides = [1, 1]} : vector<16x4xf32> to vector<14x4xf32>
    %c8_745 = arith.constant 8 : index
    %c0_746 = arith.constant 0 : index
    %c0_747 = arith.constant 0 : index
    %856 = vector.load %arg2[%c8_745, %c0_746, %c0_747] : memref<9x4x128xf32, #tpu.memory_space<vmem>>, vector<1x4x128xf32>
    %857 = vector.shape_cast %856 : vector<1x4x128xf32> to vector<4x128xf32>
    %cst_748 = arith.constant dense<0.000000e+00> : vector<14x128xf32>
    %858 = tpu.matmul %855, %857, %cst_748 {dimension_numbers = #tpu.dot_dimension_numbers<[1], [0], [0], [1], [0, 0, 1, 1], [], []>} : vector<14x4xf32>, vector<4x128xf32>, vector<14x128xf32> -> vector<14x128xf32>
    %859 = arith.addf %854, %858 : vector<14x128xf32>
    %c0_749 = arith.constant 0 : index
    %c13_750 = arith.constant 13 : index
    %c0_751 = arith.constant 0 : index
    %c0_752 = arith.constant 0 : index
    %860 = vector.load %arg3[%c0_749, %c13_750, %c0_751, %c0_752] : memref<1x14x14x128xf32, #tpu.memory_space<vmem>>, vector<1x1x14x128xf32>
    %861 = vector.shape_cast %860 : vector<1x1x14x128xf32> to vector<14x128xf32>
    %862 = vector.shape_cast %859 : vector<14x128xf32> to vector<1x1x14x128xf32>
    tpu.vector_store %arg3[%c0_749, %c13_750, %c0_751, %c0_752], %862 {strides = array<i32>} : memref<1x14x14x128xf32, #tpu.memory_space<vmem>>, vector<1x1x14x128xf32>,
    %cst_753 = arith.constant dense<0.000000e+00> : vector<128xf32>
    %863 = vector.multi_reduction <add>, %859, %cst_753 [0] : vector<14x128xf32> to vector<128xf32>
    %864 = vector.shape_cast %863 : vector<128xf32> to vector<1x128xf32>
    %865 = arith.addf %803, %864 : vector<1x128xf32>
    %866 = arith.mulf %859, %859 : vector<14x128xf32>
    %cst_754 = arith.constant dense<0.000000e+00> : vector<128xf32>
    %867 = vector.multi_reduction <add>, %866, %cst_754 [0] : vector<14x128xf32> to vector<128xf32>
    %868 = vector.shape_cast %867 : vector<128xf32> to vector<1x128xf32>
    %869 = arith.addf %807, %868 : vector<1x128xf32>
    %c0_755 = arith.constant 0 : index
    %c0_756 = arith.constant 0 : index
    %c0_757 = arith.constant 0 : index
    %870 = vector.load %arg4[%c0_755, %c0_756, %c0_757] : memref<1x2x128xf32, #tpu.memory_space<vmem>>, vector<1x1x128xf32>
    %871 = vector.shape_cast %870 : vector<1x1x128xf32> to vector<1x128xf32>
    %872 = vector.shape_cast %865 : vector<1x128xf32> to vector<1x1x128xf32>
    tpu.vector_store %arg4[%c0_755, %c0_756, %c0_757], %872 {strides = array<i32>} : memref<1x2x128xf32, #tpu.memory_space<vmem>>, vector<1x1x128xf32>,
    %c0_758 = arith.constant 0 : index
    %c1_759 = arith.constant 1 : index
    %c0_760 = arith.constant 0 : index
    %873 = vector.load %arg4[%c0_758, %c1_759, %c0_760] : memref<1x2x128xf32, #tpu.memory_space<vmem>>, vector<1x1x128xf32>
    %874 = vector.shape_cast %873 : vector<1x1x128xf32> to vector<1x128xf32>
    %875 = vector.shape_cast %869 : vector<1x128xf32> to vector<1x1x128xf32>
    tpu.vector_store %arg4[%c0_758, %c1_759, %c0_760], %875 {strides = array<i32>} : memref<1x2x128xf32, #tpu.memory_space<vmem>>, vector<1x1x128xf32>,
    return
  }
  func.func @transform_0(%arg0: i32) -> (i32, i32, i32, i32) {
    %c0_i32 = arith.constant 0 : i32
    %c0_i32_0 = arith.constant 0 : i32
    %c0_i32_1 = arith.constant 0 : i32
    %c0_i32_2 = arith.constant 0 : i32
    return %arg0, %c0_i32, %c0_i32_0, %c0_i32_1 : i32, i32, i32, i32
  }
  func.func @transform_1(%arg0: i32) -> (i32, i32, i32) {
    %c0_i32 = arith.constant 0 : i32
    %c0_i32_0 = arith.constant 0 : i32
    %c0_i32_1 = arith.constant 0 : i32
    %c0_i32_2 = arith.constant 0 : i32
    return %c0_i32, %c0_i32_0, %c0_i32_1 : i32, i32, i32
  }
  func.func @transform_2(%arg0: i32) -> (i32, i32, i32, i32) {
    %c0_i32 = arith.constant 0 : i32
    %c0_i32_0 = arith.constant 0 : i32
    %c0_i32_1 = arith.constant 0 : i32
    %c0_i32_2 = arith.constant 0 : i32
    return %arg0, %c0_i32, %c0_i32_0, %c0_i32_1 : i32, i32, i32, i32
  }
  func.func @transform_3(%arg0: i32) -> (i32, i32, i32) {
    %c0_i32 = arith.constant 0 : i32
    %c0_i32_0 = arith.constant 0 : i32
    %c0_i32_1 = arith.constant 0 : i32
    return %arg0, %c0_i32, %c0_i32_0 : i32, i32, i32
  }
}

</mosaic_0001>

<bundles_post_ra>
// kernel: tpu_custom_call.1
= control target key start
LH: loop header
LB: loop body
LE: loop exit
PB: predicated region body
PF: predicated region fallthrough
CT: control target
= control target key end

     0   :  { %9 = vsyncpa [#allocation3], 0  ;;  %s15243_s0 = inlined_call_operand.vmem [shape: f32[2,16,16,4], index: 0, kind: input, shape index: {}]   ;;  %s15244_s1 = inlined_call_operand.vmem [shape: f32[9,4,128], index: 1, kind: input, shape index: {}]   ;;  %s15245_s2 = inlined_call_operand.vmem [shape: f32[2,14,14,128], index: 2, kind: output, shape index: {0}]   ;;  %s15246_s3 = inlined_call_operand.hbm [shape: f32[2,2,128], index: 3, kind: output, shape index: {1}]  }
   0x1   :  { %11 = vsyncpa [#allocation3 + $0x1], 0  ;;  %s13680_s12 = smov 0   ;;  %s13682_s13 = smov 0  }
   0x2   :  { %s13684_s14 = smov 0   ;;  %s13686_s15 = smov 0  }
   0x3 LB: > { %s13701_s16 = sadd.s32 4294967295, %s13657_s15   ;;  %s11712_s17 = sadd.s32 4294967294, %s13657_s15   ;;  %s13657_s15 = sphi %s13686_s15, %s15252_s15   ;;  %s13653_s14 = sphi %s13684_s14, %s15251_s14   ;;  %s13649_s13 = sphi %s13682_s13, %s15250_s13   ;;  %s13645_s12 = sphi %s13680_s12, %s15249_s12  }
   0x4   : > { %s13705_s18 = sadd.s32 1, %s13657_s15   ;;  %s97_s19 = sadd.s32 1, %s13653_s14 }
   0x5   : > { %s94_s20 = ssub.s32 %s13657_s15, %s13705_s18  ;;  %p107_p0 = scmp.ne.s32.totalorder %s13653_s14, %s13649_s13 }
   0x6   : > { %p95_p1 = scmp.eq.s32.totalorder %s94_s20, 0  ;;  %p108_p2 = scmp.eq.s32.totalorder %s13701_s16, 1 }
   0x7   : > { %p113_p3 = scmp.ne.s32.totalorder %s13649_s13, %s13645_s12  ;;  %p114_p4 = scmp.eq.s32.totalorder %s11712_s17, 1 }
   0x8   : > { %s13716_s21 = scalar_select %p95_p1, %s13653_s14, %s97_s19  }
   0x9   : > { %p13718_p5 = por %p108_p2, %p107_p0  ;;  %p13722_p6 = por %p114_p4, %p113_p3 }
   0xa   : > { %p11715_p7 = scmp.ge.s32.totalorder %s13657_s15, 1  ;;  %p143_p8 = scmp.lt.s32.totalorder %s13657_s15, 3 }
   0xc   : > { %p144_p9 = pnand %p11715_p7, %p143_p8 }
   0xd   : > { %v11720_v0 = vld [vmem:[%s15244_s1 + $0x4] sm:$0xf] (!%p144_p9)  ;;  %vm198_vm0 = vcmask (!%p144_p9), 1043456   ;;  %p172_p10 = scmp.lt.s32.totalorder (!%p144_p9), %s13701_s16, 1  ;;  %v184_v2 = vld [vmem:[%s15244_s1] sm:$0xf] (!%p144_p9) }
   0xe   : > { %147 = sbr.rel (%p144_p9) target bundleno = 749 (0x2ed), region = 28  ;;  %v11761_v1 = vld [vmem:[%s15244_s1 + $0x4] sm:$0xf] (!%p144_p9)  ;;  %12701 = vmatprep.subr.msk.mxu0 (!%p144_p9), %vm198_vm0, %v11720_v0  ;;  %v1011_v3 = vld [vmem:[%s15244_s1] sm:$0xf] (!%p144_p9)  ;;  %vm189_vm1 = vcmask (!%p144_p9), 1046528  }
   0xf   : > { %12746 = vmatprep.subr.msk.mxu1 (!%p144_p9), %vm198_vm0, %v11761_v1  ;;  %12702 = vmatpush3.msk.msra.mxu0 (!%p144_p9), %vm198_vm0, %v11720_v0  ;;  %vm193_vm2 = vcmask (!%p144_p9), 31744   ;;  %v11727_v14 = vld [vmem:[%s15244_s1 + $0x8] sm:$0xf] (!%p144_p9)  ;;  %vm361_vm3 = vcmask (!%p144_p9), 1045504   ;;  %v11733_v21 = vld [vmem:[%s15244_s1 + $0xc] sm:$0xf] (!%p144_p9) }
  0x10   : > { %12747 = vmatpush3.msk.msra.mxu1 (!%p144_p9), %vm198_vm0, %v11761_v1  ;;  %12706 = vmatprep.subr.msk.mxu0 (!%p144_p9), %vm198_vm0, %v184_v2  ;;  %v11768_v15 = vld [vmem:[%s15244_s1 + $0x8] sm:$0xf] (!%p144_p9)  ;;  %v11774_v23 = vld [vmem:[%s15244_s1 + $0xc] sm:$0xf] (!%p144_p9)  ;;  %v11737_v24 = vld [vmem:[%s15244_s1 + $0x10] sm:$0xf] (!%p144_p9) }
  0x11   : > { %12751 = vmatprep.subr.msk.mxu1 (!%p144_p9), %vm198_vm0, %v1011_v3  ;;  %v11778_v26 = vld [vmem:[%s15244_s1 + $0x10] sm:$0xf] (!%p144_p9)  ;;  %v11741_v30 = vld [vmem:[%s15244_s1 + $0x14] sm:$0xf] (!%p144_p9)  ;;  %v11747_v35 = vld [vmem:[%s15244_s1 + $0x18] sm:$0xf] (!%p144_p9) }
  0x12   : > { %v11782_v32 = vld [vmem:[%s15244_s1 + $0x14] sm:$0xf] (!%p144_p9)  ;;  %v11788_v37 = vld [vmem:[%s15244_s1 + $0x18] sm:$0xf] (!%p144_p9)  ;;  %v11751_v38 = vld [vmem:[%s15244_s1 + $0x1c] sm:$0xf] (!%p144_p9) }
  0x13   : > { %v11792_v40 = vld [vmem:[%s15244_s1 + $0x1c] sm:$0xf] (!%p144_p9)  ;;  %v11755_v44 = vld [vmem:[%s15244_s1 + $0x20] sm:$0xf] (!%p144_p9)  ;;  %v11804_v50 = vld [vmem:[%s15244_s1 + $0x4] sm:$0xf] (!%p144_p9) }
  0x14   : > { %v11796_v46 = vld [vmem:[%s15244_s1 + $0x20] sm:$0xf] (!%p144_p9)  ;;  %v11847_v51 = vld [vmem:[%s15244_s1 + $0x4] sm:$0xf] (!%p144_p9)  ;;  %v11811_v54 = vld [vmem:[%s15244_s1 + $0x8] sm:$0xf] (!%p144_p9) }
  0x15   : > { %s13745_s5 = scalar_select %p172_p10, %s13701_s16, 1  ;;  %v1826_v52 = vld [vmem:[%s15244_s1] sm:$0xf]  ;;  %v11854_v55 = vld [vmem:[%s15244_s1 + $0x8] sm:$0xf] }
  0x16   : > { %v2641_v53 = vld [vmem:[%s15244_s1] sm:$0xf]  ;;  %v11817_v56 = vld [vmem:[%s15244_s1 + $0xc] sm:$0xf]  ;;  %v11821_v58 = vld [vmem:[%s15244_s1 + $0x10] sm:$0xf] }
  0x17   : > { %s12322_s6 = sshll.u32 %s13745_s5, 8  ;;  %v11860_v57 = vld [vmem:[%s15244_s1 + $0xc] sm:$0xf]  ;;  %v11864_v60 = vld [vmem:[%s15244_s1 + $0x10] sm:$0xf]  ;;  %s13555_s10 = smul.u32 224, %s13745_s5 }
  0x18   : > { %s13754_s9 = scalar_lea.vmem %s15243_s0, %s12322_s6  ;;  %v11825_v0 = vld [vmem:[%s15244_s1 + $0x14] sm:$0xf]  ;;  %s12319_s26 = sshll.u32 %s13701_s16, 5 }
  0x19   : > { %v182_v4 = vld [vmem:[%s13754_s9] sm:$0xff]  ;;  %v183_v5 = vld [vmem:[%s13754_s9 + $0x8] sm:$0xff]  ;;  %v11759_v6 = vld [vmem:[%s13754_s9 + $0x10] sm:$0xff]  ;;  %s14586_s20 = scalar_lea.vmem %s15245_s2, %s13555_s10  ;;  %s15201_s4 = scalar_lea.hbm %s15246_s3, %s12319_s26 }
  0x1a   : > { %v190_v7 = vrot.slane %v182_v4, 1  ;;  %v191_v8 = vrot.slane %v183_v5, 1  ;;  %v11760_v9 = vld [vmem:[%s13754_s9 + $0x18] sm:$0xff]  ;;  %v1015_v10 = vrot.slane %v11759_v6, 1  ;;  %v362_v16 = vrot.slane %v182_v4, 2  ;;  %v13799_v25 = vld [vmem:[%s13754_s9 + $0x20] sm:$0xff] }
  0x1b   : > { %v1016_v11 = vrot.slane %v11760_v9, 1  ;;  %v363_v17 = vrot.slane %v183_v5, 2  ;;  %v1183_v18 = vrot.slane %v11759_v6, 2  ;;  %v1184_v19 = vrot.slane %v11760_v9, 2  ;;  %v13812_v27 = vld [vmem:[%s13754_s9 + $0x28] sm:$0xff]  ;;  %v13868_v39 = vld [vmem:[%s13754_s9 + $0x30] sm:$0xff] }
  0x1c   : > { %v192_v12 = vsel %vm189_vm1, %v190_v7, %v191_v8  ;;  %v1360_v28 = vrot.slane %v13799_v25, 1  ;;  %v13817_v29 = vrot.slane %v13812_v27, 1  ;;  %v1448_v33 = vrot.slane %v13799_v25, 2  ;;  %v13883_v41 = vld [vmem:[%s13754_s9 + $0x38] sm:$0xff]  ;;  %v13998_v59 = vld [vmem:[%s13754_s9 + $0x40] sm:$0xff]  ;;  %v14013_v61 = vld [vmem:[%s13754_s9 + $0x48] sm:$0xff] }
  0x1d   : > { %12703 = vmatprep.mubr.msk.f32.mxu0 %vm193_vm2, %v192_v12  ;;  %v1017_v13 = vsel %vm189_vm1, %v1015_v10, %v1016_v11  ;;  %v364_v20 = vsel %vm361_vm3, %v362_v16, %v363_v17  ;;  %v1185_v22 = vsel %vm361_vm3, %v1183_v18, %v1184_v19  ;;  %v13841_v34 = vrot.slane %v13812_v27, 2  ;;  %v11874_v7 = vld [vmem:[%s15244_s1 + $0x18] sm:$0xf]  ;;  %v11878_v10 = vld [vmem:[%s15244_s1 + $0x1c] sm:$0xf]  ;;  %s13659_s7 = smov [#allocation2]  }
  0x1e   : > { %12748 = vmatprep.mubr.msk.f32.mxu1 %vm193_vm2, %v1017_v13  ;;  %12704 = vmatmul.mubr.msk.f32.vlgmr.msra.gmra.mrb[0].mxu0 %vm193_vm2, %v191_v8  ;;  %v13825_v31 = vsel %vm189_vm1, %v1360_v28, %v13817_v29  ;;  %v1626_v42 = vrot.slane %v13868_v39, 1  ;;  %v13888_v43 = vrot.slane %v13883_v41, 1  ;;  %v1714_v47 = vrot.slane %v13868_v39, 2  ;;  %v11835_v8 = vld [vmem:[%s15244_s1 + $0x1c] sm:$0xf]  ;;  %s13599_s8 = sshll.u32 %s13659_s7, 4  ;;  %s13600_s8 = int_to_ptr.vmem [resolvable:$false] %s13599_s8 }
  0x1f   : > { %12707 = vmatpush3.msk.msra.mxu0 %vm198_vm0, %v184_v2  ;;  %12749 = vmatmul.mubr.msk.f32.vlgmr.msra.gmra.mrb[0].mxu1 %vm193_vm2, %v1016_v11  ;;  %v13849_v36 = vsel %vm361_vm3, %v1448_v33, %v13841_v34  ;;  %v13914_v48 = vrot.slane %v13883_v41, 2  ;;  %v2990_v62 = vrot.slane %v13998_v59, 1  ;;  %v14018_v63 = vrot.slane %v14013_v61, 1  ;;  %v11868_v2 = vld [vmem:[%s15244_s1 + $0x14] sm:$0xf]  ;;  %s13601_s10 = scalar_lea.vmem %s13600_s8, 64 }
  0x20   : > { %12752 = vmatpush3.msk.msra.mxu1 %vm198_vm0, %v1011_v3  ;;  %12708 = vmatprep.mubr.msk.f32.mxu0 %vm193_vm2, %v182_v4  ;;  %v13897_v45 = vsel %vm189_vm1, %v1626_v42, %v13888_v43  ;;  %v3078_v3 = vrot.slane %v13998_v59, 2  ;;  %v14044_v4 = vrot.slane %v14013_v61, 2  ;;  %v11882_v16 = vld [vmem:[%s15244_s1 + $0x20] sm:$0xf]  ;;  %v11907_v28 = vld [vmem:[%s15244_s1 + $0x10] sm:$0xf] }
  0x21   : > { %12711 = vmatprep.subr.msk.mxu0 %vm198_vm0, %v11727_v14  ;;  %12753 = vmatprep.mubr.msk.f32.mxu1 %vm193_vm2, %v11759_v6  ;;  %v13920_v49 = vsel %vm361_vm3, %v1714_v47, %v13914_v48  ;;  %v14027_v1 = vsel %vm189_vm1, %v2990_v62, %v14018_v63  ;;  %v11921_v42 = vld [vmem:[%s15244_s1 + $0x1c] sm:$0xf]  ;;  %v11993_v62 = vld [vmem:[%s15244_s1 + $0x10] sm:$0xf] }
  0x22   : > { %12756 = vmatprep.subr.msk.mxu1 %vm198_vm0, %v11768_v15 }
  0x26   : > { %12709 = vmatmul.mubr.msk.f32.vlgmr.msra.gmra.mrb[0].mxu0 %vm193_vm2, %v183_v5  ;;  %v11831_v5 = vld [vmem:[%s15244_s1 + $0x18] sm:$0xf] }
  0x27   : > { %12712 = vmatpush3.msk.msra.mxu0 %vm198_vm0, %v11727_v14  ;;  %12754 = vmatmul.mubr.msk.f32.vlgmr.msra.gmra.mrb[0].mxu1 %vm193_vm2, %v11760_v9  ;;  %v11839_v14 = vld [vmem:[%s15244_s1 + $0x20] sm:$0xf] }
  0x28   : > { %12757 = vmatpush3.msk.msra.mxu1 %vm198_vm0, %v11768_v15  ;;  %12713 = vmatprep.mubr.msk.f32.mxu0 %vm193_vm2, %v364_v20  ;;  %v11890_v20 = vld [vmem:[%s15244_s1 + $0x4] sm:$0xf] }
  0x29   : > { %12716 = vmatprep.subr.msk.mxu0 %vm198_vm0, %v11733_v21  ;;  %12758 = vmatprep.mubr.msk.f32.mxu1 %vm193_vm2, %v1185_v22 }
  0x2a   : > { %12761 = vmatprep.subr.msk.mxu1 %vm198_vm0, %v11774_v23 }
  0x2e   : > { %12714 = vmatmul.mubr.msk.f32.vlgmr.msra.gmra.mrb[0].mxu0 %vm193_vm2, %v363_v17 }
  0x2f   : > { %12717 = vmatpush3.msk.msra.mxu0 %vm198_vm0, %v11733_v21  ;;  %12759 = vmatmul.mubr.msk.f32.vlgmr.msra.gmra.mrb[0].mxu1 %vm193_vm2, %v1184_v19  ;;  %v11933_v21 = vld [vmem:[%s15244_s1 + $0x4] sm:$0xf] }
  0x30   : > { %12762 = vmatpush3.msk.msra.mxu1 %vm198_vm0, %v11774_v23  ;;  %12718 = vmatprep.mubr.msk.f32.mxu0 %vm193_vm2, %v11759_v6  ;;  %v14053_v6 = vsel %vm361_vm3, %v3078_v3, %v14044_v4  ;;  %v4271_v23 = vld [vmem:[%s15244_s1] sm:$0xf] }
  0x31   : > { %12721 = vmatprep.subr.msk.mxu0 %vm198_vm0, %v11737_v24  ;;  %12763 = vmatprep.mubr.msk.f32.mxu1 %vm193_vm2, %v13799_v25 }
  0x32   : > { %12766 = vmatprep.subr.msk.mxu1 %vm198_vm0, %v11778_v26 }
  0x36   : > { %12719 = vmatmul.mubr.msk.f32.vlgmr.msra.gmra.mrb[0].mxu0 %vm193_vm2, %v11760_v9  ;;  %v14074_v9 = vld [vmem:[%s13754_s9 + $0x50] sm:$0xff] }
  0x37   : > { %12722 = vmatpush3.msk.msra.mxu0 %vm198_vm0, %v11737_v24  ;;  %12764 = vmatmul.mubr.msk.f32.vlgmr.msra.gmra.mrb[0].mxu1 %vm193_vm2, %v13812_v27  ;;  %v3256_v12 = vrot.slane %v14074_v9, 1  ;;  %v3344_v17 = vrot.slane %v14074_v9, 2  ;;  %v11897_v24 = vld [vmem:[%s15244_s1 + $0x8] sm:$0xf] }
  0x38   : > { %12767 = vmatpush3.msk.msra.mxu1 %vm198_vm0, %v11778_v26  ;;  %12723 = vmatprep.mubr.msk.f32.mxu0 %vm193_vm2, %v1017_v13  ;;  %v11903_v26 = vld [vmem:[%s15244_s1 + $0xc] sm:$0xf] }
  0x39   : > { %12726 = vmatprep.subr.msk.mxu0 %vm198_vm0, %v11741_v30  ;;  %12768 = vmatprep.mubr.msk.f32.mxu1 %vm193_vm2, %v13825_v31 }
  0x3a   : > { %12771 = vmatprep.subr.msk.mxu1 %vm198_vm0, %v11782_v32 }
  0x3e   : > { %12724 = vmatmul.mubr.msk.f32.vlgmr.msra.gmra.mrb[0].mxu0 %vm193_vm2, %v1016_v11  ;;  %v14089_v11 = vld [vmem:[%s13754_s9 + $0x58] sm:$0xff] }
  0x3f   : > { %12727 = vmatpush3.msk.msra.mxu0 %vm198_vm0, %v11741_v30  ;;  %12769 = vmatmul.mubr.msk.f32.vlgmr.msra.gmra.mrb[0].mxu1 %vm193_vm2, %v13817_v29  ;;  %v14094_v13 = vrot.slane %v14089_v11, 1  ;;  %v14120_v18 = vrot.slane %v14089_v11, 2  ;;  %v11950_v30 = vld [vmem:[%s15244_s1 + $0x10] sm:$0xf] }
  0x40   : > { %12772 = vmatpush3.msk.msra.mxu1 %vm198_vm0, %v11782_v32  ;;  %12728 = vmatprep.mubr.msk.f32.mxu0 %vm193_vm2, %v1185_v22  ;;  %v3456_v22 = vld [vmem:[%s15244_s1] sm:$0xf] }
  0x41   : > { %12731 = vmatprep.subr.msk.mxu0 %vm198_vm0, %v11747_v35  ;;  %12773 = vmatprep.mubr.msk.f32.mxu1 %vm193_vm2, %v13849_v36  ;;  %v14103_v15 = vsel %vm189_vm1, %v3256_v12, %v14094_v13  ;;  %v12007_v12 = vld [vmem:[%s15244_s1 + $0x1c] sm:$0xf] }
  0x42   : > { %12776 = vmatprep.subr.msk.mxu1 %vm198_vm0, %v11788_v37 }
  0x46   : > { %12729 = vmatmul.mubr.msk.f32.vlgmr.msra.gmra.mrb[0].mxu0 %vm193_vm2, %v1184_v19  ;;  %v14126_v19 = vsel %vm361_vm3, %v3344_v17, %v14120_v18 }
  0x47   : > { %12732 = vmatpush3.msk.msra.mxu0 %vm198_vm0, %v11747_v35  ;;  %12774 = vmatmul.mubr.msk.f32.vlgmr.msra.gmra.mrb[0].mxu1 %vm193_vm2, %v13841_v34 }
  0x48   : > { %12777 = vmatpush3.msk.msra.mxu1 %vm198_vm0, %v11788_v37  ;;  %12733 = vmatprep.mubr.msk.f32.mxu0 %vm193_vm2, %v13799_v25 }
  0x49   : > { %12736 = vmatprep.subr.msk.mxu0 %vm198_vm0, %v11751_v38  ;;  %12778 = vmatprep.mubr.msk.f32.mxu1 %vm193_vm2, %v13868_v39 }
  0x4a   : > { %12781 = vmatprep.subr.msk.mxu1 %vm198_vm0, %v11792_v40 }
  0x4e   : > { %12734 = vmatmul.mubr.msk.f32.vlgmr.msra.gmra.mrb[0].mxu0 %vm193_vm2, %v13812_v27 }
  0x4f   : > { %12737 = vmatpush3.msk.msra.mxu0 %vm198_vm0, %v11751_v38  ;;  %12779 = vmatmul.mubr.msk.f32.vlgmr.msra.gmra.mrb[0].mxu1 %vm193_vm2, %v13883_v41 }
  0x50   : > { %12782 = vmatpush3.msk.msra.mxu1 %vm198_vm0, %v11792_v40  ;;  %12738 = vmatprep.mubr.msk.f32.mxu0 %vm193_vm2, %v13825_v31 }
  0x51   : > { %12741 = vmatprep.subr.msk.mxu0 %vm198_vm0, %v11755_v44  ;;  %12783 = vmatprep.mubr.msk.f32.mxu1 %vm193_vm2, %v13897_v45 }
  0x52   : > { %12786 = vmatprep.subr.msk.mxu1 %vm198_vm0, %v11796_v46 }
  0x56   : > { %12739 = vmatmul.mubr.msk.f32.vlgmr.msra.gmra.mrb[0].mxu0 %vm193_vm2, %v13817_v29 }
  0x57   : > { %12742 = vmatpush3.msk.msra.mxu0 %vm198_vm0, %v11755_v44  ;;  %12784 = vmatmul.mubr.msk.f32.vlgmr.msra.gmra.mrb[0].mxu1 %vm193_vm2, %v13888_v43  ;;  %v11964_v44 = vld [vmem:[%s15244_s1 + $0x1c] sm:$0xf] }
  0x58   : > { %12787 = vmatpush3.msk.msra.mxu1 %vm198_vm0, %v11796_v46  ;;  %12743 = vmatprep.mubr.msk.f32.mxu0 %vm193_vm2, %v13849_v36 }
  0x59   : > { %12788 = vmatprep.mubr.msk.f32.mxu1 %vm193_vm2, %v13920_v49  ;;  %12791 = vmatprep.subr.msk.mxu0 %vm198_vm0, %v11804_v50 }
  0x5a   : > { %12836 = vmatprep.subr.msk.mxu1 %vm198_vm0, %v11847_v51 }
  0x5e   : > { %12744 = vmatmul.mubr.msk.f32.vlgmr.msra.gmra.mrb[0].mxu0 %vm193_vm2, %v13841_v34 }
  0x5f   : > { %12789 = vmatmul.mubr.msk.f32.vlgmr.msra.gmra.mrb[0].mxu1 %vm193_vm2, %v13914_v48  ;;  %12792 = vmatpush3.msk.msra.mxu0 %vm198_vm0, %v11804_v50  ;;  %v11968_v50 = vld [vmem:[%s15244_s1 + $0x20] sm:$0xf] }
  0x60   : > { %12837 = vmatpush3.msk.msra.mxu1 %vm198_vm0, %v11847_v51  ;;  %12793 = vmatprep.mubr.msk.f32.mxu0 %vm193_vm2, %v13825_v31  ;;  %v14219_v31 = vld [vmem:[%s13754_s9 + $0x68] sm:$0xff] }
  0x61   : > { %12796 = vmatprep.subr.msk.mxu0 %vm198_vm0, %v1826_v52  ;;  %12838 = vmatprep.mubr.msk.f32.mxu1 %vm193_vm2, %v13897_v45  ;;  %v14224_v33 = vrot.slane %v14219_v31, 1  ;;  %v14250_v38 = vrot.slane %v14219_v31, 2 }
  0x62   : > { %12794 = vmatmul.mubr.msk.f32.vlgmr.msra.gmra.mrb[2].mxu0 %vm193_vm2, %v13817_v29  ;;  %12841 = vmatprep.subr.msk.mxu1 %vm198_vm0, %v2641_v53  ;;  %v14204_v29 = vld [vmem:[%s13754_s9 + $0x60] sm:$0xff] }
  0x63   : > { %12797 = vmatpush3.msk.msra.mxu0 %vm198_vm0, %v1826_v52  ;;  %12839 = vmatmul.mubr.msk.f32.vlgmr.msra.gmra.mrb[2].mxu1 %vm193_vm2, %v13888_v43  ;;  %v4620_v32 = vrot.slane %v14204_v29, 1  ;;  %v4708_v37 = vrot.slane %v14204_v29, 2 }
  0x64   : > { %12842 = vmatpush3.msk.msra.mxu1 %vm198_vm0, %v2641_v53  ;;  %12798 = vmatprep.mubr.msk.f32.mxu0 %vm193_vm2, %v13799_v25  ;;  %v11940_v25 = vld [vmem:[%s15244_s1 + $0x8] sm:$0xf] }
  0x65   : > { %12801 = vmatprep.subr.msk.mxu0 %vm198_vm0, %v11811_v54  ;;  %12843 = vmatprep.mubr.msk.f32.mxu1 %vm193_vm2, %v13868_v39  ;;  %v14233_v35 = vsel %vm189_vm1, %v4620_v32, %v14224_v33  ;;  %v14259_v40 = vsel %vm361_vm3, %v4708_v37, %v14250_v38 }
  0x66   : > { %12846 = vmatprep.subr.msk.mxu1 %vm198_vm0, %v11854_v55 }
  0x6a   : > { %12799 = vmatmul.mubr.msk.f32.vlgmr.msra.gmra.mrb[2].mxu0 %vm193_vm2, %v13812_v27  ;;  %v11946_v27 = vld [vmem:[%s15244_s1 + $0xc] sm:$0xf] }
  0x6b   : > { %12802 = vmatpush3.msk.msra.mxu0 %vm198_vm0, %v11811_v54  ;;  %12844 = vmatmul.mubr.msk.f32.vlgmr.msra.gmra.mrb[2].mxu1 %vm193_vm2, %v13883_v41  ;;  %v11976_v54 = vld [vmem:[%s15244_s1 + $0x4] sm:$0xf] }
  0x6c   : > { %12847 = vmatpush3.msk.msra.mxu1 %vm198_vm0, %v11854_v55  ;;  %12803 = vmatprep.mubr.msk.f32.mxu0 %vm193_vm2, %v13849_v36  ;;  %v11954_v36 = vld [vmem:[%s15244_s1 + $0x14] sm:$0xf]  ;;  %v12019_v55 = vld [vmem:[%s15244_s1 + $0x4] sm:$0xf] }
  0x6d   : > { %12806 = vmatprep.subr.msk.mxu0 %vm198_vm0, %v11817_v56  ;;  %12848 = vmatprep.mubr.msk.f32.mxu1 %vm193_vm2, %v13920_v49 }
  0x6e   : > { %12851 = vmatprep.subr.msk.mxu1 %vm198_vm0, %v11860_v57 }
  0x72   : > { %12804 = vmatmul.mubr.msk.f32.vlgmr.msra.gmra.mrb[2].mxu0 %vm193_vm2, %v13841_v34  ;;  %v11911_v34 = vld [vmem:[%s15244_s1 + $0x14] sm:$0xf] }
  0x73   : > { %12807 = vmatpush3.msk.msra.mxu0 %vm198_vm0, %v11817_v56  ;;  %12849 = vmatmul.mubr.msk.f32.vlgmr.msra.gmra.mrb[2].mxu1 %vm193_vm2, %v13914_v48  ;;  %v5086_v56 = vld [vmem:[%s15244_s1] sm:$0xf] }
  0x74   : > { %12852 = vmatpush3.msk.msra.mxu1 %vm198_vm0, %v11860_v57  ;;  %12808 = vmatprep.mubr.msk.f32.mxu0 %vm193_vm2, %v13868_v39  ;;  %v11917_v39 = vld [vmem:[%s15244_s1 + $0x18] sm:$0xf]  ;;  %v5901_v57 = vld [vmem:[%s15244_s1] sm:$0xf] }
  0x75   : > { %12811 = vmatprep.subr.msk.mxu0 %vm198_vm0, %v11821_v58  ;;  %12853 = vmatprep.mubr.msk.f32.mxu1 %vm193_vm2, %v13998_v59 }
  0x76   : > { %12856 = vmatprep.subr.msk.mxu1 %vm198_vm0, %v11864_v60 }
  0x7a   : > { %12809 = vmatmul.mubr.msk.f32.vlgmr.msra.gmra.mrb[2].mxu0 %vm193_vm2, %v13883_v41  ;;  %v11960_v41 = vld [vmem:[%s15244_s1 + $0x18] sm:$0xf] }
  0x7b   : > { %12812 = vmatpush3.msk.msra.mxu0 %vm198_vm0, %v11821_v58  ;;  %12854 = vmatmul.mubr.msk.f32.vlgmr.msra.gmra.mrb[2].mxu1 %vm193_vm2, %v14013_v61  ;;  %v11983_v58 = vld [vmem:[%s15244_s1 + $0x8] sm:$0xf] }
  0x7c   : > { %12857 = vmatpush3.msk.msra.mxu1 %vm198_vm0, %v11864_v60  ;;  %12813 = vmatprep.mubr.msk.f32.mxu0 %vm193_vm2, %v13897_v45  ;;  %v14295_v45 = vld [vmem:[%s13754_s9 + $0x78] sm:$0xff]  ;;  %v11989_v60 = vld [vmem:[%s15244_s1 + $0xc] sm:$0xf] }
  0x7d   : > { %12816 = vmatprep.subr.msk.mxu0 %vm198_vm0, %v11825_v0  ;;  %12858 = vmatprep.mubr.msk.f32.mxu1 %vm193_vm2, %v14027_v1  ;;  %v14300_v47 = vrot.slane %v14295_v45, 1  ;;  %v14326_v52 = vrot.slane %v14295_v45, 2 }
  0x7e   : > { %12861 = vmatprep.subr.msk.mxu1 %vm198_vm0, %v11868_v2 }
  0x82   : > { %12814 = vmatmul.mubr.msk.f32.vlgmr.msra.gmra.mrb[2].mxu0 %vm193_vm2, %v13888_v43  ;;  %v14280_v43 = vld [vmem:[%s13754_s9 + $0x70] sm:$0xff] }
  0x83   : > { %12817 = vmatpush3.msk.msra.mxu0 %vm198_vm0, %v11825_v0  ;;  %12859 = vmatmul.mubr.msk.f32.vlgmr.msra.gmra.mrb[2].mxu1 %vm193_vm2, %v14018_v63  ;;  %v4886_v46 = vrot.slane %v14280_v43, 1  ;;  %v4974_v51 = vrot.slane %v14280_v43, 2  ;;  %v12036_v0 = vld [vmem:[%s15244_s1 + $0x10] sm:$0xf] }
  0x84   : > { %12862 = vmatpush3.msk.msra.mxu1 %vm198_vm0, %v11868_v2  ;;  %12818 = vmatprep.mubr.msk.f32.mxu0 %vm193_vm2, %v13920_v49 }
  0x85   : > { %12821 = vmatprep.subr.msk.mxu0 %vm198_vm0, %v11831_v5  ;;  %12863 = vmatprep.mubr.msk.f32.mxu1 %vm193_vm2, %v14053_v6  ;;  %v14309_v49 = vsel %vm189_vm1, %v4886_v46, %v14300_v47  ;;  %v14332_v53 = vsel %vm361_vm3, %v4974_v51, %v14326_v52  ;;  %v12118_v51 = vld [vmem:[%s15244_s1 + $0xc] sm:$0xf] }
  0x86   : > { %12866 = vmatprep.subr.msk.mxu1 %vm198_vm0, %v11874_v7 }
  0x8a   : > { %12819 = vmatmul.mubr.msk.f32.vlgmr.msra.gmra.mrb[2].mxu0 %vm193_vm2, %v13914_v48  ;;  %v11925_v48 = vld [vmem:[%s15244_s1 + $0x20] sm:$0xf] }
  0x8b   : > { %12822 = vmatpush3.msk.msra.mxu0 %vm198_vm0, %v11831_v5  ;;  %12864 = vmatmul.mubr.msk.f32.vlgmr.msra.gmra.mrb[2].mxu1 %vm193_vm2, %v14044_v4 }
  0x8c   : > { %12867 = vmatpush3.msk.msra.mxu1 %vm198_vm0, %v11874_v7  ;;  %12823 = vmatprep.mubr.msk.f32.mxu0 %vm193_vm2, %v13998_v59 }
  0x8d   : > { %12826 = vmatprep.subr.msk.mxu0 %vm198_vm0, %v11835_v8  ;;  %12868 = vmatprep.mubr.msk.f32.mxu1 %vm193_vm2, %v14074_v9 }
  0x8e   : > { %12871 = vmatprep.subr.msk.mxu1 %vm198_vm0, %v11878_v10 }
  0x92   : > { %12824 = vmatmul.mubr.msk.f32.vlgmr.msra.gmra.mrb[2].mxu0 %vm193_vm2, %v14013_v61 }
  0x93   : > { %12827 = vmatpush3.msk.msra.mxu0 %vm198_vm0, %v11835_v8  ;;  %12869 = vmatmul.mubr.msk.f32.vlgmr.msra.gmra.mrb[2].mxu1 %vm193_vm2, %v14089_v11 }
  0x94   : > { %12872 = vmatpush3.msk.msra.mxu1 %vm198_vm0, %v11878_v10  ;;  %12828 = vmatprep.mubr.msk.f32.mxu0 %vm193_vm2, %v14027_v1 }
  0x95   : > { %12831 = vmatprep.subr.msk.mxu0 %vm198_vm0, %v11839_v14  ;;  %12873 = vmatprep.mubr.msk.f32.mxu1 %vm193_vm2, %v14103_v15 }
  0x96   : > { %12876 = vmatprep.subr.msk.mxu1 %vm198_vm0, %v11882_v16 }
  0x9a   : > { %12829 = vmatmul.mubr.msk.f32.vlgmr.msra.gmra.mrb[2].mxu0 %vm193_vm2, %v14018_v63 }
  0x9b   : > { %12832 = vmatpush3.msk.msra.mxu0 %vm198_vm0, %v11839_v14  ;;  %12874 = vmatmul.mubr.msk.f32.vlgmr.msra.gmra.mrb[2].mxu1 %vm193_vm2, %v14094_v13  ;;  %v12050_v14 = vld [vmem:[%s15244_s1 + $0x1c] sm:$0xf] }
  0x9c   : > { %12877 = vmatpush3.msk.msra.mxu1 %vm198_vm0, %v11882_v16  ;;  %12833 = vmatprep.mubr.msk.f32.mxu0 %vm193_vm2, %v14053_v6 }
  0x9d   : > { %12878 = vmatprep.mubr.msk.f32.mxu1 %vm193_vm2, %v14126_v19  ;;  %12881 = vmatprep.subr.msk.mxu0 %vm198_vm0, %v11890_v20 }
  0x9e   : > { %12926 = vmatprep.subr.msk.mxu1 %vm198_vm0, %v11933_v21 }
  0xa2   : > { %12834 = vmatmul.mubr.msk.f32.vlgmr.msra.gmra.mrb[2].mxu0 %vm193_vm2, %v14044_v4 }
  0xa3   : > { %12879 = vmatmul.mubr.msk.f32.vlgmr.msra.gmra.mrb[2].mxu1 %vm193_vm2, %v14120_v18  ;;  %12882 = vmatpush3.msk.msra.mxu0 %vm198_vm0, %v11890_v20  ;;  %v12054_v20 = vld [vmem:[%s15244_s1 + $0x20] sm:$0xf] }
  0xa4   : > { %12927 = vmatpush3.msk.msra.mxu1 %vm198_vm0, %v11933_v21  ;;  %12883 = vmatprep.mubr.msk.f32.mxu0 %vm193_vm2, %v14027_v1  ;;  %v14425_v1 = vld [vmem:[%s13754_s9 + $0x88] sm:$0xff] }
  0xa5   : > { %12886 = vmatprep.subr.msk.mxu0 %vm198_vm0, %v3456_v22  ;;  %12928 = vmatprep.mubr.msk.f32.mxu1 %vm193_vm2, %v14103_v15  ;;  %v14430_v3 = vrot.slane %v14425_v1, 1  ;;  %v14456_v8 = vrot.slane %v14425_v1, 2 }
  0xa6   : > { %12884 = vmatmul.mubr.msk.f32.vlgmr.msra.gmra.mrb[4].mxu0 %vm193_vm2, %v14018_v63  ;;  %12931 = vmatprep.subr.msk.mxu1 %vm198_vm0, %v4271_v23  ;;  %v14410_v63 = vld [vmem:[%s13754_s9 + $0x80] sm:$0xff] }
  0xa7   : > { %12887 = vmatpush3.msk.msra.mxu0 %vm198_vm0, %v3456_v22  ;;  %12929 = vmatmul.mubr.msk.f32.vlgmr.msra.gmra.mrb[4].mxu1 %vm193_vm2, %v14094_v13  ;;  %v6250_v2 = vrot.slane %v14410_v63, 1  ;;  %v6338_v7 = vrot.slane %v14410_v63, 2 }
  0xa8   : > { %12932 = vmatpush3.msk.msra.mxu1 %vm198_vm0, %v4271_v23  ;;  %12888 = vmatprep.mubr.msk.f32.mxu0 %vm193_vm2, %v13998_v59  ;;  %v12026_v59 = vld [vmem:[%s15244_s1 + $0x8] sm:$0xf] }
  0xa9   : > { %12891 = vmatprep.subr.msk.mxu0 %vm198_vm0, %v11897_v24  ;;  %12933 = vmatprep.mubr.msk.f32.mxu1 %vm193_vm2, %v14074_v9  ;;  %v14439_v5 = vsel %vm189_vm1, %v6250_v2, %v14430_v3  ;;  %v14465_v10 = vsel %vm361_vm3, %v6338_v7, %v14456_v8  ;;  %v12079_v2 = vld [vmem:[%s15244_s1 + $0x10] sm:$0xf] }
  0xaa   : > { %12936 = vmatprep.subr.msk.mxu1 %vm198_vm0, %v11940_v25 }
  0xae   : > { %12889 = vmatmul.mubr.msk.f32.vlgmr.msra.gmra.mrb[4].mxu0 %vm193_vm2, %v14013_v61  ;;  %v12032_v61 = vld [vmem:[%s15244_s1 + $0xc] sm:$0xf] }
  0xaf   : > { %12892 = vmatpush3.msk.msra.mxu0 %vm198_vm0, %v11897_v24  ;;  %12934 = vmatmul.mubr.msk.f32.vlgmr.msra.gmra.mrb[4].mxu1 %vm193_vm2, %v14089_v11  ;;  %v12062_v24 = vld [vmem:[%s15244_s1 + $0x4] sm:$0xf] }
  0xb0   : > { %12937 = vmatpush3.msk.msra.mxu1 %vm198_vm0, %v11940_v25  ;;  %12893 = vmatprep.mubr.msk.f32.mxu0 %vm193_vm2, %v14053_v6  ;;  %v12040_v6 = vld [vmem:[%s15244_s1 + $0x14] sm:$0xf]  ;;  %v12105_v25 = vld [vmem:[%s15244_s1 + $0x4] sm:$0xf] }
  0xb1   : > { %12896 = vmatprep.subr.msk.mxu0 %vm198_vm0, %v11903_v26  ;;  %12938 = vmatprep.mubr.msk.f32.mxu1 %vm193_vm2, %v14126_v19 }
  0xb2   : > { %12941 = vmatprep.subr.msk.mxu1 %vm198_vm0, %v11946_v27 }
  0xb6   : > { %12894 = vmatmul.mubr.msk.f32.vlgmr.msra.gmra.mrb[4].mxu0 %vm193_vm2, %v14044_v4  ;;  %v11997_v4 = vld [vmem:[%s15244_s1 + $0x14] sm:$0xf] }
  0xb7   : > { %12897 = vmatpush3.msk.msra.mxu0 %vm198_vm0, %v11903_v26  ;;  %12939 = vmatmul.mubr.msk.f32.vlgmr.msra.gmra.mrb[4].mxu1 %vm193_vm2, %v14120_v18  ;;  %v6716_v26 = vld [vmem:[%s15244_s1] sm:$0xf] }
  0xb8   : > { %12942 = vmatpush3.msk.msra.mxu1 %vm198_vm0, %v11946_v27  ;;  %12898 = vmatprep.mubr.msk.f32.mxu0 %vm193_vm2, %v14074_v9  ;;  %v12003_v9 = vld [vmem:[%s15244_s1 + $0x18] sm:$0xf]  ;;  %v7531_v27 = vld [vmem:[%s15244_s1] sm:$0xf] }
  0xb9   : > { %12901 = vmatprep.subr.msk.mxu0 %vm198_vm0, %v11907_v28  ;;  %12943 = vmatprep.mubr.msk.f32.mxu1 %vm193_vm2, %v14204_v29 }
  0xba   : > { %12946 = vmatprep.subr.msk.mxu1 %vm198_vm0, %v11950_v30 }
  0xbe   : > { %12899 = vmatmul.mubr.msk.f32.vlgmr.msra.gmra.mrb[4].mxu0 %vm193_vm2, %v14089_v11  ;;  %v12046_v11 = vld [vmem:[%s15244_s1 + $0x18] sm:$0xf] }
  0xbf   : > { %12902 = vmatpush3.msk.msra.mxu0 %vm198_vm0, %v11907_v28  ;;  %12944 = vmatmul.mubr.msk.f32.vlgmr.msra.gmra.mrb[4].mxu1 %vm193_vm2, %v14219_v31  ;;  %v12069_v28 = vld [vmem:[%s15244_s1 + $0x8] sm:$0xf] }
  0xc0   : > { %12947 = vmatpush3.msk.msra.mxu1 %vm198_vm0, %v11950_v30  ;;  %12903 = vmatprep.mubr.msk.f32.mxu0 %vm193_vm2, %v14103_v15  ;;  %v14501_v15 = vld [vmem:[%s13754_s9 + $0x98] sm:$0xff] }
  0xc1   : > { %12906 = vmatprep.subr.msk.mxu0 %vm198_vm0, %v11911_v34  ;;  %12948 = vmatprep.mubr.msk.f32.mxu1 %vm193_vm2, %v14233_v35  ;;  %v14506_v17 = vrot.slane %v14501_v15, 1  ;;  %v14532_v22 = vrot.slane %v14501_v15, 2 }
  0xc2   : > { %12951 = vmatprep.subr.msk.mxu1 %vm198_vm0, %v11954_v36 }
  0xc6   : > { %12904 = vmatmul.mubr.msk.f32.vlgmr.msra.gmra.mrb[4].mxu0 %vm193_vm2, %v14094_v13  ;;  %v14486_v13 = vld [vmem:[%s13754_s9 + $0x90] sm:$0xff] }
  0xc7   : > { %12907 = vmatpush3.msk.msra.mxu0 %vm198_vm0, %v11911_v34  ;;  %12949 = vmatmul.mubr.msk.f32.vlgmr.msra.gmra.mrb[4].mxu1 %vm193_vm2, %v14224_v33  ;;  %v6516_v16 = vrot.slane %v14486_v13, 1  ;;  %v6604_v21 = vrot.slane %v14486_v13, 2 }
  0xc8   : > { %12952 = vmatpush3.msk.msra.mxu1 %vm198_vm0, %v11954_v36  ;;  %12908 = vmatprep.mubr.msk.f32.mxu0 %vm193_vm2, %v14126_v19 }
  0xc9   : > { %12911 = vmatprep.subr.msk.mxu0 %vm198_vm0, %v11917_v39  ;;  %12953 = vmatprep.mubr.msk.f32.mxu1 %vm193_vm2, %v14259_v40  ;;  %v14515_v19 = vsel %vm189_vm1, %v6516_v16, %v14506_v17  ;;  %v14538_v23 = vsel %vm361_vm3, %v6604_v21, %v14532_v22  ;;  %v12126_v21 = vld [vmem:[%s15244_s1 + $0x14] sm:$0xf] }
  0xca   : > { %12956 = vmatprep.subr.msk.mxu1 %vm198_vm0, %v11960_v41 }
  0xce   : > { %12909 = vmatmul.mubr.msk.f32.vlgmr.msra.gmra.mrb[4].mxu0 %vm193_vm2, %v14120_v18  ;;  %v12011_v18 = vld [vmem:[%s15244_s1 + $0x20] sm:$0xf] }
  0xcf   : > { %12912 = vmatpush3.msk.msra.mxu0 %vm198_vm0, %v11917_v39  ;;  %12954 = vmatmul.mubr.msk.f32.vlgmr.msra.gmra.mrb[4].mxu1 %vm193_vm2, %v14250_v38 }
  0xd0   : > { %12957 = vmatpush3.msk.msra.mxu1 %vm198_vm0, %v11960_v41  ;;  %12913 = vmatprep.mubr.msk.f32.mxu0 %vm193_vm2, %v14204_v29 }
  0xd1   : > { %12916 = vmatprep.subr.msk.mxu0 %vm198_vm0, %v11921_v42  ;;  %12958 = vmatprep.mubr.msk.f32.mxu1 %vm193_vm2, %v14280_v43 }
  0xd2   : > { %12961 = vmatprep.subr.msk.mxu1 %vm198_vm0, %v11964_v44 }
  0xd6   : > { %12914 = vmatmul.mubr.msk.f32.vlgmr.msra.gmra.mrb[4].mxu0 %vm193_vm2, %v14219_v31 }
  0xd7   : > { %12917 = vmatpush3.msk.msra.mxu0 %vm198_vm0, %v11921_v42  ;;  %12959 = vmatmul.mubr.msk.f32.vlgmr.msra.gmra.mrb[4].mxu1 %vm193_vm2, %v14295_v45 }
  0xd8   : > { %12962 = vmatpush3.msk.msra.mxu1 %vm198_vm0, %v11964_v44  ;;  %12918 = vmatprep.mubr.msk.f32.mxu0 %vm193_vm2, %v14233_v35 }
  0xd9   : > { %12921 = vmatprep.subr.msk.mxu0 %vm198_vm0, %v11925_v48  ;;  %12963 = vmatprep.mubr.msk.f32.mxu1 %vm193_vm2, %v14309_v49 }
  0xda   : > { %12966 = vmatprep.subr.msk.mxu1 %vm198_vm0, %v11968_v50 }
  0xde   : > { %12919 = vmatmul.mubr.msk.f32.vlgmr.msra.gmra.mrb[4].mxu0 %vm193_vm2, %v14224_v33 }
  0xdf   : > { %12922 = vmatpush3.msk.msra.mxu0 %vm198_vm0, %v11925_v48  ;;  %12964 = vmatmul.mubr.msk.f32.vlgmr.msra.gmra.mrb[4].mxu1 %vm193_vm2, %v14300_v47  ;;  %v12075_v48 = vld [vmem:[%s15244_s1 + $0xc] sm:$0xf] }
  0xe0   : > { %12967 = vmatpush3.msk.msra.mxu1 %vm198_vm0, %v11968_v50  ;;  %12923 = vmatprep.mubr.msk.f32.mxu0 %vm193_vm2, %v14259_v40 }
  0xe1   : > { %12968 = vmatprep.mubr.msk.f32.mxu1 %vm193_vm2, %v14332_v53  ;;  %12971 = vmatprep.subr.msk.mxu0 %vm198_vm0, %v11976_v54 }
  0xe2   : > { %13016 = vmatprep.subr.msk.mxu1 %vm198_vm0, %v12019_v55 }
  0xe6   : > { %12924 = vmatmul.mubr.msk.f32.vlgmr.msra.gmra.mrb[4].mxu0 %vm193_vm2, %v14250_v38 }
  0xe7   : > { %12969 = vmatmul.mubr.msk.f32.vlgmr.msra.gmra.mrb[4].mxu1 %vm193_vm2, %v14326_v52  ;;  %12972 = vmatpush3.msk.msra.mxu0 %vm198_vm0, %v11976_v54 }
  0xe8   : > { %13017 = vmatpush3.msk.msra.mxu1 %vm198_vm0, %v12019_v55  ;;  %12973 = vmatprep.mubr.msk.f32.mxu0 %vm193_vm2, %v14233_v35 }
  0xe9   : > { %12976 = vmatprep.subr.msk.mxu0 %vm198_vm0, %v5086_v56  ;;  %13018 = vmatprep.mubr.msk.f32.mxu1 %vm193_vm2, %v14309_v49 }
  0xea   : > { %12974 = vmatmul.mubr.msk.f32.vlgmr.msra.gmra.mrb[6].mxu0 %vm193_vm2, %v14224_v33  ;;  %13021 = vmatprep.subr.msk.mxu1 %vm198_vm0, %v5901_v57 }
  0xeb   : > { %12977 = vmatpush3.msk.msra.mxu0 %vm198_vm0, %v5086_v56  ;;  %13019 = vmatmul.mubr.msk.f32.vlgmr.msra.gmra.mrb[6].mxu1 %vm193_vm2, %v14300_v47 }
  0xec   : > { %13022 = vmatpush3.msk.msra.mxu1 %vm198_vm0, %v5901_v57  ;;  %12978 = vmatprep.mubr.msk.f32.mxu0 %vm193_vm2, %v14204_v29  ;;  %v12112_v29 = vld [vmem:[%s15244_s1 + $0x8] sm:$0xf] }
  0xed   : > { %12981 = vmatprep.subr.msk.mxu0 %vm198_vm0, %v11983_v58  ;;  %13023 = vmatprep.mubr.msk.f32.mxu1 %vm193_vm2, %v14280_v43 }
  0xee   : > { %13026 = vmatprep.subr.msk.mxu1 %vm198_vm0, %v12026_v59 }
  0xf2   : > { %12979 = vmatmul.mubr.msk.f32.vlgmr.msra.gmra.mrb[6].mxu0 %vm193_vm2, %v14219_v31 }
  0xf3   : > { %12982 = vmatpush3.msk.msra.mxu0 %vm198_vm0, %v11983_v58  ;;  %13024 = vmatmul.mubr.msk.f32.vlgmr.msra.gmra.mrb[6].mxu1 %vm193_vm2, %v14295_v45 }
  0xf4   : > { %13027 = vmatpush3.msk.msra.mxu1 %vm198_vm0, %v12026_v59  ;;  %12983 = vmatprep.mubr.msk.f32.mxu0 %vm193_vm2, %v14259_v40 }
  0xf5   : > { %12986 = vmatprep.subr.msk.mxu0 %vm198_vm0, %v11989_v60  ;;  %13028 = vmatprep.mubr.msk.f32.mxu1 %vm193_vm2, %v14332_v53 }
  0xf6   : > { %13031 = vmatprep.subr.msk.mxu1 %vm198_vm0, %v12032_v61 }
  0xfa   : > { %12984 = vmatmul.mubr.msk.f32.vlgmr.msra.gmra.mrb[6].mxu0 %vm193_vm2, %v14250_v38 }
  0xfb   : > { %12987 = vmatpush3.msk.msra.mxu0 %vm198_vm0, %v11989_v60  ;;  %13029 = vmatmul.mubr.msk.f32.vlgmr.msra.gmra.mrb[6].mxu1 %vm193_vm2, %v14326_v52 }
  0xfc   : > { %13032 = vmatpush3.msk.msra.mxu1 %vm198_vm0, %v12032_v61  ;;  %12988 = vmatprep.mubr.msk.f32.mxu0 %vm193_vm2, %v14280_v43 }
  0xfd   : > { %12991 = vmatprep.subr.msk.mxu0 %vm198_vm0, %v11993_v62  ;;  %13033 = vmatprep.mubr.msk.f32.mxu1 %vm193_vm2, %v14410_v63 }
  0xfe   : > { %13036 = vmatprep.subr.msk.mxu1 %vm198_vm0, %v12036_v0 }
 0x102   : > { %12989 = vmatmul.mubr.msk.f32.vlgmr.msra.gmra.mrb[6].mxu0 %vm193_vm2, %v14295_v45 }
 0x103   : > { %12992 = vmatpush3.msk.msra.mxu0 %vm198_vm0, %v11993_v62  ;;  %13034 = vmatmul.mubr.msk.f32.vlgmr.msra.gmra.mrb[6].mxu1 %vm193_vm2, %v14425_v1 }
 0x104   : > { %13037 = vmatpush3.msk.msra.mxu1 %vm198_vm0, %v12036_v0  ;;  %12993 = vmatprep.mubr.msk.f32.mxu0 %vm193_vm2, %v14309_v49 }
 0x105   : > { %12996 = vmatprep.subr.msk.mxu0 %vm198_vm0, %v11997_v4  ;;  %13038 = vmatprep.mubr.msk.f32.mxu1 %vm193_vm2, %v14439_v5 }
 0x106   : > { %13041 = vmatprep.subr.msk.mxu1 %vm198_vm0, %v12040_v6 }
 0x10a   : > { %12994 = vmatmul.mubr.msk.f32.vlgmr.msra.gmra.mrb[6].mxu0 %vm193_vm2, %v14300_v47 }
 0x10b   : > { %12997 = vmatpush3.msk.msra.mxu0 %vm198_vm0, %v11997_v4  ;;  %13039 = vmatmul.mubr.msk.f32.vlgmr.msra.gmra.mrb[6].mxu1 %vm193_vm2, %v14430_v3 }
 0x10c   : > { %13042 = vmatpush3.msk.msra.mxu1 %vm198_vm0, %v12040_v6  ;;  %12998 = vmatprep.mubr.msk.f32.mxu0 %vm193_vm2, %v14332_v53  ;;  %v12122_v6 = vld [vmem:[%s15244_s1 + $0x10] sm:$0xf] }
 0x10d   : > { %13001 = vmatprep.subr.msk.mxu0 %vm198_vm0, %v12003_v9  ;;  %13043 = vmatprep.mubr.msk.f32.mxu1 %vm193_vm2, %v14465_v10 }
 0x10e   : > { %13046 = vmatprep.subr.msk.mxu1 %vm198_vm0, %v12046_v11 }
 0x112   : > { %12999 = vmatmul.mubr.msk.f32.vlgmr.msra.gmra.mrb[6].mxu0 %vm193_vm2, %v14326_v52 }
 0x113   : > { %13002 = vmatpush3.msk.msra.mxu0 %vm198_vm0, %v12003_v9  ;;  %13044 = vmatmul.mubr.msk.f32.vlgmr.msra.gmra.mrb[6].mxu1 %vm193_vm2, %v14456_v8 }
 0x114   : > { %13047 = vmatpush3.msk.msra.mxu1 %vm198_vm0, %v12046_v11  ;;  %13003 = vmatprep.mubr.msk.f32.mxu0 %vm193_vm2, %v14410_v63 }
 0x115   : > { %13006 = vmatprep.subr.msk.mxu0 %vm198_vm0, %v12007_v12  ;;  %13048 = vmatprep.mubr.msk.f32.mxu1 %vm193_vm2, %v14486_v13 }
 0x116   : > { %13051 = vmatprep.subr.msk.mxu1 %vm198_vm0, %v12050_v14 }
 0x11a   : > { %13004 = vmatmul.mubr.msk.f32.vlgmr.msra.gmra.mrb[6].mxu0 %vm193_vm2, %v14425_v1 }
 0x11b   : > { %13007 = vmatpush3.msk.msra.mxu0 %vm198_vm0, %v12007_v12  ;;  %13049 = vmatmul.mubr.msk.f32.vlgmr.msra.gmra.mrb[6].mxu1 %vm193_vm2, %v14501_v15 }
 0x11c   : > { %13052 = vmatpush3.msk.msra.mxu1 %vm198_vm0, %v12050_v14  ;;  %13008 = vmatprep.mubr.msk.f32.mxu0 %vm193_vm2, %v14439_v5 }
 0x11d   : > { %13011 = vmatprep.subr.msk.mxu0 %vm198_vm0, %v12011_v18  ;;  %13053 = vmatprep.mubr.msk.f32.mxu1 %vm193_vm2, %v14515_v19 }
 0x11e   : > { %13056 = vmatprep.subr.msk.mxu1 %vm198_vm0, %v12054_v20 }
 0x122   : > { %13009 = vmatmul.mubr.msk.f32.vlgmr.msra.gmra.mrb[6].mxu0 %vm193_vm2, %v14430_v3 }
 0x123   : > { %13012 = vmatpush3.msk.msra.mxu0 %vm198_vm0, %v12011_v18  ;;  %13054 = vmatmul.mubr.msk.f32.vlgmr.msra.gmra.mrb[6].mxu1 %vm193_vm2, %v14506_v17 }
 0x124   : > { %13057 = vmatpush3.msk.msra.mxu1 %vm198_vm0, %v12054_v20  ;;  %13013 = vmatprep.mubr.msk.f32.mxu0 %vm193_vm2, %v14465_v10 }
 0x125   : > { %13058 = vmatprep.mubr.msk.f32.mxu1 %vm193_vm2, %v14538_v23  ;;  %13061 = vmatprep.subr.msk.mxu0 %vm198_vm0, %v12062_v24 }
 0x126   : > { %13106 = vmatprep.subr.msk.mxu1 %vm198_vm0, %v12105_v25 }
 0x12a   : > { %13014 = vmatmul.mubr.msk.f32.vlgmr.msra.gmra.mrb[6].mxu0 %vm193_vm2, %v14456_v8 }
 0x12b   : > { %13059 = vmatmul.mubr.msk.f32.vlgmr.msra.gmra.mrb[6].mxu1 %vm193_vm2, %v14532_v22  ;;  %13062 = vmatpush3.msk.msra.mxu0 %vm198_vm0, %v12062_v24 }
 0x12c   : > { %13107 = vmatpush3.msk.msra.mxu1 %vm198_vm0, %v12105_v25  ;;  %13063 = vmatprep.mubr.msk.f32.mxu0 %vm193_vm2, %v14439_v5 }
 0x12d   : > { %13066 = vmatprep.subr.msk.mxu0 %vm198_vm0, %v6716_v26  ;;  %13108 = vmatprep.mubr.msk.f32.mxu1 %vm193_vm2, %v14515_v19 }
 0x12e   : > { %13064 = vmatmul.mubr.msk.f32.vlgmr.msra.gmra.mrb[8].mxu0 %vm193_vm2, %v14430_v3  ;;  %13111 = vmatprep.subr.msk.mxu1 %vm198_vm0, %v7531_v27  ;;  %v14630_v3 = vld [vmem:[%s13754_s9 + $0xa0] sm:$0xff] }
 0x12f   : > { %13067 = vmatpush3.msk.msra.mxu0 %vm198_vm0, %v6716_v26  ;;  %13109 = vmatmul.mubr.msk.f32.vlgmr.msra.gmra.mrb[8].mxu1 %vm193_vm2, %v14506_v17  ;;  %v7880_v14 = vrot.slane %v14630_v3, 1  ;;  %v12132_v26 = vld [vmem:[%s15244_s1 + $0x18] sm:$0xf] }
 0x130   : > { %13112 = vmatpush3.msk.msra.mxu1 %vm198_vm0, %v7531_v27  ;;  %13068 = vmatprep.mubr.msk.f32.mxu0 %vm193_vm2, %v14410_v63  ;;  %v14710_v27 = vld [vmem:[%s13754_s9 + $0xb0] sm:$0xff] }
 0x131   : > { %v12745_v30 = vpop.f32.mrb[0].mxu0  ;;  %13071 = vmatprep.subr.msk.mxu0 %vm198_vm0, %v12069_v28  ;;  %13113 = vmatprep.mubr.msk.f32.mxu1 %vm193_vm2, %v14486_v13 }
 0x132   : > { %988 = vst [vmem:[%s14586_s20 + $0x8] sm:$0x3f] %v12745_v30  ;;  %v989_v31 = vsel %vm361_vm3, %v12745_v30, 0.0  ;;  %v999_v32 = vmul.f32 %v12745_v30, %v12745_v30  ;;  %v12790_v33 = vpop.f32.mrb[0].mxu1  ;;  %v976_v34 = vpop.f32.mrb[1].mxu0  ;;  %13116 = vmatprep.subr.msk.mxu1 %vm198_vm0, %v12112_v29 }
 0x133   : > { %11801 = vst [vmem:[%s14586_s20 + $0x18] sm:$0x3f] %v12790_v33  ;;  %v1804_v35 = vsel %vm361_vm3, %v12790_v33, 0.0  ;;  %v1814_v36 = vmul.f32 %v12790_v33, %v12790_v33  ;;  %987 = vst [vmem:[%s14586_s20] sm:$0xff] %v976_v34  ;;  %v990_v37 = vadd.f32 %v989_v31, %v976_v34  ;;  %v998_v38 = vmul.f32 %v976_v34, %v976_v34  ;;  %v1790_v39 = vpop.f32.mrb[1].mxu1  ;;  %v12097_v30 = vld [vmem:[%s15244_s1 + $0x20] sm:$0xf] }
 0x134   : > { %v1000_v40 = vsel %vm361_vm3, %v999_v32, 0.0  ;;  %11800 = vst [vmem:[%s14586_s20 + $0x10] sm:$0xff] %v1790_v39  ;;  %v1805_v41 = vadd.f32 %v1804_v35, %v1790_v39  ;;  %v1813_v42 = vmul.f32 %v1790_v39, %v1790_v39  ;;  %v12140_v32 = vld [vmem:[%s15244_s1 + $0x20] sm:$0xf]  ;;  %v8234_v33 = vrot.slane %v14710_v27, 2 }
 0x135   : > { %v1815_v43 = vsel %vm361_vm3, %v1814_v36, 0.0  ;;  %v991_v44 = vrot.slane %v990_v37, 4  ;;  %v1001_v45 = vadd.f32 %v1000_v40, %v998_v38  ;;  %v12148_v36 = vld [vmem:[%s15244_s1 + $0x4] sm:$0xf]  ;;  %v8346_v38 = vld [vmem:[%s15244_s1] sm:$0xf] }
 0x136   : > { %v1806_v46 = vrot.slane %v1805_v41, 4  ;;  %v1816_v47 = vadd.f32 %v1815_v43, %v1813_v42  ;;  %13069 = vmatmul.mubr.msk.f32.vlgmr.msra.gmra.mrb[8].mxu0 %vm193_vm2, %v14425_v1  ;;  %v9161_v39 = vld [vmem:[%s15244_s1] sm:$0xf]  ;;  %v12155_v40 = vld [vmem:[%s15244_s1 + $0x8] sm:$0xf] }
 0x137   : > { %v992_v49 = vadd.f32 %v991_v44, %v990_v37  ;;  %v1002_v50 = vrot.slane %v1001_v45, 4  ;;  %13072 = vmatpush3.msk.msra.mxu0 %vm198_vm0, %v12069_v28  ;;  %13114 = vmatmul.mubr.msk.f32.vlgmr.msra.gmra.mrb[8].mxu1 %vm193_vm2, %v14501_v15  ;;  %v8146_v28 = vrot.slane %v14710_v27, 1  ;;  %v12191_v37 = vld [vmem:[%s15244_s1 + $0x4] sm:$0xf] }
 0x138   : > { %v1807_v52 = vadd.f32 %v1806_v46, %v1805_v41  ;;  %v1817_v53 = vrot.slane %v1816_v47, 4  ;;  %13117 = vmatpush3.msk.msra.mxu1 %vm198_vm0, %v12112_v29  ;;  %13073 = vmatprep.mubr.msk.f32.mxu0 %vm193_vm2, %v14465_v10  ;;  %v14645_v10 = vld [vmem:[%s13754_s9 + $0xa8] sm:$0xff] }
 0x139   : > { %v993_v54 = vrot.slane %v992_v49, 2  ;;  %v1003_v55 = vadd.f32 %v1002_v50, %v1001_v45  ;;  %13076 = vmatprep.subr.msk.mxu0 %vm198_vm0, %v12075_v48  ;;  %13118 = vmatprep.mubr.msk.f32.mxu1 %vm193_vm2, %v14538_v23  ;;  %v14652_v16 = vrot.slane %v14645_v10, 1  ;;  %v14680_v24 = vrot.slane %v14645_v10, 2  ;;  %v12198_v41 = vld [vmem:[%s15244_s1 + $0x8] sm:$0xf] }
 0x13a   : > { %v1808_v56 = vrot.slane %v1807_v52, 2  ;;  %v1818_v57 = vadd.f32 %v1817_v53, %v1816_v47  ;;  %13121 = vmatprep.subr.msk.mxu1 %vm198_vm0, %v12118_v51 }
 0x13b   : > { %v994_v58 = vadd.f32 %v993_v54, %v992_v49  ;;  %v1004_v59 = vrot.slane %v1003_v55, 2  ;;  %v14663_v20 = vsel %vm189_vm1, %v7880_v14, %v14652_v16 }
 0x13c   : > { %v1809_v60 = vadd.f32 %v1808_v56, %v1807_v52  ;;  %v1819_v61 = vrot.slane %v1818_v57, 2 }
 0x13d   : > { %v995_v62 = vrot.slane %v994_v58, 1  ;;  %v1005_v63 = vadd.f32 %v1004_v59, %v1003_v55 }
 0x13e   : > { %v1810_v0 = vrot.slane %v1809_v60, 1  ;;  %v1820_v1 = vadd.f32 %v1819_v61, %v1818_v57  ;;  %13074 = vmatmul.mubr.msk.f32.vlgmr.msra.gmra.mrb[8].mxu0 %vm193_vm2, %v14456_v8 }
 0x13f   : > { %v996_v4 = vadd.f32 %v995_v62, %v994_v58  ;;  %v1006_v5 = vrot.slane %v1005_v63, 1  ;;  %13077 = vmatpush3.msk.msra.mxu0 %vm198_vm0, %v12075_v48  ;;  %13119 = vmatmul.mubr.msk.f32.vlgmr.msra.gmra.mrb[8].mxu1 %vm193_vm2, %v14532_v22 }
 0x140   : > { %v1811_v7 = vadd.f32 %v1810_v0, %v1809_v60  ;;  %v1821_v9 = vrot.slane %v1820_v1, 1  ;;  %13122 = vmatpush3.msk.msra.mxu1 %vm198_vm0, %v12118_v51  ;;  %13078 = vmatprep.mubr.msk.f32.mxu0 %vm193_vm2, %v14486_v13  ;;  %v12083_v13 = vld [vmem:[%s15244_s1 + $0x14] sm:$0xf]  ;;  %v12161_v60 = vld [vmem:[%s15244_s1 + $0xc] sm:$0xf] }
 0x141   : > { %v1007_v8 = vadd.f32 %v1006_v5, %v1005_v63  ;;  %13081 = vmatprep.subr.msk.mxu0 %vm198_vm0, %v12079_v2  ;;  %13123 = vmatprep.mubr.msk.f32.mxu1 %vm193_vm2, %v14630_v3  ;;  %v12204_v63 = vld [vmem:[%s15244_s1 + $0xc] sm:$0xf] }
 0x142   : > { %v14647_v11 = vadd.f32 %v1811_v7, %v996_v4  ;;  %v1822_v12 = vadd.f32 %v1821_v9, %v1820_v1  ;;  %13126 = vmatprep.subr.msk.mxu1 %vm198_vm0, %v12122_v6 }
 0x144   : > { %v14654_v18 = vadd.f32 %v1822_v12, %v1007_v8 }
 0x146   : > { %13079 = vmatmul.mubr.msk.f32.vlgmr.msra.gmra.mrb[8].mxu0 %vm193_vm2, %v14501_v15  ;;  %v7968_v15 = vrot.slane %v14630_v3, 2 }
 0x147   : > { %13082 = vmatpush3.msk.msra.mxu0 %vm198_vm0, %v12079_v2  ;;  %13124 = vmatmul.mubr.msk.f32.vlgmr.msra.gmra.mrb[8].mxu1 %vm193_vm2, %v14645_v10 }
 0x148   : > { %13127 = vmatpush3.msk.msra.mxu1 %vm198_vm0, %v12122_v6  ;;  %13083 = vmatprep.mubr.msk.f32.mxu0 %vm193_vm2, %v14515_v19  ;;  %v12089_v19 = vld [vmem:[%s15244_s1 + $0x18] sm:$0xf]  ;;  %v14689_v25 = vsel %vm361_vm3, %v7968_v15, %v14680_v24 }
 0x149   : > { %13086 = vmatprep.subr.msk.mxu0 %vm198_vm0, %v12083_v13  ;;  %13128 = vmatprep.mubr.msk.f32.mxu1 %vm193_vm2, %v14663_v20 }
 0x14a   : > { %13131 = vmatprep.subr.msk.mxu1 %vm198_vm0, %v12126_v21 }
 0x14e   : > { %13084 = vmatmul.mubr.msk.f32.vlgmr.msra.gmra.mrb[8].mxu0 %vm193_vm2, %v14506_v17  ;;  %v12093_v17 = vld [vmem:[%s15244_s1 + $0x1c] sm:$0xf] }
 0x14f   : > { %13087 = vmatpush3.msk.msra.mxu0 %vm198_vm0, %v12083_v13  ;;  %13129 = vmatmul.mubr.msk.f32.vlgmr.msra.gmra.mrb[8].mxu1 %vm193_vm2, %v14652_v16  ;;  %v12165_v13 = vld [vmem:[%s15244_s1 + $0x10] sm:$0xf] }
 0x150   : > { %13132 = vmatpush3.msk.msra.mxu1 %vm198_vm0, %v12126_v21  ;;  %13088 = vmatprep.mubr.msk.f32.mxu0 %vm193_vm2, %v14538_v23  ;;  %v12136_v23 = vld [vmem:[%s15244_s1 + $0x1c] sm:$0xf] }
 0x151   : > { %13091 = vmatprep.subr.msk.mxu0 %vm198_vm0, %v12089_v19  ;;  %13133 = vmatprep.mubr.msk.f32.mxu1 %vm193_vm2, %v14689_v25 }
 0x152   : > { %13136 = vmatprep.subr.msk.mxu1 %vm198_vm0, %v12132_v26 }
 0x156   : > { %13089 = vmatmul.mubr.msk.f32.vlgmr.msra.gmra.mrb[8].mxu0 %vm193_vm2, %v14532_v22  ;;  %v14725_v22 = vld [vmem:[%s13754_s9 + $0xb8] sm:$0xff] }
 0x157   : > { %13092 = vmatpush3.msk.msra.mxu0 %vm198_vm0, %v12089_v19  ;;  %13134 = vmatmul.mubr.msk.f32.vlgmr.msra.gmra.mrb[8].mxu1 %vm193_vm2, %v14680_v24  ;;  %v14730_v29 = vrot.slane %v14725_v22, 1  ;;  %v14756_v34 = vrot.slane %v14725_v22, 2  ;;  %v12208_v19 = vld [vmem:[%s15244_s1 + $0x10] sm:$0xf] }
 0x158   : > { %13137 = vmatpush3.msk.msra.mxu1 %vm198_vm0, %v12132_v26  ;;  %13093 = vmatprep.mubr.msk.f32.mxu0 %vm193_vm2, %v14630_v3 }
 0x159   : > { %13096 = vmatprep.subr.msk.mxu0 %vm198_vm0, %v12093_v17  ;;  %13138 = vmatprep.mubr.msk.f32.mxu1 %vm193_vm2, %v14710_v27  ;;  %v14739_v31 = vsel %vm189_vm1, %v8146_v28, %v14730_v29  ;;  %v14762_v35 = vsel %vm361_vm3, %v8234_v33, %v14756_v34 }
 0x15a   : > { %13141 = vmatprep.subr.msk.mxu1 %vm198_vm0, %v12136_v23 }
 0x15e   : > { %13094 = vmatmul.mubr.msk.f32.vlgmr.msra.gmra.mrb[8].mxu0 %vm193_vm2, %v14645_v10 }
 0x15f   : > { %13097 = vmatpush3.msk.msra.mxu0 %vm198_vm0, %v12093_v17  ;;  %13139 = vmatmul.mubr.msk.f32.vlgmr.msra.gmra.mrb[8].mxu1 %vm193_vm2, %v14725_v22 }
 0x160   : > { %13142 = vmatpush3.msk.msra.mxu1 %vm198_vm0, %v12136_v23  ;;  %13098 = vmatprep.mubr.msk.f32.mxu0 %vm193_vm2, %v14663_v20  ;;  %v14864_v23 = vld [vmem:[%s13754_s9 + $0xc8] sm:$0xff] }
 0x161   : > { %13101 = vmatprep.subr.msk.mxu0 %vm198_vm0, %v12097_v30  ;;  %13143 = vmatprep.mubr.msk.f32.mxu1 %vm193_vm2, %v14739_v31 }
 0x162   : > { %13146 = vmatprep.subr.msk.mxu1 %vm198_vm0, %v12140_v32 }
 0x166   : > { %13099 = vmatmul.mubr.msk.f32.vlgmr.msra.gmra.mrb[8].mxu0 %vm193_vm2, %v14652_v16 }
 0x167   : > { %13102 = vmatpush3.msk.msra.mxu0 %vm198_vm0, %v12097_v30  ;;  %13144 = vmatmul.mubr.msk.f32.vlgmr.msra.gmra.mrb[8].mxu1 %vm193_vm2, %v14730_v29  ;;  %v14869_v30 = vrot.slane %v14864_v23, 1 }
 0x168   : > { %13147 = vmatpush3.msk.msra.mxu1 %vm198_vm0, %v12140_v32  ;;  %13103 = vmatprep.mubr.msk.f32.mxu0 %vm193_vm2, %v14689_v25 }
 0x169   : > { %13148 = vmatprep.mubr.msk.f32.mxu1 %vm193_vm2, %v14762_v35  ;;  %13151 = vmatprep.subr.msk.mxu0 %vm198_vm0, %v12148_v36 }
 0x16a   : > { %13196 = vmatprep.subr.msk.mxu1 %vm198_vm0, %v12191_v37 }
 0x16e   : > { %13104 = vmatmul.mubr.msk.f32.vlgmr.msra.gmra.mrb[8].mxu0 %vm193_vm2, %v14680_v24 }
 0x16f   : > { %13149 = vmatmul.mubr.msk.f32.vlgmr.msra.gmra.mrb[8].mxu1 %vm193_vm2, %v14756_v34  ;;  %13152 = vmatpush3.msk.msra.mxu0 %vm198_vm0, %v12148_v36  ;;  %v12169_v36 = vld [vmem:[%s15244_s1 + $0x14] sm:$0xf] }
 0x170   : > { %13197 = vmatpush3.msk.msra.mxu1 %vm198_vm0, %v12191_v37  ;;  %13153 = vmatprep.mubr.msk.f32.mxu0 %vm193_vm2, %v14663_v20  ;;  %v14848_v20 = vld [vmem:[%s13754_s9 + $0xc0] sm:$0xff] }
 0x171   : > { %13156 = vmatprep.subr.msk.mxu0 %vm198_vm0, %v8346_v38  ;;  %13198 = vmatprep.mubr.msk.f32.mxu1 %vm193_vm2, %v14739_v31  ;;  %v9510_v28 = vrot.slane %v14848_v20, 1 }
 0x172   : > { %13154 = vmatmul.mubr.msk.f32.vlgmr.msra.gmra.mrb[10].mxu0 %vm193_vm2, %v14652_v16  ;;  %13201 = vmatprep.subr.msk.mxu1 %vm198_vm0, %v9161_v39 }
 0x173   : > { %13157 = vmatpush3.msk.msra.mxu0 %vm198_vm0, %v8346_v38  ;;  %13199 = vmatmul.mubr.msk.f32.vlgmr.msra.gmra.mrb[10].mxu1 %vm193_vm2, %v14730_v29  ;;  %v14883_v37 = vsel %vm189_vm1, %v9510_v28, %v14869_v30  ;;  %v14900_v38 = vrot.slane %v14864_v23, 2 }
 0x174   : > { %13202 = vmatpush3.msk.msra.mxu1 %vm198_vm0, %v9161_v39  ;;  %13158 = vmatprep.mubr.msk.f32.mxu0 %vm193_vm2, %v14630_v3 }
 0x175   : > { %v12835_v42 = vpop.f32.mrb[2].mxu0  ;;  %13161 = vmatprep.subr.msk.mxu0 %vm198_vm0, %v12155_v40  ;;  %13203 = vmatprep.mubr.msk.f32.mxu1 %vm193_vm2, %v14710_v27 }
 0x176   : > { %11844 = vst [vmem:[%s14586_s20 + $0x28] sm:$0x3f] %v12835_v42  ;;  %v2619_v43 = vsel %vm361_vm3, %v12835_v42, 0.0  ;;  %v2629_v44 = vmul.f32 %v12835_v42, %v12835_v42  ;;  %v12880_v45 = vpop.f32.mrb[2].mxu1  ;;  %v2605_v46 = vpop.f32.mrb[3].mxu0  ;;  %13206 = vmatprep.subr.msk.mxu1 %vm198_vm0, %v12198_v41 }
 0x177   : > { %11887 = vst [vmem:[%s14586_s20 + $0x38] sm:$0x3f] %v12880_v45  ;;  %v3434_v47 = vsel %vm361_vm3, %v12880_v45, 0.0  ;;  %v3444_v48 = vmul.f32 %v12880_v45, %v12880_v45  ;;  %11843 = vst [vmem:[%s14586_s20 + $0x20] sm:$0xff] %v2605_v46  ;;  %v2620_v49 = vadd.f32 %v2619_v43, %v2605_v46  ;;  %v2628_v50 = vmul.f32 %v2605_v46, %v2605_v46  ;;  %v3420_v51 = vpop.f32.mrb[3].mxu1 }
 0x178   : > { %v2630_v52 = vsel %vm361_vm3, %v2629_v44, 0.0  ;;  %11886 = vst [vmem:[%s14586_s20 + $0x30] sm:$0xff] %v3420_v51  ;;  %v3435_v53 = vadd.f32 %v3434_v47, %v3420_v51  ;;  %v3443_v54 = vmul.f32 %v3420_v51, %v3420_v51  ;;  %v12183_v44 = vld [vmem:[%s15244_s1 + $0x20] sm:$0xf]  ;;  %v12277_v51 = vld [vmem:[%s15244_s1 + $0x4] sm:$0xf] }
 0x179   : > { %v3445_v55 = vsel %vm361_vm3, %v3444_v48, 0.0  ;;  %v2621_v56 = vrot.slane %v2620_v49, 4  ;;  %v2631_v57 = vadd.f32 %v2630_v52, %v2628_v50  ;;  %v12226_v46 = vld [vmem:[%s15244_s1 + $0x20] sm:$0xf]  ;;  %v12234_v50 = vld [vmem:[%s15244_s1 + $0x4] sm:$0xf] }
 0x17a   : > { %v3436_v58 = vrot.slane %v3435_v53, 4  ;;  %v3446_v59 = vadd.f32 %v3445_v55, %v3443_v54  ;;  %13159 = vmatmul.mubr.msk.f32.vlgmr.msra.gmra.mrb[10].mxu0 %vm193_vm2, %v14645_v10  ;;  %v9976_v52 = vld [vmem:[%s15244_s1] sm:$0xf]  ;;  %v12241_v54 = vld [vmem:[%s15244_s1 + $0x8] sm:$0xf] }
 0x17b   : > { %v2622_v61 = vadd.f32 %v2621_v56, %v2620_v49  ;;  %v2632_v62 = vrot.slane %v2631_v57, 4  ;;  %13162 = vmatpush3.msk.msra.mxu0 %vm198_vm0, %v12155_v40  ;;  %13204 = vmatmul.mubr.msk.f32.vlgmr.msra.gmra.mrb[10].mxu1 %vm193_vm2, %v14725_v22  ;;  %v12218_v40 = vld [vmem:[%s15244_s1 + $0x18] sm:$0xf]  ;;  %v12284_v55 = vld [vmem:[%s15244_s1 + $0x8] sm:$0xf] }
 0x17c   : > { %v3437_v0 = vadd.f32 %v3436_v58, %v3435_v53  ;;  %v3447_v1 = vrot.slane %v3446_v59, 4  ;;  %13207 = vmatpush3.msk.msra.mxu1 %vm198_vm0, %v12198_v41  ;;  %13163 = vmatprep.mubr.msk.f32.mxu0 %vm193_vm2, %v14689_v25  ;;  %v14930_v41 = vld [vmem:[%s13754_s9 + $0xd0] sm:$0xff]  ;;  %v10791_v53 = vld [vmem:[%s15244_s1] sm:$0xf] }
 0x17d   : > { %v2623_v2 = vrot.slane %v2622_v61, 2  ;;  %v2633_v3 = vadd.f32 %v2632_v62, %v2631_v57  ;;  %13166 = vmatprep.subr.msk.mxu0 %vm198_vm0, %v12161_v60  ;;  %13208 = vmatprep.mubr.msk.f32.mxu1 %vm193_vm2, %v14762_v35  ;;  %v9776_v42 = vrot.slane %v14930_v41, 1  ;;  %v9864_v47 = vrot.slane %v14930_v41, 2 }
 0x17e   : > { %v3438_v4 = vrot.slane %v3437_v0, 2  ;;  %v3448_v5 = vadd.f32 %v3447_v1, %v3446_v59  ;;  %13211 = vmatprep.subr.msk.mxu1 %vm198_vm0, %v12204_v63 }
 0x17f   : > { %v2624_v6 = vadd.f32 %v2623_v2, %v2622_v61  ;;  %v2634_v7 = vrot.slane %v2633_v3, 2 }
 0x180   : > { %v3439_v9 = vadd.f32 %v3438_v4, %v3437_v0  ;;  %v3449_v8 = vrot.slane %v3448_v5, 2 }
 0x181   : > { %v2625_v10 = vrot.slane %v2624_v6, 1  ;;  %v2635_v12 = vadd.f32 %v2634_v7, %v2633_v3 }
 0x182   : > { %v3440_v14 = vrot.slane %v3439_v9, 1  ;;  %v3450_v16 = vadd.f32 %v3449_v8, %v3448_v5  ;;  %13164 = vmatmul.mubr.msk.f32.vlgmr.msra.gmra.mrb[10].mxu0 %vm193_vm2, %v14680_v24 }
 0x183   : > { %v2626_v21 = vadd.f32 %v2625_v10, %v2624_v6  ;;  %v2636_v15 = vrot.slane %v2635_v12, 1  ;;  %13167 = vmatpush3.msk.msra.mxu0 %vm198_vm0, %v12161_v60  ;;  %13209 = vmatmul.mubr.msk.f32.vlgmr.msra.gmra.mrb[10].mxu1 %vm193_vm2, %v14756_v34  ;;  %v12247_v10 = vld [vmem:[%s15244_s1 + $0xc] sm:$0xf] }
 0x184   : > { %v3451_v25 = vrot.slane %v3450_v16, 1  ;;  %13212 = vmatpush3.msk.msra.mxu1 %vm198_vm0, %v12204_v63  ;;  %13168 = vmatprep.mubr.msk.f32.mxu0 %vm193_vm2, %v14710_v27  ;;  %v3441_v17 = vadd.f32 %v3440_v14, %v3439_v9 }
 0x185   : > { %v2627_v24 = vadd.f32 %v2626_v21, %v14647_v11  ;;  %v2637_v26 = vadd.f32 %v2636_v15, %v2635_v12  ;;  %13171 = vmatprep.subr.msk.mxu0 %vm198_vm0, %v12165_v13  ;;  %13213 = vmatprep.mubr.msk.f32.mxu1 %vm193_vm2, %v14848_v20 }
 0x186   : > { %13216 = vmatprep.subr.msk.mxu1 %vm198_vm0, %v12208_v19  ;;  %v3452_v11 = vadd.f32 %v3451_v25, %v3450_v16  ;;  %v12290_v16 = vld [vmem:[%s15244_s1 + $0xc] sm:$0xf] }
 0x187   : > { %v2638_v27 = vadd.f32 %v2637_v26, %v14654_v18  ;;  %v14872_v32 = vadd.f32 %v3441_v17, %v2627_v24  ;;  %v12212_v18 = vld [vmem:[%s15244_s1 + $0x14] sm:$0xf] }
 0x189   : > { %v14874_v33 = vadd.f32 %v3452_v11, %v2638_v27 }
 0x18a   : > { %13169 = vmatmul.mubr.msk.f32.vlgmr.msra.gmra.mrb[10].mxu0 %vm193_vm2, %v14725_v22  ;;  %v9598_v22 = vrot.slane %v14848_v20, 2 }
 0x18b   : > { %13172 = vmatpush3.msk.msra.mxu0 %vm198_vm0, %v12165_v13  ;;  %13214 = vmatmul.mubr.msk.f32.vlgmr.msra.gmra.mrb[10].mxu1 %vm193_vm2, %v14864_v23 }
 0x18c   : > { %13217 = vmatpush3.msk.msra.mxu1 %vm198_vm0, %v12208_v19  ;;  %13173 = vmatprep.mubr.msk.f32.mxu0 %vm193_vm2, %v14739_v31  ;;  %v12175_v31 = vld [vmem:[%s15244_s1 + $0x18] sm:$0xf]  ;;  %v14909_v39 = vsel %vm361_vm3, %v9598_v22, %v14900_v38 }
 0x18d   : > { %13176 = vmatprep.subr.msk.mxu0 %vm198_vm0, %v12169_v36  ;;  %13218 = vmatprep.mubr.msk.f32.mxu1 %vm193_vm2, %v14883_v37 }
 0x18e   : > { %13221 = vmatprep.subr.msk.mxu1 %vm198_vm0, %v12212_v18 }
 0x192   : > { %13174 = vmatmul.mubr.msk.f32.vlgmr.msra.gmra.mrb[10].mxu0 %vm193_vm2, %v14730_v29  ;;  %v12179_v29 = vld [vmem:[%s15244_s1 + $0x1c] sm:$0xf] }
 0x193   : > { %13177 = vmatpush3.msk.msra.mxu0 %vm198_vm0, %v12169_v36  ;;  %13219 = vmatmul.mubr.msk.f32.vlgmr.msra.gmra.mrb[10].mxu1 %vm193_vm2, %v14869_v30  ;;  %v12251_v36 = vld [vmem:[%s15244_s1 + $0x10] sm:$0xf] }
 0x194   : > { %13222 = vmatpush3.msk.msra.mxu1 %vm198_vm0, %v12212_v18  ;;  %13178 = vmatprep.mubr.msk.f32.mxu0 %vm193_vm2, %v14762_v35  ;;  %v12222_v35 = vld [vmem:[%s15244_s1 + $0x1c] sm:$0xf] }
 0x195   : > { %13181 = vmatprep.subr.msk.mxu0 %vm198_vm0, %v12175_v31  ;;  %13223 = vmatprep.mubr.msk.f32.mxu1 %vm193_vm2, %v14909_v39 }
 0x196   : > { %13226 = vmatprep.subr.msk.mxu1 %vm198_vm0, %v12218_v40 }
 0x19a   : > { %13179 = vmatmul.mubr.msk.f32.vlgmr.msra.gmra.mrb[10].mxu0 %vm193_vm2, %v14756_v34  ;;  %v14945_v34 = vld [vmem:[%s13754_s9 + $0xd8] sm:$0xff] }
 0x19b   : > { %13182 = vmatpush3.msk.msra.mxu0 %vm198_vm0, %v12175_v31  ;;  %13224 = vmatmul.mubr.msk.f32.vlgmr.msra.gmra.mrb[10].mxu1 %vm193_vm2, %v14900_v38  ;;  %v14950_v43 = vrot.slane %v14945_v34, 1  ;;  %v14976_v48 = vrot.slane %v14945_v34, 2  ;;  %v12294_v31 = vld [vmem:[%s15244_s1 + $0x10] sm:$0xf] }
 0x19c   : > { %13227 = vmatpush3.msk.msra.mxu1 %vm198_vm0, %v12218_v40  ;;  %13183 = vmatprep.mubr.msk.f32.mxu0 %vm193_vm2, %v14848_v20 }
 0x19d   : > { %13186 = vmatprep.subr.msk.mxu0 %vm198_vm0, %v12179_v29  ;;  %13228 = vmatprep.mubr.msk.f32.mxu1 %vm193_vm2, %v14930_v41  ;;  %v14959_v45 = vsel %vm189_vm1, %v9776_v42, %v14950_v43  ;;  %v14982_v49 = vsel %vm361_vm3, %v9864_v47, %v14976_v48 }
 0x19e   : > { %13231 = vmatprep.subr.msk.mxu1 %vm198_vm0, %v12222_v35 }
 0x1a2   : > { %13184 = vmatmul.mubr.msk.f32.vlgmr.msra.gmra.mrb[10].mxu0 %vm193_vm2, %v14864_v23 }
 0x1a3   : > { %13187 = vmatpush3.msk.msra.mxu0 %vm198_vm0, %v12179_v29  ;;  %13229 = vmatmul.mubr.msk.f32.vlgmr.msra.gmra.mrb[10].mxu1 %vm193_vm2, %v14945_v34 }
 0x1a4   : > { %13232 = vmatpush3.msk.msra.mxu1 %vm198_vm0, %v12222_v35  ;;  %13188 = vmatprep.mubr.msk.f32.mxu0 %vm193_vm2, %v14883_v37  ;;  %v12289_v35 = vld [vmem:[%s13754_s9 + $0xe8] sm:$0xff] }
 0x1a5   : > { %13191 = vmatprep.subr.msk.mxu0 %vm198_vm0, %v12183_v44  ;;  %13233 = vmatprep.mubr.msk.f32.mxu1 %vm193_vm2, %v14959_v45 }
 0x1a6   : > { %13236 = vmatprep.subr.msk.mxu1 %vm198_vm0, %v12226_v46 }
 0x1aa   : > { %13189 = vmatmul.mubr.msk.f32.vlgmr.msra.gmra.mrb[10].mxu0 %vm193_vm2, %v14869_v30 }
 0x1ab   : > { %13192 = vmatpush3.msk.msra.mxu0 %vm198_vm0, %v12183_v44  ;;  %13234 = vmatmul.mubr.msk.f32.vlgmr.msra.gmra.mrb[10].mxu1 %vm193_vm2, %v14950_v43  ;;  %v11141_v44 = vrot.slane %v12289_v35, 1 }
 0x1ac   : > { %13237 = vmatpush3.msk.msra.mxu1 %vm198_vm0, %v12226_v46  ;;  %13193 = vmatprep.mubr.msk.f32.mxu0 %vm193_vm2, %v14909_v39 }
 0x1ad   : > { %13238 = vmatprep.mubr.msk.f32.mxu1 %vm193_vm2, %v14982_v49  ;;  %13241 = vmatprep.subr.msk.mxu0 %vm198_vm0, %v12234_v50 }
 0x1ae   : > { %13286 = vmatprep.subr.msk.mxu1 %vm198_vm0, %v12277_v51 }
 0x1b2   : > { %13194 = vmatmul.mubr.msk.f32.vlgmr.msra.gmra.mrb[10].mxu0 %vm193_vm2, %v14900_v38 }
 0x1b3   : > { %13239 = vmatmul.mubr.msk.f32.vlgmr.msra.gmra.mrb[10].mxu1 %vm193_vm2, %v14976_v48  ;;  %13242 = vmatpush3.msk.msra.mxu0 %vm198_vm0, %v12234_v50 }
 0x1b4   : > { %13287 = vmatpush3.msk.msra.mxu1 %vm198_vm0, %v12277_v51  ;;  %13243 = vmatprep.mubr.msk.f32.mxu0 %vm193_vm2, %v14883_v37  ;;  %v12288_v37 = vld [vmem:[%s13754_s9 + $0xe0] sm:$0xff] }
 0x1b5   : > { %13246 = vmatprep.subr.msk.mxu0 %vm198_vm0, %v9976_v52  ;;  %13288 = vmatprep.mubr.msk.f32.mxu1 %vm193_vm2, %v14959_v45  ;;  %v11140_v42 = vrot.slane %v12288_v37, 1 }
 0x1b6   : > { %13244 = vmatmul.mubr.msk.f32.vlgmr.msra.gmra.mrb[12].mxu0 %vm193_vm2, %v14869_v30  ;;  %13291 = vmatprep.subr.msk.mxu1 %vm198_vm0, %v10791_v53 }
 0x1b7   : > { %13247 = vmatpush3.msk.msra.mxu0 %vm198_vm0, %v9976_v52  ;;  %13289 = vmatmul.mubr.msk.f32.vlgmr.msra.gmra.mrb[12].mxu1 %vm193_vm2, %v14950_v43  ;;  %v11229_v52 = vrot.slane %v12289_v35, 2 }
 0x1b8   : > { %13292 = vmatpush3.msk.msra.mxu1 %vm198_vm0, %v10791_v53  ;;  %13248 = vmatprep.mubr.msk.f32.mxu0 %vm193_vm2, %v14848_v20  ;;  %v12261_v53 = vld [vmem:[%s15244_s1 + $0x18] sm:$0xf] }
 0x1b9   : > { %v12925_v56 = vpop.f32.mrb[4].mxu0  ;;  %13251 = vmatprep.subr.msk.mxu0 %vm198_vm0, %v12241_v54  ;;  %13293 = vmatprep.mubr.msk.f32.mxu1 %vm193_vm2, %v14930_v41 }
 0x1ba   : > { %11930 = vst [vmem:[%s14586_s20 + $0x48] sm:$0x3f] %v12925_v56  ;;  %v4249_v57 = vsel %vm361_vm3, %v12925_v56, 0.0  ;;  %v4259_v58 = vmul.f32 %v12925_v56, %v12925_v56  ;;  %v12970_v59 = vpop.f32.mrb[4].mxu1  ;;  %v4235_v60 = vpop.f32.mrb[5].mxu0  ;;  %13296 = vmatprep.subr.msk.mxu1 %vm198_vm0, %v12284_v55 }
 0x1bb   : > { %11973 = vst [vmem:[%s14586_s20 + $0x58] sm:$0x3f] %v12970_v59  ;;  %v5064_v61 = vsel %vm361_vm3, %v12970_v59, 0.0  ;;  %v5074_v62 = vmul.f32 %v12970_v59, %v12970_v59  ;;  %11929 = vst [vmem:[%s14586_s20 + $0x40] sm:$0xff] %v4235_v60  ;;  %v4250_v63 = vadd.f32 %v4249_v57, %v4235_v60  ;;  %v4258_v0 = vmul.f32 %v4235_v60, %v4235_v60  ;;  %v5050_v1 = vpop.f32.mrb[5].mxu1 }
 0x1bc   : > { %v4260_v2 = vsel %vm361_vm3, %v4259_v58, 0.0  ;;  %11972 = vst [vmem:[%s14586_s20 + $0x50] sm:$0xff] %v5050_v1  ;;  %v5065_v3 = vadd.f32 %v5064_v61, %v5050_v1  ;;  %v5073_v4 = vmul.f32 %v5050_v1, %v5050_v1  ;;  %v12269_v58 = vld [vmem:[%s15244_s1 + $0x20] sm:$0xf] }
 0x1bd   : > { %v5075_v5 = vsel %vm361_vm3, %v5074_v62, 0.0  ;;  %v4251_v6 = vrot.slane %v4250_v63, 4  ;;  %v4261_v7 = vadd.f32 %v4260_v2, %v4258_v0  ;;  %v12312_v60 = vld [vmem:[%s15244_s1 + $0x20] sm:$0xf] }
 0x1be   : > { %v5066_v9 = vrot.slane %v5065_v3, 4  ;;  %v5076_v8 = vadd.f32 %v5075_v5, %v5073_v4  ;;  %13249 = vmatmul.mubr.msk.f32.vlgmr.msra.gmra.mrb[12].mxu0 %vm193_vm2, %v14864_v23 }
 0x1bf   : > { %v4252_v12 = vadd.f32 %v4251_v6, %v4250_v63  ;;  %v4262_v14 = vrot.slane %v4261_v7, 4  ;;  %13252 = vmatpush3.msk.msra.mxu0 %vm198_vm0, %v12241_v54  ;;  %13294 = vmatmul.mubr.msk.f32.vlgmr.msra.gmra.mrb[12].mxu1 %vm193_vm2, %v14945_v34 }
 0x1c0   : > { %v5067_v13 = vadd.f32 %v5066_v9, %v5065_v3  ;;  %v5077_v20 = vrot.slane %v5076_v8, 4  ;;  %13297 = vmatpush3.msk.msra.mxu1 %vm198_vm0, %v12284_v55  ;;  %13253 = vmatprep.mubr.msk.f32.mxu0 %vm193_vm2, %v14909_v39  ;;  %v12302_v55 = vld [vmem:[%s13754_s9 + $0xf0] sm:$0xff] }
 0x1c1   : > { %v4253_v21 = vrot.slane %v4252_v12, 2  ;;  %v4263_v15 = vadd.f32 %v4262_v14, %v4261_v7  ;;  %13256 = vmatprep.subr.msk.mxu0 %vm198_vm0, %v12247_v10  ;;  %13298 = vmatprep.mubr.msk.f32.mxu1 %vm193_vm2, %v14982_v49  ;;  %v11406_v56 = vrot.slane %v12302_v55, 1  ;;  %v11494_v61 = vrot.slane %v12302_v55, 2 }
 0x1c2   : > { %v5068_v19 = vrot.slane %v5067_v13, 2  ;;  %v5078_v25 = vadd.f32 %v5077_v20, %v5076_v8  ;;  %13301 = vmatprep.subr.msk.mxu1 %vm198_vm0, %v12290_v16 }
 0x1c3   : > { %v4254_v24 = vadd.f32 %v4253_v21, %v4252_v12  ;;  %v4264_v26 = vrot.slane %v4263_v15, 2 }
 0x1c4   : > { %v5069_v17 = vadd.f32 %v5068_v19, %v5067_v13  ;;  %v5079_v23 = vrot.slane %v5078_v25, 2 }
 0x1c5   : > { %v4255_v28 = vrot.slane %v4254_v24, 1  ;;  %v4265_v30 = vadd.f32 %v4264_v26, %v4263_v15 }
 0x1c6   : > { %v5070_v27 = vrot.slane %v5069_v17, 1  ;;  %v5080_v11 = vadd.f32 %v5079_v23, %v5078_v25  ;;  %13254 = vmatmul.mubr.msk.f32.vlgmr.msra.gmra.mrb[12].mxu0 %vm193_vm2, %v14900_v38 }
 0x1c7   : > { %v4256_v18 = vadd.f32 %v4255_v28, %v4254_v24  ;;  %v4266_v22 = vrot.slane %v4265_v30, 1  ;;  %13257 = vmatpush3.msk.msra.mxu0 %vm198_vm0, %v12247_v10  ;;  %13299 = vmatmul.mubr.msk.f32.vlgmr.msra.gmra.mrb[12].mxu1 %vm193_vm2, %v14976_v48 }
 0x1c8   : > { %v5081_v39 = vrot.slane %v5080_v11, 1  ;;  %13302 = vmatpush3.msk.msra.mxu1 %vm198_vm0, %v12290_v16  ;;  %13258 = vmatprep.mubr.msk.f32.mxu0 %vm193_vm2, %v14930_v41  ;;  %v5071_v29 = vadd.f32 %v5070_v27, %v5069_v17  ;;  %v11142_v41 = vsel %vm189_vm1, %v11140_v42, %v11141_v44 }
 0x1c9   : > { %v4257_v38 = vadd.f32 %v4256_v18, %v14872_v32  ;;  %v4267_v40 = vadd.f32 %v4266_v22, %v4265_v30  ;;  %13261 = vmatprep.subr.msk.mxu0 %vm198_vm0, %v12251_v36  ;;  %13303 = vmatprep.mubr.msk.f32.mxu1 %vm193_vm2, %v12288_v37  ;;  %v12255_v32 = vld [vmem:[%s15244_s1 + $0x14] sm:$0xf] }
 0x1ca   : > { %13306 = vmatprep.subr.msk.mxu1 %vm198_vm0, %v12294_v31  ;;  %v5082_v50 = vadd.f32 %v5081_v39, %v5080_v11 }
 0x1cb   : > { %v4268_v46 = vadd.f32 %v4267_v40, %v14874_v33  ;;  %v15083_v47 = vadd.f32 %v5071_v29, %v4257_v38  ;;  %v12298_v33 = vld [vmem:[%s15244_s1 + $0x14] sm:$0xf] }
 0x1cd   : > { %v15085_v51 = vadd.f32 %v5082_v50, %v4268_v46 }
 0x1ce   : > { %13259 = vmatmul.mubr.msk.f32.vlgmr.msra.gmra.mrb[12].mxu0 %vm193_vm2, %v14945_v34  ;;  %v11228_v34 = vrot.slane %v12288_v37, 2 }
 0x1cf   : > { %13262 = vmatpush3.msk.msra.mxu0 %vm198_vm0, %v12251_v36  ;;  %13304 = vmatmul.mubr.msk.f32.vlgmr.msra.gmra.mrb[12].mxu1 %vm193_vm2, %v12289_v35 }
 0x1d0   : > { %13307 = vmatpush3.msk.msra.mxu1 %vm198_vm0, %v12294_v31  ;;  %13263 = vmatprep.mubr.msk.f32.mxu0 %vm193_vm2, %v14959_v45  ;;  %v11230_v54 = vsel %vm361_vm3, %v11228_v34, %v11229_v52  ;;  %v12304_v45 = vld [vmem:[%s15244_s1 + $0x18] sm:$0xf] }
 0x1d1   : > { %13266 = vmatprep.subr.msk.mxu0 %vm198_vm0, %v12255_v32  ;;  %13308 = vmatprep.mubr.msk.f32.mxu1 %vm193_vm2, %v11142_v41 }
 0x1d2   : > { %13311 = vmatprep.subr.msk.mxu1 %vm198_vm0, %v12298_v33 }
 0x1d6   : > { %13264 = vmatmul.mubr.msk.f32.vlgmr.msra.gmra.mrb[12].mxu0 %vm193_vm2, %v14950_v43  ;;  %v12265_v43 = vld [vmem:[%s15244_s1 + $0x1c] sm:$0xf] }
 0x1d7   : > { %13267 = vmatpush3.msk.msra.mxu0 %vm198_vm0, %v12255_v32  ;;  %13309 = vmatmul.mubr.msk.f32.vlgmr.msra.gmra.mrb[12].mxu1 %vm193_vm2, %v11141_v44 }
 0x1d8   : > { %13312 = vmatpush3.msk.msra.mxu1 %vm198_vm0, %v12298_v33  ;;  %13268 = vmatprep.mubr.msk.f32.mxu0 %vm193_vm2, %v14982_v49  ;;  %v12308_v49 = vld [vmem:[%s15244_s1 + $0x1c] sm:$0xf] }
 0x1d9   : > { %13271 = vmatprep.subr.msk.mxu0 %vm198_vm0, %v12261_v53  ;;  %13313 = vmatprep.mubr.msk.f32.mxu1 %vm193_vm2, %v11230_v54 }
 0x1da   : > { %13316 = vmatprep.subr.msk.mxu1 %vm198_vm0, %v12304_v45 }
 0x1de   : > { %13269 = vmatmul.mubr.msk.f32.vlgmr.msra.gmra.mrb[12].mxu0 %vm193_vm2, %v14976_v48  ;;  %v12303_v48 = vld [vmem:[%s13754_s9 + $0xf8] sm:$0xff]  ;;  %s169_s9 = sand.u32 1, %s13649_s13  }
 0x1df   : > { %13272 = vmatpush3.msk.msra.mxu0 %vm198_vm0, %v12261_v53  ;;  %13314 = vmatmul.mubr.msk.f32.vlgmr.msra.gmra.mrb[12].mxu1 %vm193_vm2, %v11229_v52  ;;  %v11407_v57 = vrot.slane %v12303_v48, 1  ;;  %v11495_v62 = vrot.slane %v12303_v48, 2  ;;  %s11612_s6 = scalar_lea.sflag [#allocation3], %s169_s9 }
 0x1e0   : > { %13317 = vmatpush3.msk.msra.mxu1 %vm198_vm0, %v12304_v45  ;;  %13273 = vmatprep.mubr.msk.f32.mxu0 %vm193_vm2, %v12288_v37 }
 0x1e1   : > { %13276 = vmatprep.subr.msk.mxu0 %vm198_vm0, %v12265_v43  ;;  %13318 = vmatprep.mubr.msk.f32.mxu1 %vm193_vm2, %v12302_v55  ;;  %v11408_v59 = vsel %vm189_vm1, %v11406_v56, %v11407_v57  ;;  %v11496_v63 = vsel %vm361_vm3, %v11494_v61, %v11495_v62 }
 0x1e2   : > { %13321 = vmatprep.subr.msk.mxu1 %vm198_vm0, %v12308_v49 }
 0x1e6   : > { %13274 = vmatmul.mubr.msk.f32.vlgmr.msra.gmra.mrb[12].mxu0 %vm193_vm2, %v12289_v35 }
 0x1e7   : > { %13277 = vmatpush3.msk.msra.mxu0 %vm198_vm0, %v12265_v43  ;;  %13319 = vmatmul.mubr.msk.f32.vlgmr.msra.gmra.mrb[12].mxu1 %vm193_vm2, %v12303_v48 }
 0x1e8   : > { %13322 = vmatpush3.msk.msra.mxu1 %vm198_vm0, %v12308_v49  ;;  %13278 = vmatprep.mubr.msk.f32.mxu0 %vm193_vm2, %v11142_v41 }
 0x1e9   : > { %13281 = vmatprep.subr.msk.mxu0 %vm198_vm0, %v12269_v58  ;;  %13323 = vmatprep.mubr.msk.f32.mxu1 %vm193_vm2, %v11408_v59 }
 0x1ea   : > { %13326 = vmatprep.subr.msk.mxu1 %vm198_vm0, %v12312_v60 }
 0x1ee   : > { %13279 = vmatmul.mubr.msk.f32.vlgmr.msra.gmra.mrb[12].mxu0 %vm193_vm2, %v11141_v44 }
 0x1ef   : > { %13282 = vmatpush3.msk.msra.mxu0 %vm198_vm0, %v12269_v58  ;;  %13324 = vmatmul.mubr.msk.f32.vlgmr.msra.gmra.mrb[12].mxu1 %vm193_vm2, %v11407_v57 }
 0x1f0   : > { %13327 = vmatpush3.msk.msra.mxu1 %vm198_vm0, %v12312_v60  ;;  %13283 = vmatprep.mubr.msk.f32.mxu0 %vm193_vm2, %v11230_v54 }
 0x1f1   : > { %13328 = vmatprep.mubr.msk.f32.mxu1 %vm193_vm2, %v11496_v63 }
 0x1f6   : > { %13284 = vmatmul.mubr.msk.f32.vlgmr.msra.gmra.mrb[12].mxu0 %vm193_vm2, %v11229_v52 }
 0x1f7   : > { %13329 = vmatmul.mubr.msk.f32.vlgmr.msra.gmra.mrb[12].mxu1 %vm193_vm2, %v11495_v62 }
 0x1fd   : > { %v13015_v0 = vpop.f32.mrb[6].mxu0 }
 0x1fe   : > { %12016 = vst [vmem:[%s14586_s20 + $0x68] sm:$0x3f] %v13015_v0  ;;  %v5879_v1 = vsel %vm361_vm3, %v13015_v0, 0.0  ;;  %v5889_v2 = vmul.f32 %v13015_v0, %v13015_v0  ;;  %v13060_v3 = vpop.f32.mrb[6].mxu1  ;;  %v5865_v4 = vpop.f32.mrb[7].mxu0 }
 0x1ff   : > { %12059 = vst [vmem:[%s14586_s20 + $0x78] sm:$0x3f] %v13060_v3  ;;  %v6694_v5 = vsel %vm361_vm3, %v13060_v3, 0.0  ;;  %v6704_v6 = vmul.f32 %v13060_v3, %v13060_v3  ;;  %12015 = vst [vmem:[%s14586_s20 + $0x60] sm:$0xff] %v5865_v4  ;;  %v5880_v7 = vadd.f32 %v5879_v1, %v5865_v4  ;;  %v5888_v9 = vmul.f32 %v5865_v4, %v5865_v4  ;;  %v6680_v8 = vpop.f32.mrb[7].mxu1 }
 0x200   : > { %v5890_v10 = vsel %vm361_vm3, %v5889_v2, 0.0  ;;  %12058 = vst [vmem:[%s14586_s20 + $0x70] sm:$0xff] %v6680_v8  ;;  %v6695_v12 = vadd.f32 %v6694_v5, %v6680_v8  ;;  %v6703_v14 = vmul.f32 %v6680_v8, %v6680_v8 }
 0x201   : > { %v6705_v16 = vsel %vm361_vm3, %v6704_v6, 0.0  ;;  %v5881_v13 = vrot.slane %v5880_v7, 4  ;;  %v5891_v20 = vadd.f32 %v5890_v10, %v5888_v9 }
 0x202   : > { %v6696_v21 = vrot.slane %v6695_v12, 4  ;;  %v6706_v15 = vadd.f32 %v6705_v16, %v6703_v14 }
 0x203   : > { %v5882_v19 = vadd.f32 %v5881_v13, %v5880_v7  ;;  %v5892_v25 = vrot.slane %v5891_v20, 4 }
 0x204   : > { %v6697_v24 = vadd.f32 %v6696_v21, %v6695_v12  ;;  %v6707_v26 = vrot.slane %v6706_v15, 4 }
 0x205   : > { %v5883_v17 = vrot.slane %v5882_v19, 2  ;;  %v5893_v23 = vadd.f32 %v5892_v25, %v5891_v20 }
 0x206   : > { %v6698_v28 = vrot.slane %v6697_v24, 2  ;;  %v6708_v30 = vadd.f32 %v6707_v26, %v6706_v15 }
 0x207   : > { %v5884_v27 = vadd.f32 %v5883_v17, %v5882_v19  ;;  %v5894_v11 = vrot.slane %v5893_v23, 2 }
 0x208   : > { %v6699_v36 = vadd.f32 %v6698_v28, %v6697_v24  ;;  %v6709_v37 = vrot.slane %v6708_v30, 2 }
 0x209   : > { %v5885_v18 = vrot.slane %v5884_v27, 1  ;;  %v5895_v22 = vadd.f32 %v5894_v11, %v5893_v23 }
 0x20a   : > { %v6700_v31 = vrot.slane %v6699_v36, 1  ;;  %v6710_v39 = vadd.f32 %v6709_v37, %v6708_v30 }
 0x20b   : > { %v5886_v38 = vadd.f32 %v5885_v18, %v5884_v27  ;;  %v5896_v40 = vrot.slane %v5895_v22, 1 }
 0x20c   : > { %v6711_v29 = vrot.slane %v6710_v39, 1  ;;  %v6701_v44 = vadd.f32 %v6700_v31, %v6699_v36 }
 0x20d   : > { %v5887_v35 = vadd.f32 %v5886_v38, %v15083_v47  ;;  %v5897_v42 = vadd.f32 %v5896_v40, %v5895_v22 }
 0x20e   : > { %v6712_v32 = vadd.f32 %v6711_v29, %v6710_v39 }
 0x20f   : > { %v5898_v46 = vadd.f32 %v5897_v42, %v15085_v51  ;;  %v6702_v50 = vadd.f32 %v6701_v44, %v5887_v35 }
 0x211   : > { %v6713_v41 = vadd.f32 %v6712_v32, %v5898_v46 }
 0x241   : > { %v13105_v33 = vpop.f32.mrb[8].mxu0 }
 0x242   : > { %12102 = vst [vmem:[%s14586_s20 + $0x88] sm:$0x3f] %v13105_v33  ;;  %v7509_v34 = vsel %vm361_vm3, %v13105_v33, 0.0  ;;  %v7519_v52 = vmul.f32 %v13105_v33, %v13105_v33  ;;  %v13150_v53 = vpop.f32.mrb[8].mxu1  ;;  %v7495_v54 = vpop.f32.mrb[9].mxu0 }
 0x243   : > { %12145 = vst [vmem:[%s14586_s20 + $0x98] sm:$0x3f] %v13150_v53  ;;  %v8324_v45 = vsel %vm361_vm3, %v13150_v53, 0.0  ;;  %v8334_v47 = vmul.f32 %v13150_v53, %v13150_v53  ;;  %12101 = vst [vmem:[%s14586_s20 + $0x80] sm:$0xff] %v7495_v54  ;;  %v7510_v43 = vadd.f32 %v7509_v34, %v7495_v54  ;;  %v7518_v55 = vmul.f32 %v7495_v54, %v7495_v54  ;;  %v8310_v49 = vpop.f32.mrb[9].mxu1 }
 0x244   : > { %v7520_v51 = vsel %vm361_vm3, %v7519_v52, 0.0  ;;  %12144 = vst [vmem:[%s14586_s20 + $0x90] sm:$0xff] %v8310_v49  ;;  %v8325_v48 = vadd.f32 %v8324_v45, %v8310_v49  ;;  %v8333_v56 = vmul.f32 %v8310_v49, %v8310_v49 }
 0x245   : > { %v8335_v57 = vsel %vm361_vm3, %v8334_v47, 0.0  ;;  %v7511_v58 = vrot.slane %v7510_v43, 4  ;;  %v7521_v59 = vadd.f32 %v7520_v51, %v7518_v55 }
 0x246   : > { %v8326_v60 = vrot.slane %v8325_v48, 4  ;;  %v8336_v61 = vadd.f32 %v8335_v57, %v8333_v56 }
 0x247   : > { %v7512_v62 = vadd.f32 %v7511_v58, %v7510_v43  ;;  %v7522_v63 = vrot.slane %v7521_v59, 4 }
 0x248   : > { %v8327_v0 = vadd.f32 %v8326_v60, %v8325_v48  ;;  %v8337_v1 = vrot.slane %v8336_v61, 4 }
 0x249   : > { %v7513_v2 = vrot.slane %v7512_v62, 2  ;;  %v7523_v3 = vadd.f32 %v7522_v63, %v7521_v59 }
 0x24a   : > { %v8328_v4 = vrot.slane %v8327_v0, 2  ;;  %v8338_v5 = vadd.f32 %v8337_v1, %v8336_v61 }
 0x24b   : > { %v7514_v6 = vadd.f32 %v7513_v2, %v7512_v62  ;;  %v7524_v7 = vrot.slane %v7523_v3, 2 }
 0x24c   : > { %v8329_v9 = vadd.f32 %v8328_v4, %v8327_v0  ;;  %v8339_v8 = vrot.slane %v8338_v5, 2 }
 0x24d   : > { %v7515_v10 = vrot.slane %v7514_v6, 1  ;;  %v7525_v12 = vadd.f32 %v7524_v7, %v7523_v3 }
 0x24e   : > { %v8330_v14 = vrot.slane %v8329_v9, 1  ;;  %v8340_v16 = vadd.f32 %v8339_v8, %v8338_v5 }
 0x24f   : > { %v7516_v13 = vadd.f32 %v7515_v10, %v7514_v6  ;;  %v7526_v20 = vrot.slane %v7525_v12, 1 }
 0x250   : > { %v8341_v21 = vrot.slane %v8340_v16, 1  ;;  %v8331_v25 = vadd.f32 %v8330_v14, %v8329_v9 }
 0x251   : > { %v7517_v15 = vadd.f32 %v7516_v13, %v6702_v50  ;;  %v7527_v19 = vadd.f32 %v7526_v20, %v7525_v12 }
 0x252   : > { %v8342_v17 = vadd.f32 %v8341_v21, %v8340_v16 }
 0x253   : > { %v7528_v24 = vadd.f32 %v7527_v19, %v6713_v41  ;;  %v8332_v26 = vadd.f32 %v8331_v25, %v7517_v15 }
 0x255   : > { %v8343_v23 = vadd.f32 %v8342_v17, %v7528_v24 }
 0x285   : > { %v13195_v28 = vpop.f32.mrb[10].mxu0 }
 0x286   : > { %12188 = vst [vmem:[%s14586_s20 + $0xa8] sm:$0x3f] %v13195_v28  ;;  %v9139_v30 = vsel %vm361_vm3, %v13195_v28, 0.0  ;;  %v9149_v27 = vmul.f32 %v13195_v28, %v13195_v28  ;;  %v13240_v11 = vpop.f32.mrb[10].mxu1  ;;  %v9125_v36 = vpop.f32.mrb[11].mxu0 }
 0x287   : > { %12231 = vst [vmem:[%s14586_s20 + $0xb8] sm:$0x3f] %v13240_v11  ;;  %v9954_v37 = vsel %vm361_vm3, %v13240_v11, 0.0  ;;  %v9964_v18 = vmul.f32 %v13240_v11, %v13240_v11  ;;  %12187 = vst [vmem:[%s14586_s20 + $0xa0] sm:$0xff] %v9125_v36  ;;  %v9140_v22 = vadd.f32 %v9139_v30, %v9125_v36  ;;  %v9148_v31 = vmul.f32 %v9125_v36, %v9125_v36  ;;  %v9940_v39 = vpop.f32.mrb[11].mxu1 }
 0x288   : > { %v9150_v38 = vsel %vm361_vm3, %v9149_v27, 0.0  ;;  %12230 = vst [vmem:[%s14586_s20 + $0xb0] sm:$0xff] %v9940_v39  ;;  %v9955_v40 = vadd.f32 %v9954_v37, %v9940_v39  ;;  %v9963_v29 = vmul.f32 %v9940_v39, %v9940_v39 }
 0x289   : > { %v9965_v35 = vsel %vm361_vm3, %v9964_v18, 0.0  ;;  %v9141_v42 = vrot.slane %v9140_v22, 4  ;;  %v9151_v44 = vadd.f32 %v9150_v38, %v9148_v31 }
 0x28a   : > { %v9956_v46 = vrot.slane %v9955_v40, 4  ;;  %v9966_v50 = vadd.f32 %v9965_v35, %v9963_v29 }
 0x28b   : > { %v9142_v32 = vadd.f32 %v9141_v42, %v9140_v22  ;;  %v9152_v41 = vrot.slane %v9151_v44, 4 }
 0x28c   : > { %v9957_v33 = vadd.f32 %v9956_v46, %v9955_v40  ;;  %v9967_v34 = vrot.slane %v9966_v50, 4 }
 0x28d   : > { %v9143_v52 = vrot.slane %v9142_v32, 2  ;;  %v9153_v53 = vadd.f32 %v9152_v41, %v9151_v44 }
 0x28e   : > { %v9958_v54 = vrot.slane %v9957_v33, 2  ;;  %v9968_v45 = vadd.f32 %v9967_v34, %v9966_v50 }
 0x28f   : > { %v9144_v47 = vadd.f32 %v9143_v52, %v9142_v32  ;;  %v9154_v43 = vrot.slane %v9153_v53, 2 }
 0x290   : > { %v9959_v55 = vadd.f32 %v9958_v54, %v9957_v33  ;;  %v9969_v49 = vrot.slane %v9968_v45, 2 }
 0x291   : > { %v9145_v51 = vrot.slane %v9144_v47, 1  ;;  %v9155_v48 = vadd.f32 %v9154_v43, %v9153_v53 }
 0x292   : > { %v9960_v56 = vrot.slane %v9959_v55, 1  ;;  %v9970_v57 = vadd.f32 %v9969_v49, %v9968_v45 }
 0x293   : > { %v9146_v58 = vadd.f32 %v9145_v51, %v9144_v47  ;;  %v9156_v59 = vrot.slane %v9155_v48, 1 }
 0x294   : > { %v9971_v60 = vrot.slane %v9970_v57, 1  ;;  %v9961_v63 = vadd.f32 %v9960_v56, %v9959_v55 }
 0x295   : > { %v9147_v61 = vadd.f32 %v9146_v58, %v8332_v26  ;;  %v9157_v62 = vadd.f32 %v9156_v59, %v9155_v48 }
 0x296   : > { %v9972_v2 = vadd.f32 %v9971_v60, %v9970_v57 }
 0x297   : > { %v9158_v0 = vadd.f32 %v9157_v62, %v8343_v23  ;;  %v9962_v1 = vadd.f32 %v9961_v63, %v9147_v61 }
 0x299   : > { %v9973_v3 = vadd.f32 %v9972_v2, %v9158_v0 }
 0x2c9   : > { %v13285_v4 = vpop.f32.mrb[12].mxu0 }
 0x2ca   : > { %12274 = vst [vmem:[%s14586_s20 + $0xc8] sm:$0x3f] %v13285_v4  ;;  %v10779_v5 = vmul.f32 %v13285_v4, %v13285_v4  ;;  %v13330_v6 = vpop.f32.mrb[12].mxu1  ;;  %v10755_v7 = vpop.f32.mrb[13].mxu0  ;;  %v10769_v9 = vsel %vm361_vm3, %v13285_v4, 0.0 }
 0x2cb   : > { %12317 = vst [vmem:[%s14586_s20 + $0xd8] sm:$0x3f] %v13330_v6  ;;  %v11594_v8 = vmul.f32 %v13330_v6, %v13330_v6  ;;  %12273 = vst [vmem:[%s14586_s20 + $0xc0] sm:$0xff] %v10755_v7  ;;  %v10770_v10 = vadd.f32 %v10769_v9, %v10755_v7  ;;  %v10778_v12 = vmul.f32 %v10755_v7, %v10755_v7  ;;  %v11570_v14 = vpop.f32.mrb[13].mxu1  ;;  %v11584_v16 = vsel %vm361_vm3, %v13330_v6, 0.0 }
 0x2cc   : > { %v10780_v13 = vsel %vm361_vm3, %v10779_v5, 0.0  ;;  %12316 = vst [vmem:[%s14586_s20 + $0xd0] sm:$0xff] %v11570_v14  ;;  %v11585_v20 = vadd.f32 %v11584_v16, %v11570_v14  ;;  %v11593_v21 = vmul.f32 %v11570_v14, %v11570_v14  ;;  %s11716_s20 = sshll.u32 %s169_s9, 1 }
 0x2cd   : > { %v10771_v15 = vrot.slane %v10770_v10, 4  ;;  %v10781_v19 = vadd.f32 %v10780_v13, %v10778_v12  ;;  %v11595_v25 = vsel %vm361_vm3, %v11594_v8, 0.0  ;;  %s171_s27 = scalar_lea.vmem [#allocation2], %s11716_s20 }
 0x2ce   : > { %v11586_v24 = vrot.slane %v11585_v20, 4  ;;  %v11596_v26 = vadd.f32 %v11595_v25, %v11593_v21  ;;  %s11628_s28 = sshll.u32 %s171_s27, 4  ;;  %s15203_s28 = int_to_ptr.vmem [resolvable:$true] %s11628_s28 }
 0x2cf   : > { %v10772_v17 = vadd.f32 %v10771_v15, %v10770_v10  ;;  %v10782_v23 = vrot.slane %v10781_v19, 4  ;;  %s13595_s16 = scalar_lea.vmem %s15203_s28, 32  ;;  %p13602_p0 = scmp.lt.s32.totalorder %s15203_s28, %s13600_s8 }
 0x2d0   : > { %v11587_v28 = vadd.f32 %v11586_v24, %v11585_v20  ;;  %v11597_v30 = vrot.slane %v11596_v26, 4  ;;  %p13596_p11 = scmp.ne.s32.totalorder %s15203_s28, %s13595_s16  ;;  %p13603_p1 = scmp.lt.s32.totalorder %s13601_s10, %s13595_s16 }
 0x2d1   : > { %v10773_v27 = vrot.slane %v10772_v17, 2  ;;  %v10783_v11 = vadd.f32 %v10782_v23, %v10781_v19 }
 0x2d2   : > { %v11588_v36 = vrot.slane %v11587_v28, 2  ;;  %v11598_v37 = vadd.f32 %v11597_v30, %v11596_v26  ;;  %p13597_p12 = pnand %p13596_p11, %p13718_p5  ;;  %p13604_p2 = por %p13603_p1, %p13602_p0 }
 0x2d3   : > { %v10774_v18 = vadd.f32 %v10773_v27, %v10772_v17  ;;  %v10784_v22 = vrot.slane %v10783_v11, 2 }
 0x2d4   : > { %v11589_v31 = vadd.f32 %v11588_v36, %v11587_v28  ;;  %v11599_v39 = vrot.slane %v11598_v37, 2  ;;  %p13598_p13 = pneg %p13597_p12 }
 0x2d5   : > { %v10775_v38 = vrot.slane %v10774_v18, 1  ;;  %v10785_v40 = vadd.f32 %v10784_v22, %v10783_v11 }
 0x2d6   : > { %v11590_v29 = vrot.slane %v11589_v31, 1  ;;  %v11600_v35 = vadd.f32 %v11599_v39, %v11598_v37  ;;  %p13605_p3 = pnand %p13604_p2, %p13598_p13 }
 0x2d7   : > { %v10776_v42 = vadd.f32 %v10775_v38, %v10774_v18  ;;  %v10786_v44 = vrot.slane %v10785_v40, 1 }
 0x2d8   : > { %v11601_v46 = vrot.slane %v11600_v35, 1  ;;  %v11591_v32 = vadd.f32 %v11590_v29, %v11589_v31 }
 0x2d9   : > { %v10787_v50 = vadd.f32 %v10786_v44, %v10785_v40  ;;  %v10777_v41 = vadd.f32 %v10776_v42, %v9962_v1 }
 0x2da   : > { %v11602_v52 = vadd.f32 %v11601_v46, %v11600_v35 }
 0x2db   : > { %v10788_v33 = vadd.f32 %v10787_v50, %v9973_v3  ;;  %v11592_v34 = vadd.f32 %v11591_v32, %v10777_v41 }
 0x2dd   : > { %v11603_v53 = vadd.f32 %v11602_v52, %v10788_v33  ;;  %11604 = vst [vmem:[%s171_s27] sm:$0x1] %v11592_v34 }
 0x2df   : > { %11605 = vst [vmem:[%s171_s27 + $0x1] sm:$0x1] %v11603_v53 }
 0x2e0   : > { %13608 = shalt.err (!%p13605_p3)
}
 0x2e1   : > { %s13609_s11 = scalar_lea.hbm %s15201_s4, 32  ;;  %s13613_s19 = scalar_lea.hbm %s15246_s3, 64 }
 0x2e2   : > { %p13610_p4 = scmp.ne.s32.totalorder %s15201_s4, %s13609_s11  ;;  %p13614_p9 = scmp.lt.u32.totalorder %s15201_s4, %s15246_s3 }
 0x2e3   : > { %p13615_p10 = scmp.lt.u32.totalorder %s13613_s19, %s13609_s11  ;;  %p13617_p12 = scmp.lt.u32.totalorder %s13609_s11, %s15201_s4 }
 0x2e4   : > { %p13611_p7 = pnand %p13610_p4, %p13718_p5 }
 0x2e5   : > { %p13616_p11 = por %p13615_p10, %p13614_p9 }
 0x2e6   : > { %p13612_p8 = pneg %p13611_p7 }
 0x2e7   : > { %p13618_p13 = por %p13617_p12, %p13616_p11 }
 0x2e9   : > { %p13619_p0 = pnand %p13618_p13, %p13612_p8 }
 0x2eb   : > { %13622 = shalt.err (!%p13619_p0)
}
 0x2ec   : > { %13556 = dma.vmem_to_hbm [thread:$0]  (%p13718_p5), %s15203_s28, 32, %s15201_s4, %s11612_s6  }
 0x2ed PF: > { %p13562_p1 = scmp.ge.s32.totalorder %s13657_s15, 2  ;;  %s11648_s9 = sand.u32 1, %s13645_s12  }
 0x2ee   : > { %s11649_s20 = scalar_lea.sflag [#allocation3], %s11648_s9 }
 0x2ef   : > { %p13559_p2 = pnand %p13562_p1, %p13722_p6 }
 0x2f1   : > { %13640 = dma.done.wait (!%p13559_p2), %s11649_s20, 32  }
 0x2f2   : > { %13642 = vsyncadd (!%p13559_p2), %s11649_s20, 4294967264  ;;  %p14_p3 = scmp.ge.s32.totalorder %s13705_s18, 4   ;;  %s15249_s12 = smov %s13649_s13 }
 0x2f3   : > { %s15250_s13 = smov %s13653_s14  ;;  %s15251_s14 = smov %s13716_s21 }
 0x2f4   : > { %s15252_s15 = smov %s13705_s18  ;;  %16 = sbr.rel (!%p14_p3) target bundleno = 3 (0x3), region = 111 }
 0x2fb   :  { %11654 = vsyncpa [#allocation3], 1 }
 0x2fc   :  { %11656 = vsyncpa [#allocation3 + $0x1], 1 }

</bundles_post_ra>
